<compile_context>
chip_gen: v7x
topology: tpu7x:2x2x1
jax: 0.10.0
libtpu: 0.0.40
codegen_flags: <defaults>
</compile_context>

<pallas_src>
import functools

import jax
import jax.numpy as jnp
import numpy as np
from jax.experimental import pallas as pl
from jax.experimental.pallas import tpu as pltpu

_LANES = 128


def _phase_layout(H, W, KH):
    """Static metadata for the phase decomposition of the zero-padded activation.

    Padding is (KH//2) rows and 1 column per side.  Phase (rp, cp) holds the
    padded positions with row parity rp / col parity cp, so a stride-2 conv tap
    (kh, kw) reads a contiguous slab of phase (kh % 2, kw % 2).
    Each entry: (rp, cp, h0, w0, ro, co, nr, nc, R, Wc).
    """
    pad_h = KH // 2
    Hp, Wp = H + 2 * pad_h, W + 2
    metas = []
    for rp in range(2 if KH == 3 else 1):
        h0 = (rp - pad_h) % 2          # first original row landing in this phase
        nr = (H - h0 + 1) // 2         # original rows in this phase
        ro = (h0 + pad_h) // 2         # scratch row offset of that data
        R = (Hp - rp + 1) // 2         # padded rows of this parity
        for cp in range(2):
            w0 = (cp - 1) % 2
            nc = (W - w0 + 1) // 2
            co = (w0 + 1) // 2
            Wc = (Wp - cp + 1) // 2
            metas.append((rp, cp, h0, w0, ro, co, nr, nc, R, Wc))
    return metas


def _tap_table(KH):
    """(phase index, row offset, col offset) for every conv tap (kh, kw)."""
    taps = []
    for kh in range(KH):
        for kw in range(3):
            if KH == 3:
                p = (kh % 2) * 2 + (kw % 2)
            else:
                p = kw % 2
            taps.append((p, kh // 2, kw // 2))
    return tuple(taps)


def _downsample_kernel(*refs, n_ph, phase_meta, taps, H_out, W_out,
                       inv_count, eps, normalize):
    """GroupNorm (optional) + k=3 / stride-2 / pad-1 conv, phase-decomposed.

    refs layout:
      [0:n_ph]                       x phase inputs, each (1, nr, nc, C)
      [n_ph+0] gamma (1, C)          [n_ph+1] beta (1, C)
      [n_ph+2] gm (C, G)             [n_ph+3] gmt (G, C)
      [n_ph+4] w (T, C, TCO)         [n_ph+5] bias (1, TCO)
      [n_ph+6] o (1, H_out, W_out, TCO)
      [n_ph+7:]                      phase scratches, each (R, Wc, C) conv dtype
    """
    x_refs = refs[:n_ph]
    gamma_ref, beta_ref, gm_ref, gmt_ref, w_ref, bias_ref, o_ref = refs[n_ph:n_ph + 7]
    s_refs = refs[n_ph + 7:]

    f32 = jnp.float32
    C = x_refs[0].shape[-1]
    j = pl.program_id(1)

    # ---- GroupNorm + padded/de-interleaved scratch fill: once per image ------
    @pl.when(j == 0)
    def _fill():
        if normalize:
            # pass 1: per-channel sums (stats in f32)
            s1 = jnp.zeros((1, C), f32)
            for p in range(n_ph):
                xp = x_refs[p][0].astype(f32)
                s1 = s1 + jnp.sum(xp.reshape(-1, C), axis=0, keepdims=True)
            g_mean = jnp.dot(s1, gm_ref[...], preferred_element_type=f32) * inv_count
            mean_c = jnp.dot(g_mean, gmt_ref[...], preferred_element_type=f32)   # (1,C)
            # pass 2: centered sum of squares (numerically safe)
            s2 = jnp.zeros((1, C), f32)
            for p in range(n_ph):
                xc = x_refs[p][0].astype(f32).reshape(-1, C) - mean_c
                s2 = s2 + jnp.sum(xc * xc, axis=0, keepdims=True)
            g_var = jnp.dot(s2, gm_ref[...], preferred_element_type=f32) * inv_count
            inv_c = jnp.dot(jax.lax.rsqrt(g_var + eps), gmt_ref[...],
                            preferred_element_type=f32)                          # (1,C)
            # fold the mean into the affine: y = x * scale + shift
            scale = (gamma_ref[...] * inv_c).reshape(1, 1, C)
            shift = (beta_ref[...] - mean_c * gamma_ref[...] * inv_c).reshape(1, 1, C)

        for p in range(n_ph):
            _, _, _, _, ro, co, nr, nc, R, Wc = phase_meta[p]
            s = s_refs[p]
            xp = x_refs[p][0].astype(f32)
            if normalize:
                y = xp * scale + shift
            else:
                y = xp
            s[ro:ro + nr, co:co + nc, :] = y.astype(s.dtype)
            # zero the conv-padding borders (written once per image)
            if ro > 0:
                s[0:ro, :, :] = jnp.zeros((ro, Wc, C), s.dtype)
            if ro + nr < R:
                s[ro + nr:R, :, :] = jnp.zeros((R - ro - nr, Wc, C), s.dtype)
            if co > 0:
                s[:, 0:co, :] = jnp.zeros((R, co, C), s.dtype)
            if co + nc < Wc:
                s[:, co + nc:Wc, :] = jnp.zeros((R, Wc - co - nc, C), s.dtype)

    # ---- conv: one MXU matmul per tap, every tap a contiguous slab read ------
    tco = o_ref.shape[-1]
    acc = jnp.zeros((H_out * W_out, tco), f32)
    for t, (p, r0, c0) in enumerate(taps):
        slab = s_refs[p][r0:r0 + H_out, c0:c0 + W_out, :]        # (H_out, W_out, C)
        acc = acc + jnp.dot(slab.reshape(H_out * W_out, C), w_ref[t],
                            preferred_element_type=f32)
    out = acc + bias_ref[...]
    o_ref[0] = out.reshape(H_out, W_out, tco).astype(o_ref.dtype)


def _tpu_params():
    """(VMEM capacity bytes, prefer 256-wide Cout tiles) for the local device."""
    vmem_cap = 128 * 1024 * 1024
    try:
        vmem_cap = int(pltpu.get_tpu_info().vmem_capacity_bytes)
    except Exception:
        pass
    pref256 = False
    try:
        kind = jax.devices()[0].device_kind.lower()
        pref256 = ("v6" in kind) or ("v7" in kind)   # 256-wide MXU generations
    except Exception:
        pass
    return vmem_cap, pref256


def _downsample_pallas(x_nhwc, gamma, beta, w_taps, bias, *, groups, normalize,
                       KH, eps, conv_dtype):
    N, H, W, C = map(int, x_nhwc.shape)
    T, _, Cout = map(int, w_taps.shape)
    assert T == 3 * KH
    pad_h = KH // 2
    H_out = (H + 2 * pad_h - KH) // 2 + 1
    W_out = (W - 1) // 2 + 1

    # Lane-dense output: pad Cout up to a multiple of 128 with zeros, slice after.
    Cout_p = -(-Cout // _LANES) * _LANES
    if Cout_p != Cout:
        w_taps = jnp.pad(w_taps, ((0, 0), (0, 0), (0, Cout_p - Cout)))
        bias = jnp.pad(jnp.asarray(bias), ((0, Cout_p - Cout),))

    metas = _phase_layout(H, W, KH)
    taps = _tap_table(KH)
    n_ph = len(metas)

    # De-interleave the (unpadded) input into phases in the wrapper; the conv
    # zero-padding borders live only in the VMEM scratch and are zeroed once.
    x_phases = [x_nhwc[:, h0::2, w0::2, :] for (_, _, h0, w0, *_r) in metas]
    for ph_arr, (_, _, _, _, _, _, nr, nc, _, _) in zip(x_phases, metas):
        assert tuple(ph_arr.shape[1:3]) == (nr, nc), (ph_arr.shape, nr, nc)

    G = int(groups) if normalize else 1
    assert C % G == 0
    cg = C // G
    gm_np = (np.arange(C)[:, None] // cg == np.arange(G)[None, :]).astype(np.float32)
    gm = jnp.asarray(gm_np)                              # channel -> group one-hot
    gmt = jnp.asarray(np.ascontiguousarray(gm_np.T))     # group -> channel one-hot

    if not normalize:
        gamma = jnp.ones((C,), jnp.float32)
        beta = jnp.zeros((C,), jnp.float32)
    gamma2 = jnp.asarray(gamma, jnp.float32).reshape(1, C)
    beta2 = jnp.asarray(beta, jnp.float32).reshape(1, C)
    bias2 = jnp.asarray(bias, jnp.float32).reshape(1, Cout_p)
    w_taps = jnp.asarray(w_taps, jnp.float32).astype(conv_dtype)   # (T, C, Cout_p)

    # Cout tiling + VMEM budget per TPU generation.
    vmem_cap, pref256 = _tpu_params()
    vmem_limit = int(min(vmem_cap * 7 // 8, 112 * 1024 * 1024))
    conv_bytes = jnp.dtype(conv_dtype).itemsize

    def vmem_est(tco):
        x_blk = 2 * 4 * H * W * C                         # phase inputs (double buf)
        w_blk = 2 * conv_bytes * T * C * tco              # weight block (double buf)
        o_blk = 2 * 4 * H_out * W_out * tco               # output block (double buf)
        scr = sum(conv_bytes * m[8] * m[9] * C for m in metas)
        acc = 4 * H_out * W_out * tco
        return x_blk + w_blk + o_blk + scr + acc + (2 << 20)

    TCO = 128
    if pref256 and Cout_p % 256 == 0 and vmem_est(256) <= vmem_limit:
        TCO = 256
    n_co = Cout_p // TCO

    kernel = functools.partial(
        _downsample_kernel, n_ph=n_ph, phase_meta=tuple(metas), taps=taps,
        H_out=H_out, W_out=W_out, inv_count=1.0 / float(H * W * cg),
        eps=float(eps), normalize=bool(normalize))

    in_specs = (
        [pl.BlockSpec((1,) + tuple(ph.shape[1:]), lambda n, j: (n, 0, 0, 0))
         for ph in x_phases]
        + [pl.BlockSpec((1, C), lambda n, j: (0, 0)),            # gamma
           pl.BlockSpec((1, C), lambda n, j: (0, 0)),            # beta
           pl.BlockSpec((C, G), lambda n, j: (0, 0)),            # channel -> group
           pl.BlockSpec((G, C), lambda n, j: (0, 0)),            # group -> channel
           pl.BlockSpec((T, C, TCO), lambda n, j: (0, 0, j)),    # per-tap weights
           pl.BlockSpec((1, TCO), lambda n, j: (0, j))])         # bias

    out = pl.pallas_call(
        kernel,
        out_shape=jax.ShapeDtypeStruct((N, H_out, W_out, Cout_p), jnp.float32),
        grid=(N, n_co),
        in_specs=in_specs,
        out_specs=pl.BlockSpec((1, H_out, W_out, TCO), lambda n, j: (n, 0, 0, j)),
        scratch_shapes=[pltpu.VMEM((m[8], m[9], C), conv_dtype) for m in metas],
        compiler_params=pltpu.CompilerParams(
            # j (Cout tiles) must be "arbitrary": GN/scratch fill only runs at
            # j == 0 and the scratch must stay on the same core across j.
            dimension_semantics=("parallel", "arbitrary"),
            vmem_limit_bytes=vmem_limit),
    )(*x_phases, gamma2, beta2, gm, gmt, w_taps, bias2)

    return out[..., :Cout] if Cout_p != Cout else out


def downsample_conv(x, gamma, beta, weight, bias, *, groups, use_2d, normalize,
                    eps=1e-5, conv_dtype=jnp.bfloat16):
    """ScriptedDownsampleConv.forward  (GroupNorm? -> Conv k=3, s=2, p=1).

    conv_dtype: dtype fed to the MXU for the convolution.  Defaults to bfloat16
    (f32 accumulation); pass jnp.float32 for bit-closer numerics at higher cost.
    """
    Cout = int(weight.shape[0])
    if use_2d:
        N, C, H, W = map(int, x.shape)
        assert H >= 2 and W >= 2
        x_nhwc = jnp.transpose(x, (0, 2, 3, 1)).astype(jnp.float32)          # (N,H,W,C)
        w_taps = jnp.transpose(weight, (2, 3, 1, 0)).reshape(9, C, Cout)     # (kh*3+kw,C,Co)
        out = _downsample_pallas(x_nhwc, gamma, beta, w_taps, bias,
                                 groups=groups, normalize=normalize, KH=3,
                                 eps=eps, conv_dtype=conv_dtype)
        return jnp.transpose(out, (0, 3, 1, 2))                              # NCHW
    # 1-D path: dummy H=1, KH=1 (no wasted taps).
    N, C, L = map(int, x.shape)
    assert L >= 2
    x_nhwc = jnp.transpose(x, (0, 2, 1)).astype(jnp.float32)[:, None, :, :]  # (N,1,L,C)
    w_taps = jnp.transpose(weight, (2, 1, 0)).reshape(3, C, Cout)            # (kw,C,Co)
    out = _downsample_pallas(x_nhwc, gamma, beta, w_taps, bias,
                             groups=groups, normalize=normalize, KH=1,
                             eps=eps, conv_dtype=conv_dtype)
    return jnp.transpose(out[:, 0], (0, 2, 1))                               # (N,Co,L_out)


def reference_forward(x, gamma, beta, weight, bias, *, groups, use_2d, normalize,
                      eps=1e-5):
    """Pure-JAX reference matching the PyTorch module semantics."""
    nd = 2 if use_2d else 1
    if normalize:
        N, C = x.shape[:2]
        xr = x.reshape(N, groups, -1)
        mean = xr.mean(axis=-1, keepdims=True)
        var = ((xr - mean) ** 2).mean(axis=-1, keepdims=True)
        xr = (xr - mean) * jax.lax.rsqrt(var + eps)
        x = xr.reshape(x.shape)
        pshape = (1, C) + (1,) * nd
        x = x * gamma.reshape(pshape) + beta.reshape(pshape)
    dn_str = ('NCHW', 'OIHW', 'NCHW') if use_2d else ('NCH', 'OIH', 'NCH')
    dn = jax.lax.conv_dimension_numbers(x.shape, weight.shape, dn_str)
    out = jax.lax.conv_general_dilated(x, weight, (2,) * nd, [(1, 1)] * nd,
                                       dimension_numbers=dn)
    return out + bias.reshape((1, -1) + (1,) * nd)


if __name__ == "__main__":
    key = jax.random.PRNGKey(0)
    ks = jax.random.split(key, 8)

    # module config: in_channels=16, out_channels=None (-> 16), normalize=True
    N, C, H, W = 2, 16, 16, 16
    Cout = C
    groups = min(C // 4, 32)              # GroupNorm group rule from the module (= 4)

    x2d = jax.random.normal(ks[0], (N, C, H, W), jnp.float32)
    gamma = 1.0 + 0.1 * jax.random.normal(ks[1], (C,), jnp.float32)
    beta = 0.1 * jax.random.normal(ks[2], (C,), jnp.float32)
    w2d = 0.1 * jax.random.normal(ks[3], (Cout, C, 3, 3), jnp.float32)
    bias = 0.1 * jax.random.normal(ks[4], (Cout,), jnp.float32)

    out2d = jax.block_until_ready(
        downsample_conv(x2d, gamma, beta, w2d, bias,
                        groups=groups, use_2d=True, normalize=True))
    ref2d = reference_forward(x2d, gamma, beta, w2d, bias,
                              groups=groups, use_2d=True, normalize=True)
    assert out2d.shape == (N, Cout, H // 2, W // 2), out2d.shape
    err2d = float(jnp.max(jnp.abs(out2d - ref2d)))
    assert err2d < 5e-2, err2d

    # use_2d=False variant (Conv1d path)
    L = 32
    x1d = jax.random.normal(ks[5], (N, C, L), jnp.float32)
    w1d = 0.1 * jax.random.normal(ks[6], (Cout, C, 3), jnp.float32)
    out1d = jax.block_until_ready(
        downsample_conv(x1d, gamma, beta, w1d, bias,
                        groups=groups, use_2d=False, normalize=True))
    ref1d = reference_forward(x1d, gamma, beta, w1d, bias,
                              groups=groups, use_2d=False, normalize=True)
    assert out1d.shape == (N, Cout, L // 2), out1d.shape
    err1d = float(jnp.max(jnp.abs(out1d - ref1d)))
    assert err1d < 5e-2, err1d

    print("KERNEL_OK")
</pallas_src>

<mosaic_0001>
module attributes {stable_mosaic.version = 11 : i64} {
  func.func @_downsample_kernel(%arg0: i32, %arg1: i32, %arg2: memref<1x8x8x16xf32, #tpu.memory_space<vmem>>, %arg3: memref<1x8x8x16xf32, #tpu.memory_space<vmem>>, %arg4: memref<1x8x8x16xf32, #tpu.memory_space<vmem>>, %arg5: memref<1x8x8x16xf32, #tpu.memory_space<vmem>>, %arg6: memref<1x16xf32, #tpu.memory_space<vmem>>, %arg7: memref<1x16xf32, #tpu.memory_space<vmem>>, %arg8: memref<16x4xf32, #tpu.memory_space<vmem>>, %arg9: memref<4x16xf32, #tpu.memory_space<vmem>>, %arg10: memref<9x16x128xbf16, #tpu.memory_space<vmem>>, %arg11: memref<1x128xf32, #tpu.memory_space<vmem>>, %arg12: memref<1x8x8x128xf32, #tpu.memory_space<vmem>>, %arg13: memref<9x9x16xbf16, #tpu.memory_space<vmem>>, %arg14: memref<9x9x16xbf16, #tpu.memory_space<vmem>>, %arg15: memref<9x9x16xbf16, #tpu.memory_space<vmem>>, %arg16: memref<9x9x16xbf16, #tpu.memory_space<vmem>>) attributes {dimension_semantics = [#tpu.dimension_semantics<parallel>, #tpu.dimension_semantics<arbitrary>], iteration_bounds = array<i64: 2, 1>, scalar_prefetch = 0 : i64, scratch_operands = 4 : i64, tpu.core_type = #tpu.core_type<tc>, window_params = [{transform_indices = @transform_0, window_bounds = array<i64: 1, 8, 8, 16>}, {transform_indices = @transform_1, window_bounds = array<i64: 1, 8, 8, 16>}, {transform_indices = @transform_2, window_bounds = array<i64: 1, 8, 8, 16>}, {transform_indices = @transform_3, window_bounds = array<i64: 1, 8, 8, 16>}, {pipeline_mode = #tpu.pipeline_mode<synchronous>, transform_indices = @transform_4, window_bounds = array<i64: 1, 16>}, {pipeline_mode = #tpu.pipeline_mode<synchronous>, transform_indices = @transform_5, window_bounds = array<i64: 1, 16>}, {pipeline_mode = #tpu.pipeline_mode<synchronous>, transform_indices = @transform_6, window_bounds = array<i64: 16, 4>}, {pipeline_mode = #tpu.pipeline_mode<synchronous>, transform_indices = @transform_7, window_bounds = array<i64: 4, 16>}, {transform_indices = @transform_8, window_bounds = array<i64: 9, 16, 128>}, {transform_indices = @transform_9, window_bounds = array<i64: 1, 128>}, {transform_indices = @transform_10, window_bounds = array<i64: 1, 8, 8, 128>}]} {
    %c0_i32 = arith.constant 0 : i32
    %0 = arith.cmpi eq, %arg1, %c0_i32 : i32
    %1 = arith.extui %0 : i1 to i32
    %c0_i32_0 = arith.constant 0 : i32
    %2 = arith.cmpi ne, %1, %c0_i32_0 : i32
    scf.if %2 {
      %cst_61 = arith.constant 0.000000e+00 : f32
      %65 = vector.broadcast %cst_61 : f32 to vector<1x16xf32>
      %c0_62 = arith.constant 0 : index
      %c0_63 = arith.constant 0 : index
      %c0_64 = arith.constant 0 : index
      %c0_65 = arith.constant 0 : index
      %66 = vector.load %arg2[%c0_62, %c0_63, %c0_64, %c0_65] : memref<1x8x8x16xf32, #tpu.memory_space<vmem>>, vector<1x8x8x16xf32>
      %67 = vector.shape_cast %66 : vector<1x8x8x16xf32> to vector<8x8x16xf32>
      %68 = vector.shape_cast %67 : vector<8x8x16xf32> to vector<64x16xf32>
      %cst_66 = arith.constant dense<0.000000e+00> : vector<16xf32>
      %69 = vector.multi_reduction <add>, %68, %cst_66 [0] : vector<64x16xf32> to vector<16xf32>
      %70 = vector.shape_cast %69 : vector<16xf32> to vector<1x16xf32>
      %71 = arith.addf %65, %70 : vector<1x16xf32>
      %c0_67 = arith.constant 0 : index
      %c0_68 = arith.constant 0 : index
      %c0_69 = arith.constant 0 : index
      %c0_70 = arith.constant 0 : index
      %72 = vector.load %arg3[%c0_67, %c0_68, %c0_69, %c0_70] : memref<1x8x8x16xf32, #tpu.memory_space<vmem>>, vector<1x8x8x16xf32>
      %73 = vector.shape_cast %72 : vector<1x8x8x16xf32> to vector<8x8x16xf32>
      %74 = vector.shape_cast %73 : vector<8x8x16xf32> to vector<64x16xf32>
      %cst_71 = arith.constant dense<0.000000e+00> : vector<16xf32>
      %75 = vector.multi_reduction <add>, %74, %cst_71 [0] : vector<64x16xf32> to vector<16xf32>
      %76 = vector.shape_cast %75 : vector<16xf32> to vector<1x16xf32>
      %77 = arith.addf %71, %76 : vector<1x16xf32>
      %c0_72 = arith.constant 0 : index
      %c0_73 = arith.constant 0 : index
      %c0_74 = arith.constant 0 : index
      %c0_75 = arith.constant 0 : index
      %78 = vector.load %arg4[%c0_72, %c0_73, %c0_74, %c0_75] : memref<1x8x8x16xf32, #tpu.memory_space<vmem>>, vector<1x8x8x16xf32>
      %79 = vector.shape_cast %78 : vector<1x8x8x16xf32> to vector<8x8x16xf32>
      %80 = vector.shape_cast %79 : vector<8x8x16xf32> to vector<64x16xf32>
      %cst_76 = arith.constant dense<0.000000e+00> : vector<16xf32>
      %81 = vector.multi_reduction <add>, %80, %cst_76 [0] : vector<64x16xf32> to vector<16xf32>
      %82 = vector.shape_cast %81 : vector<16xf32> to vector<1x16xf32>
      %83 = arith.addf %77, %82 : vector<1x16xf32>
      %c0_77 = arith.constant 0 : index
      %c0_78 = arith.constant 0 : index
      %c0_79 = arith.constant 0 : index
      %c0_80 = arith.constant 0 : index
      %84 = vector.load %arg5[%c0_77, %c0_78, %c0_79, %c0_80] : memref<1x8x8x16xf32, #tpu.memory_space<vmem>>, vector<1x8x8x16xf32>
      %85 = vector.shape_cast %84 : vector<1x8x8x16xf32> to vector<8x8x16xf32>
      %86 = vector.shape_cast %85 : vector<8x8x16xf32> to vector<64x16xf32>
      %cst_81 = arith.constant dense<0.000000e+00> : vector<16xf32>
      %87 = vector.multi_reduction <add>, %86, %cst_81 [0] : vector<64x16xf32> to vector<16xf32>
      %88 = vector.shape_cast %87 : vector<16xf32> to vector<1x16xf32>
      %89 = arith.addf %83, %88 : vector<1x16xf32>
      %c0_82 = arith.constant 0 : index
      %c0_83 = arith.constant 0 : index
      %90 = vector.load %arg8[%c0_82, %c0_83] : memref<16x4xf32, #tpu.memory_space<vmem>>, vector<16x4xf32>
      %cst_84 = arith.constant dense<0.000000e+00> : vector<1x4xf32>
      %91 = tpu.matmul %89, %90, %cst_84 {dimension_numbers = #tpu.dot_dimension_numbers<[1], [0], [0], [1], [0, 0, 1, 1], [], []>} : vector<1x16xf32>, vector<16x4xf32>, vector<1x4xf32> -> vector<1x4xf32>
      %cst_85 = arith.constant 9.765625E-4 : f32
      %92 = vector.broadcast %cst_85 : f32 to vector<1x4xf32>
      %93 = arith.mulf %91, %92 : vector<1x4xf32>
      %c0_86 = arith.constant 0 : index
      %c0_87 = arith.constant 0 : index
      %94 = vector.load %arg9[%c0_86, %c0_87] : memref<4x16xf32, #tpu.memory_space<vmem>>, vector<4x16xf32>
      %cst_88 = arith.constant dense<0.000000e+00> : vector<1x16xf32>
      %95 = tpu.matmul %93, %94, %cst_88 {dimension_numbers = #tpu.dot_dimension_numbers<[1], [0], [0], [1], [0, 0, 1, 1], [], []>} : vector<1x4xf32>, vector<4x16xf32>, vector<1x16xf32> -> vector<1x16xf32>
      %cst_89 = arith.constant 0.000000e+00 : f32
      %96 = vector.broadcast %cst_89 : f32 to vector<1x16xf32>
      %c0_90 = arith.constant 0 : index
      %c0_91 = arith.constant 0 : index
      %c0_92 = arith.constant 0 : index
      %c0_93 = arith.constant 0 : index
      %97 = vector.load %arg2[%c0_90, %c0_91, %c0_92, %c0_93] : memref<1x8x8x16xf32, #tpu.memory_space<vmem>>, vector<1x8x8x16xf32>
      %98 = vector.shape_cast %97 : vector<1x8x8x16xf32> to vector<8x8x16xf32>
      %99 = vector.shape_cast %98 : vector<8x8x16xf32> to vector<64x16xf32>
      %100 = vector.broadcast %95 : vector<1x16xf32> to vector<64x16xf32>
      %101 = arith.subf %99, %100 : vector<64x16xf32>
      %102 = arith.mulf %101, %101 : vector<64x16xf32>
      %cst_94 = arith.constant dense<0.000000e+00> : vector<16xf32>
      %103 = vector.multi_reduction <add>, %102, %cst_94 [0] : vector<64x16xf32> to vector<16xf32>
      %104 = vector.shape_cast %103 : vector<16xf32> to vector<1x16xf32>
      %105 = arith.addf %96, %104 : vector<1x16xf32>
      %c0_95 = arith.constant 0 : index
      %c0_96 = arith.constant 0 : index
      %c0_97 = arith.constant 0 : index
      %c0_98 = arith.constant 0 : index
      %106 = vector.load %arg3[%c0_95, %c0_96, %c0_97, %c0_98] : memref<1x8x8x16xf32, #tpu.memory_space<vmem>>, vector<1x8x8x16xf32>
      %107 = vector.shape_cast %106 : vector<1x8x8x16xf32> to vector<8x8x16xf32>
      %108 = vector.shape_cast %107 : vector<8x8x16xf32> to vector<64x16xf32>
      %109 = vector.broadcast %95 : vector<1x16xf32> to vector<64x16xf32>
      %110 = arith.subf %108, %109 : vector<64x16xf32>
      %111 = arith.mulf %110, %110 : vector<64x16xf32>
      %cst_99 = arith.constant dense<0.000000e+00> : vector<16xf32>
      %112 = vector.multi_reduction <add>, %111, %cst_99 [0] : vector<64x16xf32> to vector<16xf32>
      %113 = vector.shape_cast %112 : vector<16xf32> to vector<1x16xf32>
      %114 = arith.addf %105, %113 : vector<1x16xf32>
      %c0_100 = arith.constant 0 : index
      %c0_101 = arith.constant 0 : index
      %c0_102 = arith.constant 0 : index
      %c0_103 = arith.constant 0 : index
      %115 = vector.load %arg4[%c0_100, %c0_101, %c0_102, %c0_103] : memref<1x8x8x16xf32, #tpu.memory_space<vmem>>, vector<1x8x8x16xf32>
      %116 = vector.shape_cast %115 : vector<1x8x8x16xf32> to vector<8x8x16xf32>
      %117 = vector.shape_cast %116 : vector<8x8x16xf32> to vector<64x16xf32>
      %118 = vector.broadcast %95 : vector<1x16xf32> to vector<64x16xf32>
      %119 = arith.subf %117, %118 : vector<64x16xf32>
      %120 = arith.mulf %119, %119 : vector<64x16xf32>
      %cst_104 = arith.constant dense<0.000000e+00> : vector<16xf32>
      %121 = vector.multi_reduction <add>, %120, %cst_104 [0] : vector<64x16xf32> to vector<16xf32>
      %122 = vector.shape_cast %121 : vector<16xf32> to vector<1x16xf32>
      %123 = arith.addf %114, %122 : vector<1x16xf32>
      %c0_105 = arith.constant 0 : index
      %c0_106 = arith.constant 0 : index
      %c0_107 = arith.constant 0 : index
      %c0_108 = arith.constant 0 : index
      %124 = vector.load %arg5[%c0_105, %c0_106, %c0_107, %c0_108] : memref<1x8x8x16xf32, #tpu.memory_space<vmem>>, vector<1x8x8x16xf32>
      %125 = vector.shape_cast %124 : vector<1x8x8x16xf32> to vector<8x8x16xf32>
      %126 = vector.shape_cast %125 : vector<8x8x16xf32> to vector<64x16xf32>
      %127 = vector.broadcast %95 : vector<1x16xf32> to vector<64x16xf32>
      %128 = arith.subf %126, %127 : vector<64x16xf32>
      %129 = arith.mulf %128, %128 : vector<64x16xf32>
      %cst_109 = arith.constant dense<0.000000e+00> : vector<16xf32>
      %130 = vector.multi_reduction <add>, %129, %cst_109 [0] : vector<64x16xf32> to vector<16xf32>
      %131 = vector.shape_cast %130 : vector<16xf32> to vector<1x16xf32>
      %132 = arith.addf %123, %131 : vector<1x16xf32>
      %c0_110 = arith.constant 0 : index
      %c0_111 = arith.constant 0 : index
      %133 = vector.load %arg8[%c0_110, %c0_111] : memref<16x4xf32, #tpu.memory_space<vmem>>, vector<16x4xf32>
      %cst_112 = arith.constant dense<0.000000e+00> : vector<1x4xf32>
      %134 = tpu.matmul %132, %133, %cst_112 {dimension_numbers = #tpu.dot_dimension_numbers<[1], [0], [0], [1], [0, 0, 1, 1], [], []>} : vector<1x16xf32>, vector<16x4xf32>, vector<1x4xf32> -> vector<1x4xf32>
      %cst_113 = arith.constant 9.765625E-4 : f32
      %135 = vector.broadcast %cst_113 : f32 to vector<1x4xf32>
      %136 = arith.mulf %134, %135 : vector<1x4xf32>
      %cst_114 = arith.constant 9.99999974E-6 : f32
      %137 = vector.broadcast %cst_114 : f32 to vector<1x4xf32>
      %138 = arith.addf %136, %137 : vector<1x4xf32>
      %139 = math.rsqrt %138 : vector<1x4xf32>
      %c0_115 = arith.constant 0 : index
      %c0_116 = arith.constant 0 : index
      %140 = vector.load %arg9[%c0_115, %c0_116] : memref<4x16xf32, #tpu.memory_space<vmem>>, vector<4x16xf32>
      %cst_117 = arith.constant dense<0.000000e+00> : vector<1x16xf32>
      %141 = tpu.matmul %139, %140, %cst_117 {dimension_numbers = #tpu.dot_dimension_numbers<[1], [0], [0], [1], [0, 0, 1, 1], [], []>} : vector<1x4xf32>, vector<4x16xf32>, vector<1x16xf32> -> vector<1x16xf32>
      %c0_118 = arith.constant 0 : index
      %c0_119 = arith.constant 0 : index
      %142 = vector.load %arg6[%c0_118, %c0_119] : memref<1x16xf32, #tpu.memory_space<vmem>>, vector<1x16xf32>
      %143 = arith.mulf %142, %141 : vector<1x16xf32>
      %144 = vector.shape_cast %143 : vector<1x16xf32> to vector<1x1x16xf32>
      %c0_120 = arith.constant 0 : index
      %c0_121 = arith.constant 0 : index
      %145 = vector.load %arg7[%c0_120, %c0_121] : memref<1x16xf32, #tpu.memory_space<vmem>>, vector<1x16xf32>
      %c0_122 = arith.constant 0 : index
      %c0_123 = arith.constant 0 : index
      %146 = vector.load %arg6[%c0_122, %c0_123] : memref<1x16xf32, #tpu.memory_space<vmem>>, vector<1x16xf32>
      %147 = arith.mulf %95, %146 : vector<1x16xf32>
      %148 = arith.mulf %147, %141 : vector<1x16xf32>
      %149 = arith.subf %145, %148 : vector<1x16xf32>
      %150 = vector.shape_cast %149 : vector<1x16xf32> to vector<1x1x16xf32>
      %c0_124 = arith.constant 0 : index
      %c0_125 = arith.constant 0 : index
      %c0_126 = arith.constant 0 : index
      %c0_127 = arith.constant 0 : index
      %151 = vector.load %arg2[%c0_124, %c0_125, %c0_126, %c0_127] : memref<1x8x8x16xf32, #tpu.memory_space<vmem>>, vector<1x8x8x16xf32>
      %152 = vector.shape_cast %151 : vector<1x8x8x16xf32> to vector<8x8x16xf32>
      %153 = vector.broadcast %144 : vector<1x1x16xf32> to vector<8x8x16xf32>
      %154 = arith.mulf %152, %153 : vector<8x8x16xf32>
      %155 = vector.broadcast %150 : vector<1x1x16xf32> to vector<8x8x16xf32>
      %156 = arith.addf %154, %155 : vector<8x8x16xf32>
      %157 = arith.truncf %156 : vector<8x8x16xf32> to vector<8x8x16xbf16>
      %c1_128 = arith.constant 1 : index
      %c1_129 = arith.constant 1 : index
      %c0_130 = arith.constant 0 : index
      %158 = vector.load %arg13[%c1_128, %c1_129, %c0_130] : memref<9x9x16xbf16, #tpu.memory_space<vmem>>, vector<8x8x16xbf16>
      tpu.vector_store %arg13[%c1_128, %c1_129, %c0_130], %157 {strides = array<i32>} : memref<9x9x16xbf16, #tpu.memory_space<vmem>>, vector<8x8x16xbf16>,
      %cst_131 = arith.constant 0.000000e+00 : bf16
      %159 = vector.broadcast %cst_131 : bf16 to vector<1x9x16xbf16>
      %c0_132 = arith.constant 0 : index
      %c0_133 = arith.constant 0 : index
      %c0_134 = arith.constant 0 : index
      %160 = vector.load %arg13[%c0_132, %c0_133, %c0_134] : memref<9x9x16xbf16, #tpu.memory_space<vmem>>, vector<1x9x16xbf16>
      tpu.vector_store %arg13[%c0_132, %c0_133, %c0_134], %159 {strides = array<i32>} : memref<9x9x16xbf16, #tpu.memory_space<vmem>>, vector<1x9x16xbf16>,
      %cst_135 = arith.constant 0.000000e+00 : bf16
      %161 = vector.broadcast %cst_135 : bf16 to vector<9x1x16xbf16>
      %c0_136 = arith.constant 0 : index
      %c0_137 = arith.constant 0 : index
      %c0_138 = arith.constant 0 : index
      %162 = vector.load %arg13[%c0_136, %c0_137, %c0_138] : memref<9x9x16xbf16, #tpu.memory_space<vmem>>, vector<9x1x16xbf16>
      tpu.vector_store %arg13[%c0_136, %c0_137, %c0_138], %161 {strides = array<i32>} : memref<9x9x16xbf16, #tpu.memory_space<vmem>>, vector<9x1x16xbf16>,
      %c0_139 = arith.constant 0 : index
      %c0_140 = arith.constant 0 : index
      %c0_141 = arith.constant 0 : index
      %c0_142 = arith.constant 0 : index
      %163 = vector.load %arg3[%c0_139, %c0_140, %c0_141, %c0_142] : memref<1x8x8x16xf32, #tpu.memory_space<vmem>>, vector<1x8x8x16xf32>
      %164 = vector.shape_cast %163 : vector<1x8x8x16xf32> to vector<8x8x16xf32>
      %165 = vector.broadcast %144 : vector<1x1x16xf32> to vector<8x8x16xf32>
      %166 = arith.mulf %164, %165 : vector<8x8x16xf32>
      %167 = vector.broadcast %150 : vector<1x1x16xf32> to vector<8x8x16xf32>
      %168 = arith.addf %166, %167 : vector<8x8x16xf32>
      %169 = arith.truncf %168 : vector<8x8x16xf32> to vector<8x8x16xbf16>
      %c1_143 = arith.constant 1 : index
      %c0_144 = arith.constant 0 : index
      %c0_145 = arith.constant 0 : index
      %170 = vector.load %arg14[%c1_143, %c0_144, %c0_145] : memref<9x9x16xbf16, #tpu.memory_space<vmem>>, vector<8x8x16xbf16>
      tpu.vector_store %arg14[%c1_143, %c0_144, %c0_145], %169 {strides = array<i32>} : memref<9x9x16xbf16, #tpu.memory_space<vmem>>, vector<8x8x16xbf16>,
      %cst_146 = arith.constant 0.000000e+00 : bf16
      %171 = vector.broadcast %cst_146 : bf16 to vector<1x9x16xbf16>
      %c0_147 = arith.constant 0 : index
      %c0_148 = arith.constant 0 : index
      %c0_149 = arith.constant 0 : index
      %172 = vector.load %arg14[%c0_147, %c0_148, %c0_149] : memref<9x9x16xbf16, #tpu.memory_space<vmem>>, vector<1x9x16xbf16>
      tpu.vector_store %arg14[%c0_147, %c0_148, %c0_149], %171 {strides = array<i32>} : memref<9x9x16xbf16, #tpu.memory_space<vmem>>, vector<1x9x16xbf16>,
      %cst_150 = arith.constant 0.000000e+00 : bf16
      %173 = vector.broadcast %cst_150 : bf16 to vector<9x1x16xbf16>
      %c0_151 = arith.constant 0 : index
      %c8_152 = arith.constant 8 : index
      %c0_153 = arith.constant 0 : index
      %174 = vector.load %arg14[%c0_151, %c8_152, %c0_153] : memref<9x9x16xbf16, #tpu.memory_space<vmem>>, vector<9x1x16xbf16>
      tpu.vector_store %arg14[%c0_151, %c8_152, %c0_153], %173 {strides = array<i32>} : memref<9x9x16xbf16, #tpu.memory_space<vmem>>, vector<9x1x16xbf16>,
      %c0_154 = arith.constant 0 : index
      %c0_155 = arith.constant 0 : index
      %c0_156 = arith.constant 0 : index
      %c0_157 = arith.constant 0 : index
      %175 = vector.load %arg4[%c0_154, %c0_155, %c0_156, %c0_157] : memref<1x8x8x16xf32, #tpu.memory_space<vmem>>, vector<1x8x8x16xf32>
      %176 = vector.shape_cast %175 : vector<1x8x8x16xf32> to vector<8x8x16xf32>
      %177 = vector.broadcast %144 : vector<1x1x16xf32> to vector<8x8x16xf32>
      %178 = arith.mulf %176, %177 : vector<8x8x16xf32>
      %179 = vector.broadcast %150 : vector<1x1x16xf32> to vector<8x8x16xf32>
      %180 = arith.addf %178, %179 : vector<8x8x16xf32>
      %181 = arith.truncf %180 : vector<8x8x16xf32> to vector<8x8x16xbf16>
      %c0_158 = arith.constant 0 : index
      %c1_159 = arith.constant 1 : index
      %c0_160 = arith.constant 0 : index
      %182 = vector.load %arg15[%c0_158, %c1_159, %c0_160] : memref<9x9x16xbf16, #tpu.memory_space<vmem>>, vector<8x8x16xbf16>
      tpu.vector_store %arg15[%c0_158, %c1_159, %c0_160], %181 {strides = array<i32>} : memref<9x9x16xbf16, #tpu.memory_space<vmem>>, vector<8x8x16xbf16>,
      %cst_161 = arith.constant 0.000000e+00 : bf16
      %183 = vector.broadcast %cst_161 : bf16 to vector<1x9x16xbf16>
      %c8_162 = arith.constant 8 : index
      %c0_163 = arith.constant 0 : index
      %c0_164 = arith.constant 0 : index
      %184 = vector.load %arg15[%c8_162, %c0_163, %c0_164] : memref<9x9x16xbf16, #tpu.memory_space<vmem>>, vector<1x9x16xbf16>
      tpu.vector_store %arg15[%c8_162, %c0_163, %c0_164], %183 {strides = array<i32>} : memref<9x9x16xbf16, #tpu.memory_space<vmem>>, vector<1x9x16xbf16>,
      %cst_165 = arith.constant 0.000000e+00 : bf16
      %185 = vector.broadcast %cst_165 : bf16 to vector<9x1x16xbf16>
      %c0_166 = arith.constant 0 : index
      %c0_167 = arith.constant 0 : index
      %c0_168 = arith.constant 0 : index
      %186 = vector.load %arg15[%c0_166, %c0_167, %c0_168] : memref<9x9x16xbf16, #tpu.memory_space<vmem>>, vector<9x1x16xbf16>
      tpu.vector_store %arg15[%c0_166, %c0_167, %c0_168], %185 {strides = array<i32>} : memref<9x9x16xbf16, #tpu.memory_space<vmem>>, vector<9x1x16xbf16>,
      %c0_169 = arith.constant 0 : index
      %c0_170 = arith.constant 0 : index
      %c0_171 = arith.constant 0 : index
      %c0_172 = arith.constant 0 : index
      %187 = vector.load %arg5[%c0_169, %c0_170, %c0_171, %c0_172] : memref<1x8x8x16xf32, #tpu.memory_space<vmem>>, vector<1x8x8x16xf32>
      %188 = vector.shape_cast %187 : vector<1x8x8x16xf32> to vector<8x8x16xf32>
      %189 = vector.broadcast %144 : vector<1x1x16xf32> to vector<8x8x16xf32>
      %190 = arith.mulf %188, %189 : vector<8x8x16xf32>
      %191 = vector.broadcast %150 : vector<1x1x16xf32> to vector<8x8x16xf32>
      %192 = arith.addf %190, %191 : vector<8x8x16xf32>
      %193 = arith.truncf %192 : vector<8x8x16xf32> to vector<8x8x16xbf16>
      %c0_173 = arith.constant 0 : index
      %c0_174 = arith.constant 0 : index
      %c0_175 = arith.constant 0 : index
      %194 = vector.load %arg16[%c0_173, %c0_174, %c0_175] : memref<9x9x16xbf16, #tpu.memory_space<vmem>>, vector<8x8x16xbf16>
      tpu.vector_store %arg16[%c0_173, %c0_174, %c0_175], %193 {strides = array<i32>} : memref<9x9x16xbf16, #tpu.memory_space<vmem>>, vector<8x8x16xbf16>,
      %cst_176 = arith.constant 0.000000e+00 : bf16
      %195 = vector.broadcast %cst_176 : bf16 to vector<1x9x16xbf16>
      %c8_177 = arith.constant 8 : index
      %c0_178 = arith.constant 0 : index
      %c0_179 = arith.constant 0 : index
      %196 = vector.load %arg16[%c8_177, %c0_178, %c0_179] : memref<9x9x16xbf16, #tpu.memory_space<vmem>>, vector<1x9x16xbf16>
      tpu.vector_store %arg16[%c8_177, %c0_178, %c0_179], %195 {strides = array<i32>} : memref<9x9x16xbf16, #tpu.memory_space<vmem>>, vector<1x9x16xbf16>,
      %cst_180 = arith.constant 0.000000e+00 : bf16
      %197 = vector.broadcast %cst_180 : bf16 to vector<9x1x16xbf16>
      %c0_181 = arith.constant 0 : index
      %c8_182 = arith.constant 8 : index
      %c0_183 = arith.constant 0 : index
      %198 = vector.load %arg16[%c0_181, %c8_182, %c0_183] : memref<9x9x16xbf16, #tpu.memory_space<vmem>>, vector<9x1x16xbf16>
      tpu.vector_store %arg16[%c0_181, %c8_182, %c0_183], %197 {strides = array<i32>} : memref<9x9x16xbf16, #tpu.memory_space<vmem>>, vector<9x1x16xbf16>,
    } else {
    }
    %cst = arith.constant 0.000000e+00 : f32
    %3 = vector.broadcast %cst : f32 to vector<64x128xf32>
    %c0 = arith.constant 0 : index
    %c0_1 = arith.constant 0 : index
    %c0_2 = arith.constant 0 : index
    %4 = vector.load %arg13[%c0, %c0_1, %c0_2] : memref<9x9x16xbf16, #tpu.memory_space<vmem>>, vector<8x8x16xbf16>
    %5 = vector.shape_cast %4 : vector<8x8x16xbf16> to vector<64x16xbf16>
    %c0_3 = arith.constant 0 : index
    %c0_4 = arith.constant 0 : index
    %c0_5 = arith.constant 0 : index
    %6 = vector.load %arg10[%c0_3, %c0_4, %c0_5] : memref<9x16x128xbf16, #tpu.memory_space<vmem>>, vector<1x16x128xbf16>
    %7 = vector.shape_cast %6 : vector<1x16x128xbf16> to vector<16x128xbf16>
    %cst_6 = arith.constant dense<0.000000e+00> : vector<64x128xf32>
    %8 = tpu.matmul %5, %7, %cst_6 {dimension_numbers = #tpu.dot_dimension_numbers<[1], [0], [0], [1], [0, 0, 1, 1], [], []>} : vector<64x16xbf16>, vector<16x128xbf16>, vector<64x128xf32> -> vector<64x128xf32>
    %9 = arith.addf %3, %8 : vector<64x128xf32>
    %c0_7 = arith.constant 0 : index
    %c0_8 = arith.constant 0 : index
    %c0_9 = arith.constant 0 : index
    %10 = vector.load %arg14[%c0_7, %c0_8, %c0_9] : memref<9x9x16xbf16, #tpu.memory_space<vmem>>, vector<8x8x16xbf16>
    %11 = vector.shape_cast %10 : vector<8x8x16xbf16> to vector<64x16xbf16>
    %c1 = arith.constant 1 : index
    %c0_10 = arith.constant 0 : index
    %c0_11 = arith.constant 0 : index
    %12 = vector.load %arg10[%c1, %c0_10, %c0_11] : memref<9x16x128xbf16, #tpu.memory_space<vmem>>, vector<1x16x128xbf16>
    %13 = vector.shape_cast %12 : vector<1x16x128xbf16> to vector<16x128xbf16>
    %cst_12 = arith.constant dense<0.000000e+00> : vector<64x128xf32>
    %14 = tpu.matmul %11, %13, %cst_12 {dimension_numbers = #tpu.dot_dimension_numbers<[1], [0], [0], [1], [0, 0, 1, 1], [], []>} : vector<64x16xbf16>, vector<16x128xbf16>, vector<64x128xf32> -> vector<64x128xf32>
    %15 = arith.addf %9, %14 : vector<64x128xf32>
    %c0_13 = arith.constant 0 : index
    %c1_14 = arith.constant 1 : index
    %c0_15 = arith.constant 0 : index
    %16 = vector.load %arg13[%c0_13, %c1_14, %c0_15] : memref<9x9x16xbf16, #tpu.memory_space<vmem>>, vector<8x8x16xbf16>
    %17 = vector.shape_cast %16 : vector<8x8x16xbf16> to vector<64x16xbf16>
    %c2 = arith.constant 2 : index
    %c0_16 = arith.constant 0 : index
    %c0_17 = arith.constant 0 : index
    %18 = vector.load %arg10[%c2, %c0_16, %c0_17] : memref<9x16x128xbf16, #tpu.memory_space<vmem>>, vector<1x16x128xbf16>
    %19 = vector.shape_cast %18 : vector<1x16x128xbf16> to vector<16x128xbf16>
    %cst_18 = arith.constant dense<0.000000e+00> : vector<64x128xf32>
    %20 = tpu.matmul %17, %19, %cst_18 {dimension_numbers = #tpu.dot_dimension_numbers<[1], [0], [0], [1], [0, 0, 1, 1], [], []>} : vector<64x16xbf16>, vector<16x128xbf16>, vector<64x128xf32> -> vector<64x128xf32>
    %21 = arith.addf %15, %20 : vector<64x128xf32>
    %c0_19 = arith.constant 0 : index
    %c0_20 = arith.constant 0 : index
    %c0_21 = arith.constant 0 : index
    %22 = vector.load %arg15[%c0_19, %c0_20, %c0_21] : memref<9x9x16xbf16, #tpu.memory_space<vmem>>, vector<8x8x16xbf16>
    %23 = vector.shape_cast %22 : vector<8x8x16xbf16> to vector<64x16xbf16>
    %c3 = arith.constant 3 : index
    %c0_22 = arith.constant 0 : index
    %c0_23 = arith.constant 0 : index
    %24 = vector.load %arg10[%c3, %c0_22, %c0_23] : memref<9x16x128xbf16, #tpu.memory_space<vmem>>, vector<1x16x128xbf16>
    %25 = vector.shape_cast %24 : vector<1x16x128xbf16> to vector<16x128xbf16>
    %cst_24 = arith.constant dense<0.000000e+00> : vector<64x128xf32>
    %26 = tpu.matmul %23, %25, %cst_24 {dimension_numbers = #tpu.dot_dimension_numbers<[1], [0], [0], [1], [0, 0, 1, 1], [], []>} : vector<64x16xbf16>, vector<16x128xbf16>, vector<64x128xf32> -> vector<64x128xf32>
    %27 = arith.addf %21, %26 : vector<64x128xf32>
    %c0_25 = arith.constant 0 : index
    %c0_26 = arith.constant 0 : index
    %c0_27 = arith.constant 0 : index
    %28 = vector.load %arg16[%c0_25, %c0_26, %c0_27] : memref<9x9x16xbf16, #tpu.memory_space<vmem>>, vector<8x8x16xbf16>
    %29 = vector.shape_cast %28 : vector<8x8x16xbf16> to vector<64x16xbf16>
    %c4 = arith.constant 4 : index
    %c0_28 = arith.constant 0 : index
    %c0_29 = arith.constant 0 : index
    %30 = vector.load %arg10[%c4, %c0_28, %c0_29] : memref<9x16x128xbf16, #tpu.memory_space<vmem>>, vector<1x16x128xbf16>
    %31 = vector.shape_cast %30 : vector<1x16x128xbf16> to vector<16x128xbf16>
    %cst_30 = arith.constant dense<0.000000e+00> : vector<64x128xf32>
    %32 = tpu.matmul %29, %31, %cst_30 {dimension_numbers = #tpu.dot_dimension_numbers<[1], [0], [0], [1], [0, 0, 1, 1], [], []>} : vector<64x16xbf16>, vector<16x128xbf16>, vector<64x128xf32> -> vector<64x128xf32>
    %33 = arith.addf %27, %32 : vector<64x128xf32>
    %c0_31 = arith.constant 0 : index
    %c1_32 = arith.constant 1 : index
    %c0_33 = arith.constant 0 : index
    %34 = vector.load %arg15[%c0_31, %c1_32, %c0_33] : memref<9x9x16xbf16, #tpu.memory_space<vmem>>, vector<8x8x16xbf16>
    %35 = vector.shape_cast %34 : vector<8x8x16xbf16> to vector<64x16xbf16>
    %c5 = arith.constant 5 : index
    %c0_34 = arith.constant 0 : index
    %c0_35 = arith.constant 0 : index
    %36 = vector.load %arg10[%c5, %c0_34, %c0_35] : memref<9x16x128xbf16, #tpu.memory_space<vmem>>, vector<1x16x128xbf16>
    %37 = vector.shape_cast %36 : vector<1x16x128xbf16> to vector<16x128xbf16>
    %cst_36 = arith.constant dense<0.000000e+00> : vector<64x128xf32>
    %38 = tpu.matmul %35, %37, %cst_36 {dimension_numbers = #tpu.dot_dimension_numbers<[1], [0], [0], [1], [0, 0, 1, 1], [], []>} : vector<64x16xbf16>, vector<16x128xbf16>, vector<64x128xf32> -> vector<64x128xf32>
    %39 = arith.addf %33, %38 : vector<64x128xf32>
    %c1_37 = arith.constant 1 : index
    %c0_38 = arith.constant 0 : index
    %c0_39 = arith.constant 0 : index
    %40 = vector.load %arg13[%c1_37, %c0_38, %c0_39] : memref<9x9x16xbf16, #tpu.memory_space<vmem>>, vector<8x8x16xbf16>
    %41 = vector.shape_cast %40 : vector<8x8x16xbf16> to vector<64x16xbf16>
    %c6 = arith.constant 6 : index
    %c0_40 = arith.constant 0 : index
    %c0_41 = arith.constant 0 : index
    %42 = vector.load %arg10[%c6, %c0_40, %c0_41] : memref<9x16x128xbf16, #tpu.memory_space<vmem>>, vector<1x16x128xbf16>
    %43 = vector.shape_cast %42 : vector<1x16x128xbf16> to vector<16x128xbf16>
    %cst_42 = arith.constant dense<0.000000e+00> : vector<64x128xf32>
    %44 = tpu.matmul %41, %43, %cst_42 {dimension_numbers = #tpu.dot_dimension_numbers<[1], [0], [0], [1], [0, 0, 1, 1], [], []>} : vector<64x16xbf16>, vector<16x128xbf16>, vector<64x128xf32> -> vector<64x128xf32>
    %45 = arith.addf %39, %44 : vector<64x128xf32>
    %c1_43 = arith.constant 1 : index
    %c0_44 = arith.constant 0 : index
    %c0_45 = arith.constant 0 : index
    %46 = vector.load %arg14[%c1_43, %c0_44, %c0_45] : memref<9x9x16xbf16, #tpu.memory_space<vmem>>, vector<8x8x16xbf16>
    %47 = vector.shape_cast %46 : vector<8x8x16xbf16> to vector<64x16xbf16>
    %c7 = arith.constant 7 : index
    %c0_46 = arith.constant 0 : index
    %c0_47 = arith.constant 0 : index
    %48 = vector.load %arg10[%c7, %c0_46, %c0_47] : memref<9x16x128xbf16, #tpu.memory_space<vmem>>, vector<1x16x128xbf16>
    %49 = vector.shape_cast %48 : vector<1x16x128xbf16> to vector<16x128xbf16>
    %cst_48 = arith.constant dense<0.000000e+00> : vector<64x128xf32>
    %50 = tpu.matmul %47, %49, %cst_48 {dimension_numbers = #tpu.dot_dimension_numbers<[1], [0], [0], [1], [0, 0, 1, 1], [], []>} : vector<64x16xbf16>, vector<16x128xbf16>, vector<64x128xf32> -> vector<64x128xf32>
    %51 = arith.addf %45, %50 : vector<64x128xf32>
    %c1_49 = arith.constant 1 : index
    %c1_50 = arith.constant 1 : index
    %c0_51 = arith.constant 0 : index
    %52 = vector.load %arg13[%c1_49, %c1_50, %c0_51] : memref<9x9x16xbf16, #tpu.memory_space<vmem>>, vector<8x8x16xbf16>
    %53 = vector.shape_cast %52 : vector<8x8x16xbf16> to vector<64x16xbf16>
    %c8 = arith.constant 8 : index
    %c0_52 = arith.constant 0 : index
    %c0_53 = arith.constant 0 : index
    %54 = vector.load %arg10[%c8, %c0_52, %c0_53] : memref<9x16x128xbf16, #tpu.memory_space<vmem>>, vector<1x16x128xbf16>
    %55 = vector.shape_cast %54 : vector<1x16x128xbf16> to vector<16x128xbf16>
    %cst_54 = arith.constant dense<0.000000e+00> : vector<64x128xf32>
    %56 = tpu.matmul %53, %55, %cst_54 {dimension_numbers = #tpu.dot_dimension_numbers<[1], [0], [0], [1], [0, 0, 1, 1], [], []>} : vector<64x16xbf16>, vector<16x128xbf16>, vector<64x128xf32> -> vector<64x128xf32>
    %57 = arith.addf %51, %56 : vector<64x128xf32>
    %c0_55 = arith.constant 0 : index
    %c0_56 = arith.constant 0 : index
    %58 = vector.load %arg11[%c0_55, %c0_56] : memref<1x128xf32, #tpu.memory_space<vmem>>, vector<1x128xf32>
    %59 = vector.broadcast %58 : vector<1x128xf32> to vector<64x128xf32>
    %60 = arith.addf %57, %59 : vector<64x128xf32>
    %61 = vector.shape_cast %60 : vector<64x128xf32> to vector<8x8x128xf32>
    %c0_57 = arith.constant 0 : index
    %c0_58 = arith.constant 0 : index
    %c0_59 = arith.constant 0 : index
    %c0_60 = arith.constant 0 : index
    %62 = vector.load %arg12[%c0_57, %c0_58, %c0_59, %c0_60] : memref<1x8x8x128xf32, #tpu.memory_space<vmem>>, vector<1x8x8x128xf32>
    %63 = vector.shape_cast %62 : vector<1x8x8x128xf32> to vector<8x8x128xf32>
    %64 = vector.shape_cast %61 : vector<8x8x128xf32> to vector<1x8x8x128xf32>
    tpu.vector_store %arg12[%c0_57, %c0_58, %c0_59, %c0_60], %64 {strides = array<i32>} : memref<1x8x8x128xf32, #tpu.memory_space<vmem>>, vector<1x8x8x128xf32>,
    return
  }
  func.func @transform_0(%arg0: i32, %arg1: i32) -> (i32, i32, i32, i32) {
    %c0_i32 = arith.constant 0 : i32
    %c0_i32_0 = arith.constant 0 : i32
    %c0_i32_1 = arith.constant 0 : i32
    %c0_i32_2 = arith.constant 0 : i32
    return %arg0, %c0_i32, %c0_i32_0, %c0_i32_1 : i32, i32, i32, i32
  }
  func.func @transform_1(%arg0: i32, %arg1: i32) -> (i32, i32, i32, i32) {
    %c0_i32 = arith.constant 0 : i32
    %c0_i32_0 = arith.constant 0 : i32
    %c0_i32_1 = arith.constant 0 : i32
    %c0_i32_2 = arith.constant 0 : i32
    return %arg0, %c0_i32, %c0_i32_0, %c0_i32_1 : i32, i32, i32, i32
  }
  func.func @transform_2(%arg0: i32, %arg1: i32) -> (i32, i32, i32, i32) {
    %c0_i32 = arith.constant 0 : i32
    %c0_i32_0 = arith.constant 0 : i32
    %c0_i32_1 = arith.constant 0 : i32
    %c0_i32_2 = arith.constant 0 : i32
    return %arg0, %c0_i32, %c0_i32_0, %c0_i32_1 : i32, i32, i32, i32
  }
  func.func @transform_3(%arg0: i32, %arg1: i32) -> (i32, i32, i32, i32) {
    %c0_i32 = arith.constant 0 : i32
    %c0_i32_0 = arith.constant 0 : i32
    %c0_i32_1 = arith.constant 0 : i32
    %c0_i32_2 = arith.constant 0 : i32
    return %arg0, %c0_i32, %c0_i32_0, %c0_i32_1 : i32, i32, i32, i32
  }
  func.func @transform_4(%arg0: i32, %arg1: i32) -> (i32, i32) {
    %c0_i32 = arith.constant 0 : i32
    %c0_i32_0 = arith.constant 0 : i32
    %c0_i32_1 = arith.constant 0 : i32
    return %c0_i32, %c0_i32_0 : i32, i32
  }
  func.func @transform_5(%arg0: i32, %arg1: i32) -> (i32, i32) {
    %c0_i32 = arith.constant 0 : i32
    %c0_i32_0 = arith.constant 0 : i32
    %c0_i32_1 = arith.constant 0 : i32
    return %c0_i32, %c0_i32_0 : i32, i32
  }
  func.func @transform_6(%arg0: i32, %arg1: i32) -> (i32, i32) {
    %c0_i32 = arith.constant 0 : i32
    %c0_i32_0 = arith.constant 0 : i32
    %c0_i32_1 = arith.constant 0 : i32
    return %c0_i32, %c0_i32_0 : i32, i32
  }
  func.func @transform_7(%arg0: i32, %arg1: i32) -> (i32, i32) {
    %c0_i32 = arith.constant 0 : i32
    %c0_i32_0 = arith.constant 0 : i32
    %c0_i32_1 = arith.constant 0 : i32
    return %c0_i32, %c0_i32_0 : i32, i32
  }
  func.func @transform_8(%arg0: i32, %arg1: i32) -> (i32, i32, i32) {
    %c0_i32 = arith.constant 0 : i32
    %c0_i32_0 = arith.constant 0 : i32
    %c0_i32_1 = arith.constant 0 : i32
    return %c0_i32, %c0_i32_0, %arg1 : i32, i32, i32
  }
  func.func @transform_9(%arg0: i32, %arg1: i32) -> (i32, i32) {
    %c0_i32 = arith.constant 0 : i32
    %c0_i32_0 = arith.constant 0 : i32
    return %c0_i32, %arg1 : i32, i32
  }
  func.func @transform_10(%arg0: i32, %arg1: i32) -> (i32, i32, i32, i32) {
    %c0_i32 = arith.constant 0 : i32
    %c0_i32_0 = arith.constant 0 : i32
    %c0_i32_1 = arith.constant 0 : i32
    return %arg0, %c0_i32, %c0_i32_0, %arg1 : i32, i32, i32, i32
  }
}

</mosaic_0001>

<bundles_post_ra>
// kernel: tpu_custom_call.1
= control target key start
LH: loop header
LB: loop body
LE: loop exit
PB: predicated region body
PF: predicated region fallthrough
CT: control target
= control target key end

     0   :  { %s5778_s0 = inlined_call_operand.hbm [shape: f32[2,8,8,16], index: 0, kind: input, shape index: {}]   ;;  %s5779_s1 = inlined_call_operand.hbm [shape: f32[2,8,8,16], index: 1, kind: input, shape index: {}]   ;;  %s5780_s2 = inlined_call_operand.hbm [shape: f32[2,8,8,16], index: 2, kind: input, shape index: {}]   ;;  %s5781_s3 = inlined_call_operand.hbm [shape: f32[2,8,8,16], index: 3, kind: input, shape index: {}]   ;;  %s5782_s4 = inlined_call_operand.hbm [shape: f32[1,16], index: 4, kind: input, shape index: {}]   ;;  %s5783_s5 = inlined_call_operand.hbm [shape: f32[1,16], index: 5, kind: input, shape index: {}]   ;;  %s5784_s6 = inlined_call_operand.hbm [shape: f32[16,4], index: 6, kind: input, shape index: {}]   ;;  %s5785_s7 = inlined_call_operand.hbm [shape: f32[4,16], index: 7, kind: input, shape index: {}]   ;;  %s5786_s8 = inlined_call_operand.hbm [shape: bf16[9,16,128], index: 8, kind: input, shape index: {}]   ;;  %s5787_s9 = inlined_call_operand.hbm [shape: f32[1,128], index: 9, kind: input, shape index: {}]   ;;  %s5788_s10 = inlined_call_operand.hbm [shape: f32[2,8,8,128], index: 10, kind: output, shape index: {}]  }
   0x1   :  { %5829 = sst [smem:[#allocation53_spill]] %s5779_s1 }
   0x2   :  { %5830 = sst [smem:[#allocation54_spill]] %s5782_s4 }
   0x3   :  { %5831 = sst [smem:[#allocation55_spill]] %s5783_s5 }
   0x4   :  { %5832 = sst [smem:[#allocation56_spill]] %s5785_s7 }
   0x5   :  { %5833 = sst [smem:[#allocation57_spill]] %s5788_s10 }
   0x6   :  { %15 = vsyncpa [#allocation7], 0 }
   0x7   :  { %17 = vsyncpa [#allocation7 + $0x1], 0 }
   0x8   :  { %18 = vsyncpa [#allocation10], 0 }
   0x9   :  { %20 = vsyncpa [#allocation10 + $0x1], 0 }
   0xa   :  { %21 = vsyncpa [#allocation13], 0 }
   0xb   :  { %23 = vsyncpa [#allocation13 + $0x1], 0 }
   0xc   :  { %24 = vsyncpa [#allocation16], 0 }
   0xd   :  { %25 = vsyncpa [#allocation19], 0 }
   0xe   :  { %26 = vsyncpa [#allocation22], 0 }
   0xf   :  { %27 = vsyncpa [#allocation8], 0 }
  0x10   :  { %29 = vsyncpa [#allocation8 + $0x1], 0  ;;  %s4514_s13 = smov 0   ;;  %s4516_s14 = smov 0  }
  0x11   :  { %s4518_s15 = smov 0   ;;  %s4520_s16 = smov 0  }
  0x12   :  { %s4522_s17 = smov 0   ;;  %s4524_s18 = smov 0  }
  0x13 LB: > { %5834 = sst [smem:[#allocation32_spill]] %s4416_s13  ;;  %s4545_s19 = sadd.s32 4294967295, %s4436_s18   ;;  %s4436_s18 = sphi %s4524_s18, %s35_s18   ;;  %s4432_s17 = sphi %s4522_s17, %s5918_s17   ;;  %s4428_s16 = sphi %s4520_s16, %s5917_s16   ;;  %s4424_s15 = sphi %s4518_s15, %s5920_s15   ;;  %s4420_s14 = sphi %s4516_s14, %s5919_s14   ;;  %s4416_s13 = sphi %s4514_s13, %s5915_s13  }
  0x14   : > { %5835 = sst [smem:[#allocation33_spill]] %s4420_s14  ;;  %p3454_p0 = scmp.ge.s32.totalorder %s4436_s18, 1 }
  0x15   : > { %5836 = sst [smem:[#allocation34_spill]] %s4428_s16  ;;  %p5789_p1 = scmp.eq.s32.totalorder %s4545_s19, 0 }
  0x16   : > { %5837 = sst [smem:[#allocation35_spill]] %s4432_s17  ;;  %p320_p2 = scmp.lt.s32.totalorder %s4436_s18, 3 }
  0x17   : > { %5838 = sst [smem:[#allocation36_spill]] %s4545_s19  ;;  %s4438_s21 = smov [#allocation14]  }
  0x18   : > { %p4550_p3 = pnand %p3454_p0, %p320_p2  ;;  %s333_s22 = sshll.u32 %s4438_s21, 4  ;;  %s334_s22 = int_to_ptr.vmem [resolvable:$true] %s333_s22 }
  0x19   : > { %s4439_s23 = smov [#allocation15]   ;;  %s4440_s26 = smov [#allocation18]  }
  0x1a   : > { %s5839_s20 = scalar_select %p4550_p3, 1, 0 }
  0x1b   : > { %p3891_p5 = pneg %p4550_p3  ;;  %s344_s24 = sshll.u32 %s4439_s23, 4  ;;  %s4563_s24 = int_to_ptr.vmem [resolvable:$true] %s344_s24 }
  0x1c   : > { %s368_s27 = sshll.u32 %s4440_s26, 4  ;;  %s5841_s4 = sld [smem:[#allocation54_spill]]  ;;  %s4565_s27 = int_to_ptr.vmem [resolvable:$true] %s368_s27 }
  0x1d   : > { %p4559_p6 = pnand %p3891_p5, %p5789_p1 }
  0x1f   : > { %s5840_s25 = scalar_select %p4559_p6, 1, 0 }
  0x20   : > { %p4575_p8 = pneg %p4559_p6 }
  0x22   : > { %s4042_s30 = scalar_lea.hbm %s5841_s4, 16 }
  0x23   : > { %p4043_p7 = scmp.ne.s32.totalorder %s5841_s4, %s4042_s30  ;;  %p4049_p11 = scmp.lt.u32.totalorder %s4042_s30, %s5841_s4 }
  0x24   : > { %s5842_s21 = scalar_select %p4575_p8, 1, 0 }
  0x25   : > { %p4045_p9 = pnand %p4575_p8, %p4043_p7 }
  0x27   : > { %p4046_p10 = pneg %p4045_p9 }
  0x29   : > { %p4051_p12 = pnand %p4049_p11, %p4046_p10 }
  0x2b   : > { %4054 = shalt.err (!%p4051_p12)
}
  0x2c   : > { %s4055_s28 = scalar_lea.vmem %s334_s22, 16  ;;  %s4062_s29 = scalar_lea.vmem %s334_s22, 32 }
  0x2d   : > { %p4056_p13 = scmp.ne.s32.totalorder %s334_s22, %s4055_s28  ;;  %p4063_p5 = scmp.lt.s32.totalorder %s334_s22, %s334_s22 }
  0x2e   : > { %p4064_p4 = scmp.lt.s32.totalorder %s4062_s29, %s4055_s28 }
  0x2f   : > { %p4058_p0 = pnand %p4056_p13, %p4575_p8 }
  0x30   : > { %p4065_p1 = por %p4064_p4, %p4063_p5 }
  0x31   : > { %p4059_p2 = pneg %p4058_p0 }
  0x33   : > { %p4066_p3 = pnand %p4065_p1, %p4059_p2 }
  0x35   : > { %4069 = shalt.err (!%p4066_p3)
}
  0x36   : > { %3894 = dma.hbm_to_vmem [thread:$0]  (!%p4559_p6), %s5841_s4, 16, %s334_s22, [#allocation13]  }
  0x37   : > { %s5843_s5 = sld [smem:[#allocation55_spill]] }
  0x3d   : > { %s4070_s26 = scalar_lea.hbm %s5843_s5, 16 }
  0x3e   : > { %p4071_p7 = scmp.ne.s32.totalorder %s5843_s5, %s4070_s26  ;;  %p4077_p1 = scmp.lt.u32.totalorder %s4070_s26, %s5843_s5 }
  0x40   : > { %p4073_p9 = pnand %p4071_p7, %p4575_p8 }
  0x42   : > { %p4074_p4 = pneg %p4073_p9 }
  0x44   : > { %p4079_p3 = pnand %p4077_p1, %p4074_p4 }
  0x46   : > { %4082 = shalt.err (!%p4079_p3)
}
  0x47   : > { %s4083_s22 = scalar_lea.vmem %s4563_s24, 16  ;;  %s4090_s10 = scalar_lea.vmem %s4563_s24, 32 }
  0x48   : > { %p4084_p10 = scmp.ne.s32.totalorder %s4563_s24, %s4083_s22  ;;  %p4091_p13 = scmp.lt.s32.totalorder %s4563_s24, %s4563_s24 }
  0x49   : > { %p4092_p0 = scmp.lt.s32.totalorder %s4090_s10, %s4083_s22 }
  0x4a   : > { %p4086_p11 = pnand %p4084_p10, %p4575_p8 }
  0x4b   : > { %p4093_p2 = por %p4092_p0, %p4091_p13 }
  0x4c   : > { %p4087_p12 = pneg %p4086_p11 }
  0x4e   : > { %p4094_p5 = pnand %p4093_p2, %p4087_p12 }
  0x50   : > { %4097 = shalt.err (!%p4094_p5)
}
  0x51   : > { %3897 = dma.hbm_to_vmem [thread:$0]  (!%p4559_p6), %s5843_s5, 16, %s4563_s24, [#allocation16]  }
  0x52   : > { %s5844_s7 = sld [smem:[#allocation56_spill]] }
  0x58   : > { %s4098_s23 = scalar_lea.hbm %s5844_s7, 64 }
  0x59   : > { %p4099_p7 = scmp.ne.s32.totalorder %s5844_s7, %s4098_s23  ;;  %p4105_p1 = scmp.lt.u32.totalorder %s4098_s23, %s5844_s7 }
  0x5b   : > { %p4101_p9 = pnand %p4099_p7, %p4575_p8 }
  0x5d   : > { %p4102_p4 = pneg %p4101_p9 }
  0x5f   : > { %p4107_p3 = pnand %p4105_p1, %p4102_p4 }
  0x61   : > { %4110 = shalt.err (!%p4107_p3)
}
  0x62   : > { %s4111_s24 = scalar_lea.vmem %s4565_s27, 64  ;;  %p4119_p13 = scmp.lt.s32.totalorder %s4565_s27, %s4565_s27 }
  0x63   : > { %p4112_p10 = scmp.ne.s32.totalorder %s4565_s27, %s4111_s24  ;;  %p4120_p0 = scmp.lt.s32.totalorder %s4111_s24, %s4111_s24 }
  0x65   : > { %p4114_p11 = pnand %p4112_p10, %p4575_p8  ;;  %p4121_p2 = por %p4120_p0, %p4119_p13 }
  0x67   : > { %p4115_p12 = pneg %p4114_p11 }
  0x69   : > { %p4122_p5 = pnand %p4121_p2, %p4115_p12 }
  0x6b   : > { %4125 = shalt.err (!%p4122_p5)
}
  0x6c   : > { %3903 = dma.hbm_to_vmem [thread:$0]  (!%p4559_p6), %s5844_s7, 64, %s4565_s27, [#allocation19]  }
  0x6d   : > { %s3453_s11 = sadd.s32 4294967294, %s4436_s18   ;;  %s47_s12 = sadd.s32 1, %s4432_s17 }
  0x6e   : > { %s54_s30 = sadd.s32 1, %s4424_s15  ;;  %p49_p7 = scmp.ge.s32.totalorder %s47_s12, 2 }
  0x6f   : > { %p61_p9 = scmp.ne.s32.totalorder %s4424_s15, %s4420_s14  ;;  %p62_p4 = scmp.eq.s32.totalorder %s4436_s18, 0 }
  0x70   : > { %p67_p1 = scmp.ne.s32.totalorder %s4420_s14, %s4416_s13  ;;  %s5922_s12 = smov (%p49_p7, %s47_s12), 0 }
  0x71   : > { %5845 = sst [smem:[#allocation37_spill]] %s5922_s12  ;;  %p4648_p3 = por %p62_p4, %p61_p9 }
  0x72   : > { %p5847_p10 = scmp.eq.s32.totalorder %s4545_s19, 0  ;;  %s51_s26 = ssub.s32 %s4432_s17, %s5922_s12 }
  0x73   : > { %p307_p12 = scmp.eq.s32.totalorder %s4545_s19, 1  ;;  %p52_p13 = scmp.eq.s32.totalorder %s51_s26, 0 }
  0x74   : > { %p4654_p11 = por %p5847_p10, %p67_p1  ;;  %p313_p0 = scmp.eq.s32.totalorder %s3453_s11, 1 }
  0x75   : > { %p4661_p2 = por %p307_p12, %p61_p9  ;;  %p3933_p7 = scmp.lt.s32.totalorder %s4436_s18, 2 }
  0x76   : > { %s5848_s27 = scalar_select %p4654_p11, 1, 0 }
  0x77   : > { %s5850_s28 = scalar_select %p4661_p2, 1, 0 }
  0x78   : > { %5849 = sst [smem:[#allocation38_spill]] %s5848_s27  ;;  %p4668_p5 = por %p313_p0, %p67_p1 }
  0x79   : > { %5851 = sst [smem:[#allocation39_spill]] %s5850_s28  ;;  %s5792_s24 = sand.u32 1, %s4424_s15  }
  0x7a   : > { %s4666_s29 = scalar_select %p52_p13, %s4424_s15, %s54_s30  }
  0x7b   : > { %s5853_s22 = scalar_select %p4668_p5, 1, 0 }
  0x7c   : > { %5852 = sst [smem:[#allocation40_spill]] %s4666_s29  ;;  %s4676_s10 = sshll.u32 %s5792_s24, 6 }
  0x7d   : > { %5854 = sst [smem:[#allocation41_spill]] %s5853_s22  ;;  %s4679_s16 = sshll.u32 %s4432_s17, 10 }
  0x7e   : > { %p4683_p9 = pnand %p3933_p7, %p4648_p3  ;;  %s5797_s30 = sand.u32 1, %s4436_s18  }
  0x7f   : > { %s5856_s1 = sld [smem:[#allocation53_spill]]  ;;  %s432_s24 = scalar_lea.vmem [#allocation9], %s4676_s10 }
  0x80   : > { %s5855_s11 = scalar_select %p4683_p9, 1, 0 }
  0x81   : > { %s439_s7 = sshll.u32 %s432_s24, 4  ;;  %s4699_s23 = scalar_lea.sflag [#allocation10], %s5797_s30  ;;  %s4695_s7 = int_to_ptr.vmem [resolvable:$true] %s439_s7 }
  0x82   : > { %p4705_p1 = pneg %p4683_p9 }
  0x84   : > { %s5857_s17 = scalar_select %p4705_p1, 1, 0 }
  0x85   : > { %s4692_s5 = scalar_lea.hbm %s5856_s1, %s4679_s16  ;;  %s4131_s24 = scalar_lea.hbm %s5856_s1, 2048 }
  0x86   : > { %s4126_s12 = scalar_lea.hbm %s4692_s5, 1024  ;;  %p4132_p12 = scmp.lt.u32.totalorder %s4692_s5, %s5856_s1 }
  0x87   : > { %p4127_p4 = scmp.ne.s32.totalorder %s4692_s5, %s4126_s12  ;;  %p4133_p13 = scmp.lt.u32.totalorder %s4131_s24, %s4126_s12 }
  0x88   : > { %p4135_p7 = scmp.lt.u32.totalorder %s4126_s12, %s4692_s5 }
  0x89   : > { %p4129_p3 = pnand %p4705_p1, %p4127_p4  ;;  %p4134_p0 = por %p4133_p13, %p4132_p12 }
  0x8b   : > { %p4130_p10 = pneg %p4129_p3  ;;  %p4136_p5 = por %p4135_p7, %p4134_p0 }
  0x8d   : > { %p4137_p2 = pnand %p4136_p5, %p4130_p10 }
  0x8f   : > { %4140 = shalt.err (!%p4137_p2)
}
  0x90   : > { %s4141_s30 = scalar_lea.vmem %s4695_s7, 1024  ;;  %s4441_s4 = smov [#allocation9]  }
  0x91   : > { %p4142_p4 = scmp.ne.s32.totalorder %s4695_s7, %s4141_s30  ;;  %s4146_s26 = sshll.u32 %s4441_s4, 4  ;;  %s4147_s26 = int_to_ptr.vmem [resolvable:$false] %s4146_s26 }
  0x92   : > { %s4148_s29 = scalar_lea.vmem %s4147_s26, 2048  ;;  %p4149_p6 = scmp.lt.s32.totalorder %s4695_s7, %s4147_s26 }
  0x93   : > { %p4144_p3 = pnand %p4142_p4, %p4705_p1  ;;  %p4150_p8 = scmp.lt.s32.totalorder %s4148_s29, %s4141_s30 }
  0x95   : > { %p4145_p11 = pneg %p4144_p3  ;;  %p4151_p12 = por %p4150_p8, %p4149_p6 }
  0x97   : > { %p4152_p13 = pnand %p4151_p12, %p4145_p11 }
  0x99   : > { %4155 = shalt.err (!%p4152_p13)
}
  0x9a   : > { %s5815_s12 = smov 128   ;;  %s4443_s22 = smov 8  }
  0x9b   : > { %3916 = dma.hbm_to_vmem [thread:$0]  (!%p4683_p9), %s4692_s5, 1024, %s4695_s7, %s4699_s23, %s5815_s12, %s5815_s12, %s4443_s22  }
  0x9c   : > { %s4444_s24 = smov [#allocation17]   ;;  %s4445_s26 = smov [#allocation20]  }
  0x9d   : > { %s354_s4 = sshll.u32 %s4444_s24, 4  ;;  %s380_s30 = sshll.u32 %s4445_s26, 4  ;;  %s355_s4 = int_to_ptr.vmem [resolvable:$true] %s354_s4  ;;  %s381_s30 = int_to_ptr.vmem [resolvable:$true] %s380_s30 }
  0x9e   : > { %s4156_s13 = scalar_lea.hbm %s5784_s6, 256  ;;  %p5858_p8 = scmp.ne.s32.totalorder %s5842_s21, 0 }
  0x9f   : > { %p4157_p6 = scmp.ne.s32.totalorder %s5784_s6, %s4156_s13  ;;  %p4163_p5 = scmp.lt.u32.totalorder %s4156_s13, %s5784_s6 }
  0xa1   : > { %p4159_p11 = pnand %p4157_p6, %p5858_p8 }
  0xa3   : > { %p4160_p2 = pneg %p4159_p11 }
  0xa5   : > { %p4165_p10 = pnand %p4163_p5, %p4160_p2 }
  0xa7   : > { %4168 = shalt.err (!%p4165_p10)
}
  0xa8   : > { %s4169_s5 = scalar_lea.vmem %s355_s4, 256  ;;  %p4177_p3 = scmp.lt.s32.totalorder %s355_s4, %s355_s4 }
  0xa9   : > { %p4170_p0 = scmp.ne.s32.totalorder %s355_s4, %s4169_s5  ;;  %p4178_p12 = scmp.lt.s32.totalorder %s4169_s5, %s4169_s5 }
  0xab   : > { %p4172_p7 = pnand %p4170_p0, %p5858_p8  ;;  %p4179_p13 = por %p4178_p12, %p4177_p3 }
  0xad   : > { %p4173_p4 = pneg %p4172_p7 }
  0xaf   : > { %p4180_p9 = pnand %p4179_p13, %p4173_p4 }
  0xb1   : > { %4183 = shalt.err (!%p4180_p9)
}
  0xb2   : > { %p5859_p6 = scmp.ne.s32.totalorder %s5840_s25, 0  ;;  %s4184_s19 = scalar_lea.hbm %s5786_s8, 1152 }
  0xb3   : > { %p4185_p11 = scmp.ne.s32.totalorder %s5786_s8, %s4184_s19  ;;  %p4191_p5 = scmp.lt.u32.totalorder %s4184_s19, %s5786_s8 }
  0xb4   : > { %3900 = dma.hbm_to_vmem [thread:$0]  (!%p5859_p6), %s5784_s6, 256, %s355_s4, [#allocation16], %s5815_s12, %s5815_s12, %s4443_s22  }
  0xb5   : > { %p4187_p9 = pnand %p4185_p11, %p5858_p8 }
  0xb7   : > { %p4188_p2 = pneg %p4187_p9 }
  0xb9   : > { %p4193_p10 = pnand %p4191_p5, %p4188_p2 }
  0xbb   : > { %4196 = shalt.err (!%p4193_p10)
}
  0xbc   : > { %s4197_s29 = scalar_lea.vmem %s381_s30, 1152  ;;  %p4205_p3 = scmp.lt.s32.totalorder %s381_s30, %s381_s30 }
  0xbd   : > { %p4198_p0 = scmp.ne.s32.totalorder %s381_s30, %s4197_s29  ;;  %p4206_p12 = scmp.lt.s32.totalorder %s4197_s29, %s4197_s29 }
  0xbf   : > { %p4200_p7 = pnand %p4198_p0, %p5858_p8  ;;  %p4207_p13 = por %p4206_p12, %p4205_p3 }
  0xc1   : > { %p4201_p4 = pneg %p4200_p7 }
  0xc3   : > { %p4208_p1 = pnand %p4207_p13, %p4201_p4 }
  0xc5   : > { %4211 = shalt.err (!%p4208_p1)
}
  0xc6   : > { %s4446_s4 = smov 64   ;;  %s4447_s5 = smov 4  }
  0xc7   : > { %3906 = dma.hbm_to_vmem [thread:$0]  (!%p5859_p6), %s5786_s8, 1152, %s381_s30, [#allocation19], %s4446_s4, %s4446_s4, %s4447_s5  }
  0xc8   : > { %s4448_s13 = smov [#allocation21]   ;;  %s4212_s28 = scalar_lea.hbm %s5787_s9, 16 }
  0xc9   : > { %s396_s14 = sshll.u32 %s4448_s13, 4  ;;  %p4213_p1 = scmp.ne.s32.totalorder %s5787_s9, %s4212_s28  ;;  %s397_s14 = int_to_ptr.vmem [resolvable:$true] %s396_s14 }
  0xca   : > { %p4219_p2 = scmp.lt.u32.totalorder %s4212_s28, %s5787_s9 }
  0xcb   : > { %p4215_p11 = pnand %p4213_p1, %p5858_p8 }
  0xcd   : > { %p4216_p9 = pneg %p4215_p11 }
  0xcf   : > { %p4221_p5 = pnand %p4219_p2, %p4216_p9 }
  0xd1   : > { %4224 = shalt.err (!%p4221_p5)
}
  0xd2   : > { %s4225_s30 = scalar_lea.vmem %s397_s14, 16  ;;  %s4232_s4 = scalar_lea.vmem %s397_s14, 32 }
  0xd3   : > { %p4226_p10 = scmp.ne.s32.totalorder %s397_s14, %s4225_s30  ;;  %p4233_p4 = scmp.lt.s32.totalorder %s397_s14, %s397_s14 }
  0xd4   : > { %p4234_p3 = scmp.lt.s32.totalorder %s4232_s4, %s4225_s30 }
  0xd5   : > { %p4228_p0 = pnand %p4226_p10, %p5858_p8 }
  0xd6   : > { %p4235_p12 = por %p4234_p3, %p4233_p4 }
  0xd7   : > { %p4229_p7 = pneg %p4228_p0 }
  0xd9   : > { %p4236_p13 = pnand %p4235_p12, %p4229_p7 }
  0xdb   : > { %4239 = shalt.err (!%p4236_p13)
}
  0xdc   : > { %3909 = dma.hbm_to_vmem [thread:$0]  (!%p5859_p6), %s5787_s9, 16, %s397_s14, [#allocation22]  }
  0xdd   : > { %s4793_s7 = scalar_lea.hbm %s5778_s0, %s4679_s16  ;;  %s411_s13 = scalar_lea.vmem [#allocation6], %s4676_s10 }
  0xde   : > { %s418_s19 = sshll.u32 %s411_s13, 4  ;;  %s5860_s25 = sand.u32 1, %s4424_s15   ;;  %s4796_s19 = int_to_ptr.vmem [resolvable:$true] %s418_s19 }
  0xdf   : > { %s4800_s27 = scalar_lea.sflag [#allocation7], %s5860_s25  ;;  %s4240_s28 = scalar_lea.hbm %s4793_s7, 1024 }
  0xe0   : > { %p4241_p8 = scmp.ne.s32.totalorder %s4793_s7, %s4240_s28  ;;  %p5861_p1 = scmp.ne.s32.totalorder %s5857_s17, 0 }
  0xe1   : > { %s4245_s26 = scalar_lea.hbm %s5778_s0, 2048  ;;  %p4246_p9 = scmp.lt.u32.totalorder %s4793_s7, %s5778_s0 }
  0xe2   : > { %p4243_p6 = pnand %p4241_p8, %p5861_p1  ;;  %p4247_p2 = scmp.lt.u32.totalorder %s4245_s26, %s4240_s28 }
  0xe3   : > { %p4249_p10 = scmp.lt.u32.totalorder %s4240_s28, %s4793_s7 }
  0xe4   : > { %p4244_p11 = pneg %p4243_p6  ;;  %p4248_p5 = por %p4247_p2, %p4246_p9 }
  0xe6   : > { %p4250_p0 = por %p4249_p10, %p4248_p5 }
  0xe8   : > { %p4251_p7 = pnand %p4250_p0, %p4244_p11 }
  0xea   : > { %4254 = shalt.err (!%p4251_p7)
}
  0xeb   : > { %s4255_s4 = scalar_lea.vmem %s4796_s19, 1024  ;;  %s4449_s5 = smov [#allocation6]  }
  0xec   : > { %p4256_p4 = scmp.ne.s32.totalorder %s4796_s19, %s4255_s4  ;;  %s4260_s1 = sshll.u32 %s4449_s5, 4  ;;  %s4261_s1 = int_to_ptr.vmem [resolvable:$false] %s4260_s1 }
  0xed   : > { %s4262_s12 = scalar_lea.vmem %s4261_s1, 2048  ;;  %p4263_p13 = scmp.lt.s32.totalorder %s4796_s19, %s4261_s1 }
  0xee   : > { %p4258_p3 = pnand %p4256_p4, %p5861_p1  ;;  %p4264_p8 = scmp.lt.s32.totalorder %s4262_s12, %s4255_s4 }
  0xf0   : > { %p4259_p12 = pneg %p4258_p3  ;;  %p4265_p6 = por %p4264_p8, %p4263_p13 }
  0xf2   : > { %p4266_p9 = pnand %p4265_p6, %p4259_p12 }
  0xf4   : > { %4269 = shalt.err (!%p4266_p9)
}
  0xf5   : > { %p5862_p11 = scmp.ne.s32.totalorder %s5855_s11, 0  ;;  %s5863_s21 = smov 128  }
  0xf6   : > { %s4831_s28 = scalar_lea.hbm %s5780_s2, %s4679_s16  ;;  %s453_s14 = scalar_lea.vmem [#allocation11], %s4676_s10 }
  0xf7   : > { %3913 = dma.hbm_to_vmem [thread:$0]  (!%p5862_p11), %s4793_s7, 1024, %s4796_s19, %s4800_s27, %s5863_s21, %s5863_s21, %s4443_s22  }
  0xf8   : > { %s460_s24 = sshll.u32 %s453_s14, 4  ;;  %s4270_s26 = scalar_lea.hbm %s4831_s28, 1024  ;;  %s4834_s24 = int_to_ptr.vmem [resolvable:$true] %s460_s24 }
  0xf9   : > { %p4271_p2 = scmp.ne.s32.totalorder %s4831_s28, %s4270_s26  ;;  %s4275_s19 = scalar_lea.hbm %s5780_s2, 2048 }
  0xfa   : > { %p4276_p0 = scmp.lt.u32.totalorder %s4831_s28, %s5780_s2  ;;  %p4277_p7 = scmp.lt.u32.totalorder %s4275_s19, %s4270_s26 }
  0xfb   : > { %p4273_p5 = pnand %p4271_p2, %p5861_p1  ;;  %p4279_p3 = scmp.lt.u32.totalorder %s4270_s26, %s4831_s28 }
  0xfc   : > { %p4278_p4 = por %p4277_p7, %p4276_p0 }
  0xfd   : > { %p4274_p10 = pneg %p4273_p5 }
  0xfe   : > { %p4280_p12 = por %p4279_p3, %p4278_p4 }
 0x100   : > { %p4281_p13 = pnand %p4280_p12, %p4274_p10 }
 0x102   : > { %4284 = shalt.err (!%p4281_p13)
}
 0x103   : > { %s4285_s4 = scalar_lea.vmem %s4834_s24, 1024  ;;  %s4450_s5 = smov [#allocation11]  }
 0x104   : > { %p4286_p8 = scmp.ne.s32.totalorder %s4834_s24, %s4285_s4  ;;  %s4290_s1 = sshll.u32 %s4450_s5, 4  ;;  %s4291_s1 = int_to_ptr.vmem [resolvable:$false] %s4290_s1 }
 0x105   : > { %s4292_s12 = scalar_lea.vmem %s4291_s1, 2048  ;;  %p4293_p2 = scmp.lt.s32.totalorder %s4834_s24, %s4291_s1 }
 0x106   : > { %p4288_p6 = pnand %p4286_p8, %p5861_p1  ;;  %p4294_p5 = scmp.lt.s32.totalorder %s4292_s12, %s4285_s4 }
 0x108   : > { %p4289_p9 = pneg %p4288_p6  ;;  %p4295_p0 = por %p4294_p5, %p4293_p2 }
 0x10a   : > { %p4296_p7 = pnand %p4295_p0, %p4289_p9 }
 0x10c   : > { %4299 = shalt.err (!%p4296_p7)
}
 0x10d   : > { %3919 = dma.hbm_to_vmem [thread:$0]  (!%p5862_p11), %s4831_s28, 1024, %s4834_s24, %s4699_s23, %s5863_s21, %s5863_s21, %s4443_s22  }
 0x10e   : > { %s4865_s14 = scalar_lea.hbm %s5781_s3, %s4679_s16  ;;  %s474_s26 = scalar_lea.vmem [#allocation12], %s4676_s10 }
 0x10f   : > { %s481_s29 = sshll.u32 %s474_s26, 4  ;;  %s5864_s7 = sand.u32 1, %s4436_s18   ;;  %s4868_s29 = int_to_ptr.vmem [resolvable:$true] %s481_s29 }
 0x110   : > { %s4872_s19 = scalar_lea.sflag [#allocation13], %s5864_s7  ;;  %s4300_s27 = scalar_lea.hbm %s4865_s14, 1024 }
 0x111   : > { %p4301_p10 = scmp.ne.s32.totalorder %s4865_s14, %s4300_s27  ;;  %s4305_s16 = scalar_lea.hbm %s5781_s3, 2048 }
 0x112   : > { %p4306_p12 = scmp.lt.u32.totalorder %s4865_s14, %s5781_s3  ;;  %p4307_p13 = scmp.lt.u32.totalorder %s4305_s16, %s4300_s27 }
 0x113   : > { %p4303_p4 = pnand %p4301_p10, %p5861_p1  ;;  %p4309_p6 = scmp.lt.u32.totalorder %s4300_s27, %s4865_s14 }
 0x114   : > { %p4308_p8 = por %p4307_p13, %p4306_p12 }
 0x115   : > { %p4304_p3 = pneg %p4303_p4 }
 0x116   : > { %p4310_p9 = por %p4309_p6, %p4308_p8 }
 0x118   : > { %p4311_p2 = pnand %p4310_p9, %p4304_p3 }
 0x11a   : > { %4314 = shalt.err (!%p4311_p2)
}
 0x11b   : > { %s4315_s10 = scalar_lea.vmem %s4868_s29, 1024  ;;  %s4451_s4 = smov [#allocation12]  }
 0x11c   : > { %p4316_p5 = scmp.ne.s32.totalorder %s4868_s29, %s4315_s10  ;;  %s4320_s5 = sshll.u32 %s4451_s4, 4  ;;  %s4321_s5 = int_to_ptr.vmem [resolvable:$false] %s4320_s5 }
 0x11d   : > { %s4322_s1 = scalar_lea.vmem %s4321_s5, 2048  ;;  %p4323_p10 = scmp.lt.s32.totalorder %s4868_s29, %s4321_s5 }
 0x11e   : > { %p4318_p0 = pnand %p4316_p5, %p5861_p1  ;;  %p4324_p4 = scmp.lt.s32.totalorder %s4322_s1, %s4315_s10 }
 0x120   : > { %p4319_p7 = pneg %p4318_p0  ;;  %p4325_p12 = por %p4324_p4, %p4323_p10 }
 0x122   : > { %p4326_p13 = pnand %p4325_p12, %p4319_p7 }
 0x124   : > { %4329 = shalt.err (!%p4326_p13)
}
 0x125   : > { %3922 = dma.hbm_to_vmem [thread:$0]  (!%p5862_p11), %s4865_s14, 1024, %s4868_s29, %s4872_s19, %s5863_s21, %s5863_s21, %s4443_s22  }
 0x126   : > { %p5865_p1 = scmp.ne.s32.totalorder %s5839_s20, 0 }
 0x128   : > { %493 = sbr.rel (%p5865_p1) target bundleno = 1719 (0x6b7), region = 60 }
 0x12f   : > { %s5866_s17 = sld [smem:[#allocation33_spill]]  ;;  %s5867_s12 = sld [smem:[#allocation38_spill]] }
 0x135   : > { %s4902_s13 = sand.u32 1, %s5866_s17   ;;  %p5868_p3 = scmp.ne.s32.totalorder %s5867_s12, 0 }
 0x136   : > { %s4905_s25 = sshll.u32 %s4902_s13, 6  ;;  %s496_s11 = scalar_lea.sflag [#allocation7], %s4902_s13 }
 0x137   : > { %s4909_s26 = scalar_lea.vmem [#allocation6], %s4905_s25 }
 0x138   : > { %4383 = dma.done.wait (%p5868_p3), %s496_s11, 1024  }
 0x139   : > { %4385 = vsyncadd (%p5868_p3), %s496_s11, 4294966272  ;;  %s5869_s22 = sld [smem:[#allocation36_spill]]  ;;  %s4917_s14 = scalar_lea.vmem [#allocation9], %s4905_s25 }
 0x13f   : > { %s504_s20 = sand.u32 1, %s5869_s22  }
 0x140   : > { %s505_s21 = scalar_lea.sflag [#allocation10], %s504_s20 }
 0x141   : > { %4387 = dma.done.wait (%p5868_p3), %s505_s21, 2048  }
 0x142   : > { %4389 = vsyncadd (%p5868_p3), %s505_s21, 4294965248  ;;  %s4924_s29 = scalar_lea.vmem [#allocation11], %s4905_s25  ;;  %s523_s7 = scalar_lea.sflag [#allocation13], %s504_s20 }
 0x143   : > { %s4927_s19 = scalar_lea.vmem [#allocation12], %s4905_s25 }
 0x144   : > { %4391 = dma.done.wait (%p5868_p3), %s523_s7, 1024  }
 0x145   : > { %4393 = vsyncadd (%p5868_p3), %s523_s7, 4294966272  ;;  %p5870_p11 = scmp.eq.s32.totalorder %s5869_s22, 0 }
 0x147   : > { %4395 = dma.done.wait (%p5870_p11), [#allocation13], 16   ;;  %p5871_p8 = pmov %p5870_p11 }
 0x149   : > { %4397 = vsyncadd (%p5871_p8), [#allocation13], 4294967280  ;;  %p5872_p6 = pmov %p5871_p8 }
 0x14b   : > { %4399 = dma.done.wait (%p5872_p6), [#allocation16], 272   ;;  %p5873_p9 = pmov %p5872_p6 }
 0x14c   : > { %p5874_p2 = pmov %p5872_p6 }
 0x14d   : > { %4401 = vsyncadd (%p5873_p9), [#allocation16], 4294967024 }
 0x14e   : > { %4403 = dma.done.wait (%p5874_p2), [#allocation19], 1216   ;;  %p5875_p5 = pmov %p5874_p2 }
 0x14f   : > { %p5876_p0 = pmov %p5874_p2 }
 0x150   : > { %4405 = vsyncadd (%p5875_p5), [#allocation19], 4294966080 }
 0x151   : > { %4407 = dma.done.wait (%p5876_p0), [#allocation22], 16   ;;  %p5877_p7 = pmov %p5876_p0 }
 0x152   : > { %v5817_v0 = vmov 0.0|0.0   ;;  %vm4453_vm0 = vmmov 0   ;;  %v4454_v1 = vmov 0.0   ;;  %vm1341_vm1 = vcmask 122880   ;;  %v1463_v3 = vld [vmem:[#allocation3 + $0x4] sm:$0x1] }
 0x153   : > { %4409 = vsyncadd (%p5877_p7), [#allocation22], 4294967280  ;;  %3785 = vmatprep.subr.bf16.mxu0 %v5817_v0  ;;  %3675 = vmatprep.mubr.msk.f32.mxu0 %vm4453_vm0, %v4454_v1  ;;  %vm1342_vm2 = vsmask.f32 256  ;;  %v1469_v4 = vld [vmem:[#allocation3 + $0xc] sm:$0x1] }
 0x154   : > { %3678 = vmatprep.subr.mxu1 %v4454_v1  ;;  %3680 = vmatprep.mubr.msk.f32.mxu1 %vm4453_vm0, %v4454_v1  ;;  %vm4955_vm3 = vmand %vm1341_vm1, %vm1342_vm2  ;;  %v1472_v5 = vld [vmem:[#allocation3 + $0x14] sm:$0x1]  ;;  %vm615_vm4 = vcmask 130048   ;;  %v1475_v9 = vld [vmem:[#allocation3 + $0x1c] sm:$0x1]  ;;  %vm809_vm5 = vcmask 1043456  }
 0x155   : > { %v1464_v6 = vsel %vm4955_vm3, 0, %v1463_v3  ;;  %v1470_v7 = vsel %vm4955_vm3, 0, %v1469_v4  ;;  %v1473_v8 = vsel %vm4955_vm3, 0, %v1472_v5  ;;  %v728_v10 = vld [vmem:[#allocation17] sm:$0xff]  ;;  %v1476_v11 = vsel %vm4955_vm3, 0, %v1475_v9  ;;  %v729_v14 = vld [vmem:[#allocation17 + $0x8] sm:$0xff] }
 0x156   : > { %1465 = vst [vmem:[#allocation3 + $0x4] sm:$0x1] %v1464_v6  ;;  %1471 = vst [vmem:[#allocation3 + $0xc] sm:$0x1] %v1470_v7  ;;  %v1478_v12 = vld [vmem:[#allocation3 + $0x24] sm:$0x1]  ;;  %v4971_v19 = vpack.c.bf16 %v729_v14, %v728_v10 }
 0x157   : > { %1474 = vst [vmem:[#allocation3 + $0x14] sm:$0x1] %v1473_v8  ;;  %v1481_v13 = vld [vmem:[#allocation3 + $0x2c] sm:$0x1]  ;;  %1477 = vst [vmem:[#allocation3 + $0x1c] sm:$0x1] %v1476_v11 }
 0x158   : > { %v1479_v15 = vsel %vm4955_vm3, 0, %v1478_v12  ;;  %v1482_v16 = vsel %vm4955_vm3, 0, %v1481_v13  ;;  %v1484_v17 = vld [vmem:[#allocation3 + $0x34] sm:$0x1]  ;;  %v1487_v18 = vld [vmem:[#allocation3 + $0x3c] sm:$0x1]  ;;  %3787 = vmatpush3.bf16.msra.mxu0 %v4971_v19 }
 0x159   : > { %1480 = vst [vmem:[#allocation3 + $0x24] sm:$0x1] %v1479_v15  ;;  %1483 = vst [vmem:[#allocation3 + $0x2c] sm:$0x1] %v1482_v16  ;;  %v1485_v20 = vsel %vm4955_vm3, 0, %v1484_v17  ;;  %v1488_v21 = vsel %vm4955_vm3, 0, %v1487_v18  ;;  %3690 = vmatprep.subr.mxu0 %v4454_v1 }
 0x15a   : > { %v1490_v22 = vld [vmem:[#allocation3 + $0x44] sm:$0x1]  ;;  %v1679_v23 = vld [vmem:[#allocation4 + $0x44] sm:$0x1]  ;;  %1486 = vst [vmem:[#allocation3 + $0x34] sm:$0x1] %v1485_v20 }
 0x15b   : > { %1489 = vst [vmem:[#allocation3 + $0x3c] sm:$0x1] %v1488_v21  ;;  %v1491_v24 = vsel %vm4955_vm3, 0, %v1490_v22  ;;  %v1680_v25 = vsel %vm4955_vm3, 0, %v1679_v23  ;;  %v1751_v26 = vld [vmem:[#allocation5 + $0x44] sm:$0x1] }
 0x15c   : > { %v1754_v27 = vld [vmem:[#allocation5 + $0x4] sm:$0x1]  ;;  %1492 = vst [vmem:[#allocation3 + $0x44] sm:$0x1] %v1491_v24  ;;  %1681 = vst [vmem:[#allocation4 + $0x44] sm:$0x1] %v1680_v25 }
 0x15d   : > { %v1752_v28 = vsel %vm4955_vm3, 0, %v1751_v26  ;;  %v1755_v29 = vsel %vm4955_vm3, 0, %v1754_v27  ;;  %v1757_v30 = vld [vmem:[#allocation5 + $0xc] sm:$0x1]  ;;  %v1760_v31 = vld [vmem:[#allocation5 + $0x14] sm:$0x1] }
 0x15e   : > { %1753 = vst [vmem:[#allocation5 + $0x44] sm:$0x1] %v1752_v28  ;;  %1756 = vst [vmem:[#allocation5 + $0x4] sm:$0x1] %v1755_v29  ;;  %v1758_v32 = vsel %vm4955_vm3, 0, %v1757_v30  ;;  %v1761_v33 = vsel %vm4955_vm3, 0, %v1760_v31 }
 0x15f   : > { %v1763_v34 = vld [vmem:[#allocation5 + $0x1c] sm:$0x1]  ;;  %v1766_v35 = vld [vmem:[#allocation5 + $0x24] sm:$0x1]  ;;  %1759 = vst [vmem:[#allocation5 + $0xc] sm:$0x1] %v1758_v32 }
 0x160   : > { %1762 = vst [vmem:[#allocation5 + $0x14] sm:$0x1] %v1761_v33  ;;  %v1764_v36 = vsel %vm4955_vm3, 0, %v1763_v34  ;;  %v1767_v37 = vsel %vm4955_vm3, 0, %v1766_v35  ;;  %v1769_v38 = vld [vmem:[#allocation5 + $0x2c] sm:$0x1] }
 0x161   : > { %v1772_v39 = vld [vmem:[#allocation5 + $0x34] sm:$0x1]  ;;  %1765 = vst [vmem:[#allocation5 + $0x1c] sm:$0x1] %v1764_v36  ;;  %1768 = vst [vmem:[#allocation5 + $0x24] sm:$0x1] %v1767_v37 }
 0x162   : > { %v1466_v40 = vld [vmem:[#allocation3 + $0x4] sm:$0x1]  ;;  %v1770_v41 = vsel %vm4955_vm3, 0, %v1769_v38  ;;  %v1773_v42 = vsel %vm4955_vm3, 0, %v1772_v39  ;;  %v1775_v43 = vld [vmem:[#allocation5 + $0x3c] sm:$0x1] }
 0x163   : > { %v1467_v44 = vsel %vm4955_vm3, 0, %v1466_v40  ;;  %1771 = vst [vmem:[#allocation5 + $0x2c] sm:$0x1] %v1770_v41  ;;  %1774 = vst [vmem:[#allocation5 + $0x34] sm:$0x1] %v1773_v42  ;;  %v1776_v45 = vsel %vm4955_vm3, 0, %v1775_v43 }
 0x164   : > { %v5004_v46 = vld [vmem:[%s4909_s26] sm:$0xff]  ;;  %v5007_v47 = vld [vmem:[%s4909_s26 + $0x8] sm:$0xff]  ;;  %v5010_v48 = vld [vmem:[%s4909_s26 + $0x10] sm:$0xff]  ;;  %1468 = vst [vmem:[#allocation3 + $0x4] sm:$0x1] %v1467_v44  ;;  %vm805_vm6 = vcmask 31744  }
 0x165   : > { %1777 = vst [vmem:[#allocation5 + $0x3c] sm:$0x1] %v1776_v45  ;;  %v5013_v49 = vld [vmem:[%s4909_s26 + $0x18] sm:$0xff]  ;;  %v616_v50 = vsel %vm615_vm4, %v5004_v46, 0.0  ;;  %v617_v51 = vsel %vm615_vm4, %v5007_v47, 0.0  ;;  %v619_v52 = vsel %vm615_vm4, %v5010_v48, 0.0 }
 0x166   : > { %v5022_v53 = vld [vmem:[%s4909_s26 + $0x20] sm:$0xff]  ;;  %v5025_v54 = vld [vmem:[%s4909_s26 + $0x28] sm:$0xff]  ;;  %v618_v55 = vadd.f32 %v617_v51, %v616_v50  ;;  %v621_v57 = vsel %vm615_vm4, %v5013_v49, 0.0  ;;  %v5036_v59 = vld [vmem:[%s4917_s14 + $0x10] sm:$0xff]  ;;  %vm1335_vm7 = vcmask 125952   ;;  %s5907_s27 = sld [smem:[#allocation34_spill]] }
 0x167   : > { %v5028_v56 = vld [vmem:[%s4917_s14] sm:$0xff]  ;;  %v5033_v58 = vld [vmem:[%s4917_s14 + $0x8] sm:$0xff]  ;;  %5881 = vst [vmem:[#allocation43_spill] sm:$0xff] %v5036_v59  ;;  %v5039_v60 = vld [vmem:[%s4917_s14 + $0x18] sm:$0xff]  ;;  %v649_v6 = vsel %vm615_vm4, %v5036_v59, 0.0  ;;  %v623_v8 = vsel %vm615_vm4, %v5022_v53, 0.0 }
 0x168   : > { %5880 = vst [vmem:[#allocation42_spill] sm:$0xff] %v5033_v58  ;;  %5882 = vst [vmem:[#allocation44_spill] sm:$0xff] %v5039_v60  ;;  %v646_v61 = vsel %vm615_vm4, %v5028_v56, 0.0  ;;  %v1778_v62 = vld [vmem:[#allocation5 + $0x44] sm:$0x1]  ;;  %v5044_v63 = vld [vmem:[%s4909_s26 + $0x30] sm:$0xff]  ;;  %v620_v4 = vadd.f32 %v619_v52, %v618_v55 }
 0x169   : > { %v5047_v3 = vld [vmem:[%s4909_s26 + $0x38] sm:$0xff]  ;;  %v647_v5 = vsel %vm615_vm4, %v5033_v58, 0.0  ;;  %v1779_v7 = vsel %vm4955_vm3, 0, %v1778_v62  ;;  %v5058_v9 = vld [vmem:[%s4917_s14 + $0x20] sm:$0xff]  ;;  %v5061_v10 = vld [vmem:[%s4917_s14 + $0x28] sm:$0xff]  ;;  %v625_v14 = vsel %vm615_vm4, %v5025_v54, 0.0 }
 0x16a   : > { %5883 = vst [vmem:[#allocation45_spill] sm:$0xff] %v5058_v9  ;;  %5884 = vst [vmem:[#allocation46_spill] sm:$0xff] %v5061_v10  ;;  %v648_v11 = vadd.f32 %v647_v5, %v646_v61  ;;  %v5064_v12 = vld [vmem:[%s4924_s29] sm:$0xff]  ;;  %v622_v13 = vadd.f32 %v621_v57, %v620_v4  ;;  %v651_v15 = vsel %vm615_vm4, %v5039_v60, 0.0  ;;  %v5071_v16 = vld [vmem:[%s4924_s29 + $0x8] sm:$0xff]  ;;  %v627_v25 = vsel %vm615_vm4, %v5044_v63, 0.0 }
 0x16b   : > { %1780 = vst [vmem:[#allocation5 + $0x44] sm:$0x1] %v1779_v7  ;;  %5885 = vst [vmem:[#allocation47_spill] sm:$0xff] %v5071_v16  ;;  %v5074_v17 = vld [vmem:[%s4924_s29 + $0x10] sm:$0xff]  ;;  %v5077_v18 = vld [vmem:[%s4924_s29 + $0x18] sm:$0xff]  ;;  %v676_v21 = vsel %vm615_vm4, %v5064_v12, 0.0 }
 0x16c   : > { %v650_v20 = vadd.f32 %v649_v6, %v648_v11  ;;  %v677_v22 = vsel %vm615_vm4, %v5071_v16, 0.0  ;;  %v679_v23 = vsel %vm615_vm4, %v5074_v17, 0.0  ;;  %v624_v24 = vadd.f32 %v623_v8, %v622_v13  ;;  %v5090_v27 = vld [vmem:[%s4924_s29 + $0x20] sm:$0xff]  ;;  %v5096_v30 = vld [vmem:[%s4927_s19 + $0x8] sm:$0xff]  ;;  %v5101_v32 = vld [vmem:[%s4917_s14 + $0x30] sm:$0xff]  ;;  %s601_s23 = scalar_lea.vmem [#allocation23], %s4905_s25 }
 0x16d   : > { %v653_v26 = vsel %vm615_vm4, %v5058_v9, 0.0  ;;  %v678_v28 = vadd.f32 %v677_v22, %v676_v21  ;;  %v5093_v29 = vld [vmem:[%s4927_s19] sm:$0xff]  ;;  %v629_v31 = vsel %vm615_vm4, %v5047_v3, 0.0  ;;  %5886 = vst [vmem:[#allocation48_spill] sm:$0xff] %v5101_v32  ;;  %v655_v34 = vsel %vm615_vm4, %v5061_v10, 0.0  ;;  %v5108_v36 = vld [vmem:[%s4927_s19 + $0x10] sm:$0xff] }
 0x16e   : > { %v652_v33 = vadd.f32 %v651_v15, %v650_v20  ;;  %v681_v35 = vsel %vm615_vm4, %v5077_v18, 0.0  ;;  %v5111_v37 = vld [vmem:[%s4927_s19 + $0x18] sm:$0xff]  ;;  %v626_v38 = vadd.f32 %v625_v14, %v624_v24  ;;  %v5114_v39 = vld [vmem:[%s4924_s29 + $0x28] sm:$0xff]  ;;  %v706_v41 = vsel %vm615_vm4, %v5093_v29, 0.0  ;;  %v5126_v50 = vld [vmem:[%s4927_s19 + $0x20] sm:$0xff]  ;;  %s3242_s28 = sshll.u32 %s601_s23, 4  ;;  %s5724_s28 = int_to_ptr.vmem [resolvable:$true] %s3242_s28 }
 0x16f   : > { %v680_v40 = vadd.f32 %v679_v23, %v678_v28  ;;  %v707_v42 = vsel %vm615_vm4, %v5096_v30, 0.0  ;;  %v5121_v43 = vld [vmem:[%s4917_s14 + $0x38] sm:$0xff]  ;;  %v683_v45 = vsel %vm615_vm4, %v5090_v27, 0.0  ;;  %5887 = vst [vmem:[#allocation49_spill] sm:$0xff] %v5126_v50  ;;  %v709_v52 = vsel %vm615_vm4, %v5108_v36, 0.0  ;;  %v5133_v61 = vld [vmem:[%s4924_s29 + $0x30] sm:$0xff] }
 0x170   : > { %v654_v44 = vadd.f32 %v653_v26, %v652_v33  ;;  %v708_v51 = vadd.f32 %v707_v42, %v706_v41  ;;  %v628_v55 = vadd.f32 %v627_v25, %v626_v38  ;;  %v657_v57 = vsel %vm615_vm4, %v5101_v32, 0.0  ;;  %v5136_v62 = vld [vmem:[%s4924_s29 + $0x38] sm:$0xff]  ;;  %v5143_v8 = vld [vmem:[%s4927_s19 + $0x28] sm:$0xff]  ;;  %v5146_v11 = vld [vmem:[%s4927_s19 + $0x30] sm:$0xff]  ;;  %s3615_s16 = sshll.u32 %s5907_s27, 10  ;;  %s5908_s24 = sld [smem:[#allocation39_spill]] }
 0x171   : > { %v682_v4 = vadd.f32 %v681_v35, %v680_v40  ;;  %v711_v5 = vsel %vm615_vm4, %v5111_v37, 0.0  ;;  %v685_v7 = vsel %vm615_vm4, %v5114_v39, 0.0  ;;  %5888 = vst [vmem:[#allocation50_spill] sm:$0xff] %v5143_v8  ;;  %5889 = vst [vmem:[#allocation51_spill] sm:$0xff] %v5146_v11  ;;  %v659_v15 = vsel %vm615_vm4, %v5121_v43, 0.0  ;;  %v5157_v33 = vld [vmem:[%s4927_s19 + $0x38] sm:$0xff] }
 0x172   : > { %v656_v6 = vadd.f32 %v655_v34, %v654_v44  ;;  %v710_v13 = vadd.f32 %v709_v52, %v708_v51  ;;  %v630_v14 = vadd.f32 %v629_v31, %v628_v55  ;;  %v713_v21 = vsel %vm615_vm4, %v5126_v50, 0.0  ;;  %5890 = vst [vmem:[#allocation52_spill] sm:$0xff] %v5157_v33  ;;  %s5909_s4 = sld [smem:[#allocation57_spill]]  ;;  %s3228_s1 = scalar_lea.sflag [#allocation8], %s4902_s13 }
 0x173   : > { %v684_v20 = vadd.f32 %v683_v45, %v682_v4  ;;  %v687_v23 = vsel %vm615_vm4, %v5133_v61, 0.0  ;;  %v689_v24 = vsel %vm615_vm4, %v5136_v62, 0.0  ;;  %v715_v31 = vsel %vm615_vm4, %v5143_v8, 0.0  ;;  %s4330_s17 = scalar_lea.vmem %s5724_s28, 1024  ;;  %s4456_s12 = smov [#allocation23]  }
 0x174   : > { %v658_v22 = vadd.f32 %v657_v57, %v656_v6  ;;  %v712_v25 = vadd.f32 %v711_v5, %v710_v13  ;;  %v631_v26 = vrot.slane %v630_v14, 4  ;;  %v717_v34 = vsel %vm615_vm4, %v5146_v11, 0.0  ;;  %p4331_p10 = scmp.ne.s32.totalorder %s5724_s28, %s4330_s17  ;;  %s4334_s25 = sshll.u32 %s4456_s12, 4  ;;  %s4335_s25 = int_to_ptr.vmem [resolvable:$false] %s4334_s25 }
 0x175   : > { %v686_v28 = vadd.f32 %v685_v7, %v684_v20  ;;  %v719_v52 = vsel %vm615_vm4, %v5157_v33, 0.0  ;;  %vm1336_vm8 = vsmask.f32 7938  ;;  %vm2025_vm10 = vsmask.f32 3328  ;;  %s4336_s11 = scalar_lea.vmem %s4335_s25, 2048  ;;  %p4337_p1 = scmp.lt.s32.totalorder %s5724_s28, %s4335_s25 }
 0x176   : > { %v660_v35 = vadd.f32 %v659_v15, %v658_v22  ;;  %v714_v38 = vadd.f32 %v713_v21, %v712_v25  ;;  %v632_v40 = vadd.f32 %v631_v26, %v630_v14  ;;  %vm5314_vm9 = vmand %vm1335_vm7, %vm1336_vm8  ;;  %vm2026_vm11 = vsmask.f32 7440  ;;  %p5910_p4 = scmp.ne.s32.totalorder %s5908_s24, 0  ;;  %p4338_p3 = scmp.lt.s32.totalorder %s4336_s11, %s4330_s17 }
 0x177   : > { %v688_v41 = vadd.f32 %v687_v23, %v686_v28  ;;  %vm5429_vm12 = vmor %vm2025_vm10, %vm2026_vm11 }
 0x178   : > { %v661_v42 = vrot.slane %v660_v35, 4  ;;  %v716_v44 = vadd.f32 %v715_v31, %v714_v38  ;;  %v633_v45 = vrot.slane %v632_v40, 2  ;;  %s5729_s5 = scalar_lea.hbm %s5909_s4, %s3615_s16  ;;  %p4332_p12 = pnand %p4331_p10, %p5910_p4 }
 0x179   : > { %v690_v51 = vadd.f32 %v689_v24, %v688_v41  ;;  %p4339_p11 = por %p4338_p3, %p4337_p1 }
 0x17a   : > { %v662_v55 = vadd.f32 %v661_v42, %v660_v35  ;;  %v718_v57 = vadd.f32 %v717_v34, %v716_v44  ;;  %v634_v4 = vadd.f32 %v633_v45, %v632_v40  ;;  %v804_v44 = vld [vmem:[#allocation18] sm:$0xf]  ;;  %v5891_v45 = vmov 0.0|0.0   ;;  %p4333_p13 = pneg %p4332_p12 }
 0x17b   : > { %v691_v5 = vrot.slane %v690_v51, 4  ;;  %3679 = vmatpush3.msk.msra.mxu1 %vm809_vm5, %v804_v44 }
 0x17c   : > { %v663_v6 = vrot.slane %v662_v55, 2  ;;  %v720_v7 = vadd.f32 %v719_v52, %v718_v57  ;;  %v635_v13 = vrot.slane %v634_v4, 1  ;;  %3788 = vmatprep.subr.bf16.mxu1 %v5891_v45  ;;  %p4340_p8 = pnand %p4339_p11, %p4333_p13 }
 0x17d   : > { %v692_v20 = vadd.f32 %v691_v5, %v690_v51 }
 0x17e   : > { %v664_v0 = vadd.f32 %v663_v6, %v662_v55  ;;  %v721_v15 = vrot.slane %v720_v7, 4  ;;  %v636_v14 = vadd.f32 %v635_v13, %v634_v4  ;;  %v883_v55 = vlaneseq }
 0x17f   : > { %v693_v21 = vrot.slane %v692_v20, 2 }
 0x180   : > { %v665_v22 = vrot.slane %v664_v0, 1  ;;  %v722_v23 = vadd.f32 %v721_v15, %v720_v7  ;;  %v884_v57 = vshrl.u32 %v883_v55, 7 }
 0x181   : > { %v694_v25 = vadd.f32 %v693_v21, %v692_v20 }
 0x182   : > { %v666_v26 = vadd.f32 %v665_v22, %v664_v0  ;;  %v723_v24 = vrot.slane %v722_v23, 2  ;;  %v5173_v4 = vsub.s32 0, %v884_v57 }
 0x183   : > { %v695_v28 = vrot.slane %v694_v25, 1 }
 0x184   : > { %v667_v31 = vadd.f32 %v666_v26, %v636_v14  ;;  %v724_v38 = vadd.f32 %v723_v24, %v722_v23 }
 0x185   : > { %v696_v35 = vadd.f32 %v695_v28, %v694_v25 }
 0x186   : > { %v725_v34 = vrot.slane %v724_v38, 1 }
 0x187   : > { %v697_v40 = vadd.f32 %v696_v35, %v667_v31 }
 0x188   : > { %v726_v41 = vadd.f32 %v725_v34, %v724_v38 }
 0x18a   : > { %v727_v42 = vadd.f32 %v726_v41, %v697_v40 }
 0x18c   : > { %3676 = vmatmul.mubr.msk.f32.vlgmr.msra.gmra.mrb[0].mxu0 %vm615_vm4, %v727_v42 }
 0x18d   : > { %3692 = vmatprep.mubr.msk.f32.mxu0 %vm4453_vm0, %v4454_v1  ;;  %3691 = vmatpush3.msk.msra.mxu0 %vm809_vm5, %v804_v44 }
 0x25f   : > { %v799_v0 = vpop.f32.mrb[0].mxu0 }
 0x260   : > { %v803_v51 = vmul.f32 0.0009765625, %v799_v0  ;;  %v3677_v52 = vpop.f32.mrb[1].mxu0 }
 0x262   : > { %3681 = vmatmul.mubr.msk.f32.vlgmr.msra.gmra.mrb[0].mxu1 %vm805_vm6, %v803_v51 }
 0x263   : > { %3790 = vmatpush3.bf16.msra.mxu1 %v4971_v19  ;;  %3687 = vmatprep.mubr.msk.f32.mxu1 %vm4453_vm0, %v4454_v1 }
 0x335   : > { %v5175_v5 = vpop.f32.mrb[0].mxu1 }
 0x336   : > { %v3682_v6 = vpop.f32.mrb[1].mxu1  ;;  %v886_v7 = vrot.slane %v5175_v5, %v5173_v4 }
 0x338   : > { %v887_v13 = vsub.f32 %v5004_v46, %v886_v7  ;;  %v888_v20 = vsub.f32 %v5007_v47, %v886_v7  ;;  %v889_v15 = vsub.f32 %v5010_v48, %v886_v7  ;;  %v890_v19 = vsub.f32 %v5013_v49, %v886_v7 }
 0x339   : > { %v891_v1 = vsub.f32 %v5022_v53, %v886_v7  ;;  %v892_v21 = vsub.f32 %v5025_v54, %v886_v7  ;;  %v893_v14 = vsub.f32 %v5044_v63, %v886_v7  ;;  %v894_v22 = vsub.f32 %v5047_v3, %v886_v7 }
 0x33a   : > { %v925_v23 = vsub.f32 %v5028_v56, %v886_v7  ;;  %v926_v25 = vsub.f32 %v5033_v58, %v886_v7  ;;  %v927_v26 = vsub.f32 %v5036_v59, %v886_v7  ;;  %v928_v24 = vsub.f32 %v5039_v60, %v886_v7 }
 0x33b   : > { %v929_v28 = vsub.f32 %v5058_v9, %v886_v7  ;;  %v930_v31 = vsub.f32 %v5061_v10, %v886_v7  ;;  %v931_v38 = vsub.f32 %v5101_v32, %v886_v7  ;;  %v932_v35 = vsub.f32 %v5121_v43, %v886_v7 }
 0x33c   : > { %v963_v34 = vsub.f32 %v5064_v12, %v886_v7  ;;  %v964_v40 = vsub.f32 %v5071_v16, %v886_v7  ;;  %v965_v41 = vsub.f32 %v5074_v17, %v886_v7  ;;  %v966_v42 = vsub.f32 %v5077_v18, %v886_v7 }
 0x33d   : > { %v967_v44 = vsub.f32 %v5090_v27, %v886_v7  ;;  %v968_v45 = vsub.f32 %v5114_v39, %v886_v7  ;;  %v969_v0 = vsub.f32 %v5133_v61, %v886_v7  ;;  %v970_v51 = vsub.f32 %v5136_v62, %v886_v7 }
 0x33e   : > { %v1001_v52 = vsub.f32 %v5093_v29, %v886_v7  ;;  %v1002_v43 = vsub.f32 %v5096_v30, %v886_v7  ;;  %v1003_v12 = vsub.f32 %v5108_v36, %v886_v7  ;;  %v1004_v55 = vsub.f32 %v5111_v37, %v886_v7 }
 0x33f   : > { %v1005_v17 = vsub.f32 %v5126_v50, %v886_v7  ;;  %v1006_v18 = vsub.f32 %v5143_v8, %v886_v7  ;;  %v5210_v27 = vsub.f32 %v5146_v11, %v886_v7  ;;  %v5213_v39 = vsub.f32 %v5157_v33, %v886_v7 }
 0x340   : > { %v895_v61 = vmul.f32 %v887_v13, %v887_v13  ;;  %v896_v62 = vmul.f32 %v888_v20, %v888_v20  ;;  %v897_v57 = vmul.f32 %v889_v15, %v889_v15  ;;  %v898_v29 = vmul.f32 %v890_v19, %v890_v19 }
 0x341   : > { %v899_v6 = vmul.f32 %v891_v1, %v891_v1  ;;  %v900_v30 = vmul.f32 %v892_v21, %v892_v21  ;;  %v901_v16 = vmul.f32 %v893_v14, %v893_v14  ;;  %v902_v36 = vmul.f32 %v894_v22, %v894_v22 }
 0x342   : > { %v933_v32 = vmul.f32 %v925_v23, %v925_v23  ;;  %v934_v37 = vmul.f32 %v926_v25, %v926_v25  ;;  %v935_v10 = vmul.f32 %v927_v26, %v927_v26  ;;  %v936_v9 = vmul.f32 %v928_v24, %v928_v24 }
 0x343   : > { %v937_v60 = vmul.f32 %v929_v28, %v929_v28  ;;  %v938_v59 = vmul.f32 %v930_v31, %v930_v31  ;;  %v939_v58 = vmul.f32 %v931_v38, %v931_v38  ;;  %v940_v11 = vmul.f32 %v932_v35, %v932_v35 }
 0x344   : > { %v971_v8 = vmul.f32 %v963_v34, %v963_v34  ;;  %v972_v50 = vmul.f32 %v964_v40, %v964_v40  ;;  %v973_v7 = vmul.f32 %v965_v41, %v965_v41  ;;  %v974_v33 = vmul.f32 %v966_v42, %v966_v42 }
 0x345   : > { %v975_v13 = vmul.f32 %v967_v44, %v967_v44  ;;  %v903_v20 = vsel %vm615_vm4, %v895_v61, 0.0  ;;  %v904_v15 = vsel %vm615_vm4, %v896_v62, 0.0  ;;  %v976_v19 = vmul.f32 %v968_v45, %v968_v45 }
 0x346   : > { %v977_v1 = vmul.f32 %v969_v0, %v969_v0  ;;  %v5217_v21 = vmul.f32 %v970_v51, %v970_v51  ;;  %v905_v14 = vadd.f32 %v904_v15, %v903_v20  ;;  %v1009_v22 = vmul.f32 %v1001_v52, %v1001_v52 }
 0x347   : > { %v906_v23 = vsel %vm615_vm4, %v897_v57, 0.0  ;;  %v941_v25 = vsel %vm615_vm4, %v933_v32, 0.0  ;;  %v942_v26 = vsel %vm615_vm4, %v934_v37, 0.0  ;;  %v1010_v24 = vmul.f32 %v1002_v43, %v1002_v43 }
 0x348   : > { %v1011_v28 = vmul.f32 %v1003_v12, %v1003_v12  ;;  %v907_v31 = vadd.f32 %v906_v23, %v905_v14  ;;  %v943_v38 = vadd.f32 %v942_v26, %v941_v25  ;;  %v1012_v35 = vmul.f32 %v1004_v55, %v1004_v55 }
 0x349   : > { %v908_v34 = vsel %vm615_vm4, %v898_v29, 0.0  ;;  %v944_v40 = vsel %vm615_vm4, %v935_v10, 0.0  ;;  %v979_v41 = vsel %vm615_vm4, %v971_v8, 0.0  ;;  %v1013_v42 = vmul.f32 %v1005_v17, %v1005_v17 }
 0x34a   : > { %v909_v44 = vadd.f32 %v908_v34, %v907_v31  ;;  %v945_v45 = vadd.f32 %v944_v40, %v943_v38  ;;  %v980_v0 = vsel %vm615_vm4, %v972_v50, 0.0  ;;  %v1014_v51 = vmul.f32 %v1006_v18, %v1006_v18 }
 0x34b   : > { %v910_v32 = vsel %vm615_vm4, %v899_v6, 0.0  ;;  %v946_v52 = vsel %vm615_vm4, %v936_v9, 0.0  ;;  %v981_v43 = vadd.f32 %v980_v0, %v979_v41  ;;  %v912_v55 = vsel %vm615_vm4, %v900_v30, 0.0 }
 0x34c   : > { %v911_v12 = vadd.f32 %v910_v32, %v909_v44  ;;  %v947_v61 = vadd.f32 %v946_v52, %v945_v45  ;;  %v982_v62 = vsel %vm615_vm4, %v973_v7, 0.0  ;;  %v948_v10 = vsel %vm615_vm4, %v937_v60, 0.0 }
 0x34d   : > { %v983_v8 = vadd.f32 %v982_v62, %v981_v43  ;;  %v1017_v17 = vsel %vm615_vm4, %v1009_v22, 0.0  ;;  %v1018_v57 = vsel %vm615_vm4, %v1010_v24, 0.0  ;;  %v984_v29 = vsel %vm615_vm4, %v974_v33, 0.0 }
 0x34e   : > { %v913_v50 = vadd.f32 %v912_v55, %v911_v12  ;;  %v949_v18 = vadd.f32 %v948_v10, %v947_v61  ;;  %v1019_v6 = vadd.f32 %v1018_v57, %v1017_v17  ;;  %v914_v9 = vsel %vm615_vm4, %v901_v16, 0.0 }
 0x34f   : > { %v950_v37 = vsel %vm615_vm4, %v938_v59, 0.0  ;;  %v985_v30 = vadd.f32 %v984_v29, %v983_v8  ;;  %v1020_v20 = vsel %vm615_vm4, %v1011_v28, 0.0  ;;  %v986_v60 = vsel %vm615_vm4, %v975_v13, 0.0 }
 0x350   : > { %v915_v7 = vadd.f32 %v914_v9, %v913_v50  ;;  %v951_v15 = vadd.f32 %v950_v37, %v949_v18  ;;  %v1021_v14 = vadd.f32 %v1020_v20, %v1019_v6  ;;  %v916_v22 = vsel %vm615_vm4, %v902_v36, 0.0 }
 0x351   : > { %v952_v23 = vsel %vm615_vm4, %v939_v58, 0.0  ;;  %v987_v25 = vadd.f32 %v986_v60, %v985_v30  ;;  %v1022_v33 = vsel %vm615_vm4, %v1012_v35, 0.0  ;;  %v988_v16 = vsel %vm615_vm4, %v976_v19, 0.0 }
 0x352   : > { %v917_v26 = vadd.f32 %v916_v22, %v915_v7  ;;  %v953_v24 = vadd.f32 %v952_v23, %v951_v15  ;;  %v1023_v59 = vadd.f32 %v1022_v33, %v1021_v14  ;;  %v1015_v28 = vmul.f32 %v5210_v27, %v5210_v27 }
 0x353   : > { %v954_v31 = vsel %vm615_vm4, %v940_v11, 0.0  ;;  %v989_v38 = vadd.f32 %v988_v16, %v987_v25  ;;  %v1024_v13 = vsel %vm615_vm4, %v1013_v42, 0.0  ;;  %v990_v58 = vsel %vm615_vm4, %v977_v1, 0.0  ;;  %v4005_v16 = vld [vmem:[#allocation20 + $0x8] sm:$0xff]  }
 0x354   : > { %v918_v34 = vrot.slane %v917_v26, 4  ;;  %v955_v36 = vadd.f32 %v954_v31, %v953_v24  ;;  %v1025_v40 = vadd.f32 %v1024_v13, %v1023_v59  ;;  %v1016_v35 = vmul.f32 %v5213_v39, %v5213_v39  ;;  %v4006_v59 = vld [vmem:[#allocation20 + $0x20] sm:$0xff]   ;;  %3695 = vmatprep.subr.bf16.mxu0 %v4005_v16 }
 0x355   : > { %v991_v41 = vadd.f32 %v990_v58, %v989_v38  ;;  %v1026_v19 = vsel %vm615_vm4, %v1014_v51, 0.0  ;;  %v992_v27 = vsel %vm615_vm4, %v5217_v21, 0.0  ;;  %v1028_v42 = vsel %vm615_vm4, %v1015_v28, 0.0  ;;  %3791 = vmatprep.subr.bf16.mxu1 %v4006_v59  ;;  %v5261_v38 = vld [vmem:[#allocation20] sm:$0xff]   ;;  %v1391_v58 = vld [vmem:[#allocation2 + $0x4] sm:$0x1] }
 0x356   : > { %v919_v44 = vadd.f32 %v918_v34, %v917_v26  ;;  %v956_v45 = vrot.slane %v955_v36, 4  ;;  %v1027_v11 = vadd.f32 %v1026_v19, %v1025_v40  ;;  %v1030_v12 = vsel %vm615_vm4, %v1016_v35, 0.0 }
 0x357   : > { %v993_v0 = vadd.f32 %v992_v27, %v991_v41  ;;  %v4455_v24 = vmov 0   ;;  %v1392_v40 = vsel %vm4955_vm3, 0, %v1391_v58 }
 0x358   : > { %v920_v32 = vrot.slane %v919_v44, 2  ;;  %v957_v52 = vadd.f32 %v956_v45, %v955_v36  ;;  %v1029_v43 = vadd.f32 %v1028_v42, %v1027_v11  ;;  %1462 = vst.msk [vmem:[#allocation3] sm:$0xf] %vm1335_vm7, %v4455_v24  ;;  %1678 = vst.msk [vmem:[#allocation4 + $0x40] sm:$0xf] %vm1335_vm7, %v4455_v24  ;;  %v5266_v36 = vld [vmem:[#allocation20 + $0x28] sm:$0xff]  }
 0x359   : > { %v994_v1 = vrot.slane %v993_v0, 4  ;;  %1390 = vst.msk [vmem:[#allocation2] sm:$0xf] %vm1335_vm7, %v4455_v24  ;;  %1393 = vst [vmem:[#allocation2 + $0x4] sm:$0x1] %v1392_v40 }
 0x35a   : > { %v921_v55 = vadd.f32 %v920_v32, %v919_v44  ;;  %v958_v39 = vrot.slane %v957_v52, 2  ;;  %v1031_v61 = vadd.f32 %v1030_v12, %v1029_v43  ;;  %v1188_v44 = vld [vmem:[#allocation14] sm:$0x1]  ;;  %v1190_v32 = vld [vmem:[#allocation15] sm:$0x1] }
 0x35b   : > { %v995_v62 = vadd.f32 %v994_v1, %v993_v0  ;;  %v1191_v0 = vmul.f32 %v1188_v44, %v5175_v5 }
 0x35c   : > { %v922_v51 = vrot.slane %v921_v55, 1  ;;  %v959_v10 = vadd.f32 %v958_v39, %v957_v52  ;;  %v1032_v8 = vrot.slane %v1031_v61, 4 }
 0x35d   : > { %v996_v17 = vrot.slane %v995_v62, 2 }
 0x35e   : > { %v923_v57 = vadd.f32 %v922_v51, %v921_v55  ;;  %v960_v21 = vrot.slane %v959_v10, 1  ;;  %v1033_v50 = vadd.f32 %v1032_v8, %v1031_v61 }
 0x35f   : > { %v997_v18 = vadd.f32 %v996_v17, %v995_v62  ;;  %v1706_v28 = vld [vmem:[#allocation4 + $0x40] sm:$0x1] }
 0x360   : > { %v961_v29 = vadd.f32 %v960_v21, %v959_v10  ;;  %v1034_v6 = vrot.slane %v1033_v50, 2  ;;  %v1707_v31 = vsel %vm4955_vm3, 0, %v1706_v28  ;;  %v1394_v13 = vld [vmem:[#allocation2] sm:$0x1]  ;;  %v2010_v11 = vld [vmem:[#allocation2 + $0x4] sm:$0x1] }
 0x361   : > { %v998_v9 = vrot.slane %v997_v18, 1  ;;  %1708 = vst [vmem:[#allocation4 + $0x40] sm:$0x1] %v1707_v31  ;;  %v1395_v34 = vsel %vm4955_vm3, 0, %v1394_v13  ;;  %v2038_v43 = vshll.u32 %v2010_v11, 16 }
 0x362   : > { %v962_v37 = vadd.f32 %v961_v29, %v923_v57  ;;  %v1035_v30 = vadd.f32 %v1034_v6, %v1033_v50  ;;  %1396 = vst [vmem:[#allocation2] sm:$0x1] %v1395_v34  ;;  %v1347_v31 = vld [vmem:[#allocation2 + $0x10] sm:$0xf] }
 0x363   : > { %v999_v20 = vadd.f32 %v998_v9, %v997_v18  ;;  %v5277_v51 = vrot.slane %v2038_v43, 5 }
 0x364   : > { %v1036_v7 = vrot.slane %v1035_v30, 1 }
 0x365   : > { %v1000_v15 = vadd.f32 %v999_v20, %v962_v37 }
 0x366   : > { %v1037_v60 = vadd.f32 %v1036_v7, %v1035_v30 }
 0x368   : > { %v1038_v14 = vadd.f32 %v1037_v60, %v1000_v15 }
 0x369   : > { %v2009_v35 = vld [vmem:[#allocation2] sm:$0xf] }
 0x36a   : > { %3688 = vmatmul.mubr.msk.f32.vlgmr.msra.gmra.mrb[2].mxu1 %vm615_vm4, %v1038_v14  ;;  %v2029_v41 = vshrl.u32 %v2009_v35, 16  ;;  %v2032_v19 = vshll.u32 %v2009_v35, 16 }
 0x36b   : > { %3792 = vmatpush3.bf16.msra.mxu1 %v4006_v59 }
 0x36c   : > { %3745 = vmatprep.subr.bf16.mxu1 %v5266_v36  ;;  %v2031_v45 = vrot.slane %v2029_v41, 4  ;;  %v2034_v27 = vrot.slane %v2032_v19, 5  ;;  %v1350_v41 = vld [vmem:[#allocation2 + $0x14] sm:$0x1]  ;;  %v1353_v19 = vld [vmem:[#allocation2 + $0x18] sm:$0xf] }
 0x36e   : > { %v2035_v52 = vor.u32 %v2034_v27, %v2031_v45 }
 0x370   : > { %v5275_v62 = vrot.slane %v2035_v52, 4 }
 0x43d   : > { %v1108_v22 = vpop.f32.mrb[2].mxu1 }
 0x43e   : > { %v1112_v23 = vmul.f32 0.0009765625, %v1108_v22  ;;  %v3689_v25 = vpop.f32.mrb[3].mxu1 }
 0x440   : > { %v1113_v33 = vadd.f32 1e-05, %v1112_v23 }
 0x442   : > { %4038 = vrsqrt.f32 %v1113_v33 }
 0x44c   : > { %v4039_v26 = vpop.eup %4038 }
 0x44d   : > { %3693 = vmatmul.mubr.msk.f32.vlgmr.msra.gmra.mrb[2].mxu0 %vm805_vm6, %v4039_v26 }
 0x44e   : > { %3696 = vmatpush3.bf16.msra.mxu0 %v4005_v16 }
 0x44f   : > { %3705 = vmatprep.subr.bf16.mxu0 %v5261_v38 }
 0x520   : > { %v1184_v42 = vpop.f32.mrb[2].mxu0 }
 0x521   : > { %v1189_v1 = vmul.f32 %v1188_v44, %v1184_v42  ;;  %v1192_v12 = vmul.f32 %v1191_v0, %v1184_v42  ;;  %v3694_v55 = vpop.f32.mrb[3].mxu0  ;;  %v1356_v0 = vld [vmem:[#allocation2 + $0x1c] sm:$0x1]  ;;  %v1362_v42 = vld [vmem:[#allocation2 + $0x24] sm:$0x1] }
 0x523   : > { %v1193_v39 = vsub.f32 %v1190_v32, %v1192_v12  ;;  %v5273_v61 = vrot.slane %v1189_v1, %v5173_v4  ;;  %v1365_v12 = vld [vmem:[#allocation2 + $0x28] sm:$0xf] }
 0x525   : > { %v5280_v10 = vrot.slane %v1193_v39, %v5173_v4  ;;  %v1200_v5 = vmul.f32 %v5273_v61, %v5004_v46  ;;  %v1201_v8 = vmul.f32 %v5273_v61, %v5007_v47  ;;  %v1202_v17 = vmul.f32 %v5273_v61, %v5010_v48 }
 0x526   : > { %v1203_v57 = vmul.f32 %v5273_v61, %v5013_v49  ;;  %v1204_v21 = vmul.f32 %v5273_v61, %v5022_v53  ;;  %v1205_v50 = vmul.f32 %v5273_v61, %v5025_v54  ;;  %v1206_v4 = vmul.f32 %v5273_v61, %v5044_v63 }
 0x527   : > { %v1207_v46 = vmul.f32 %v5273_v61, %v5047_v3  ;;  %v1214_v47 = vadd.f32 %v5280_v10, %v1200_v5  ;;  %v1215_v18 = vadd.f32 %v5280_v10, %v1201_v8  ;;  %v1216_v48 = vadd.f32 %v5280_v10, %v1202_v17  ;;  %v1368_v17 = vld [vmem:[#allocation2 + $0x2c] sm:$0x1] }
 0x528   : > { %v1217_v49 = vadd.f32 %v5280_v10, %v1203_v57  ;;  %v1218_v29 = vadd.f32 %v5280_v10, %v1204_v21  ;;  %v1219_v53 = vadd.f32 %v5280_v10, %v1205_v50  ;;  %v1220_v54 = vadd.f32 %v5280_v10, %v1206_v4 }
 0x529   : > { %v1221_v6 = vadd.f32 %v5280_v10, %v1207_v46  ;;  %v3599_v63 = vpack.c.bf16 %v1214_v47, %v1214_v47  ;;  %v3600_v9 = vpack.c.bf16 %v1215_v18, %v1215_v18  ;;  %v3601_v37 = vpack.c.bf16 %v1216_v48, %v1216_v48  ;;  %v1371_v46 = vld [vmem:[#allocation2 + $0x30] sm:$0xf] }
 0x52a   : > { %v3602_v3 = vpack.c.bf16 %v1217_v49, %v1217_v49  ;;  %v3603_v30 = vpack.c.bf16 %v1218_v29, %v1218_v29  ;;  %v3604_v20 = vpack.c.bf16 %v1219_v53, %v1219_v53  ;;  %v5306_v7 = vpack.c.bf16 %v1220_v54, %v1220_v54  ;;  %v1374_v29 = vld [vmem:[#allocation2 + $0x34] sm:$0x1]  ;;  %v1377_v53 = vld [vmem:[#allocation2 + $0x38] sm:$0xf] }
 0x52b   : > { %v5308_v15 = vpack.c.bf16 %v1221_v6, %v1221_v6  ;;  %v1255_v60 = vshrl.u32 %v3599_v63, 16  ;;  %v1258_v14 = vshll.u32 %v3599_v63, 16  ;;  %v1263_v22 = vshrl.u32 %v3600_v9, 16 }
 0x52c   : > { %v1266_v23 = vshll.u32 %v3600_v9, 16  ;;  %v1271_v25 = vshrl.u32 %v3601_v37, 16  ;;  %v1274_v33 = vshll.u32 %v3601_v37, 16  ;;  %v1279_v26 = vshrl.u32 %v3602_v3, 16  ;;  %v1380_v37 = vld [vmem:[#allocation2 + $0x3c] sm:$0x1] }
 0x52d   : > { %v5310_v24 = vrot.slane %v1255_v60, 7  ;;  %v1265_v16 = vrot.slane %v1263_v22, 7  ;;  %v1282_v59 = vshll.u32 %v3602_v3, 16  ;;  %v1287_v28 = vshrl.u32 %v3603_v30, 16  ;;  %v1383_v3 = vld [vmem:[#allocation2 + $0x40] sm:$0xf] }
 0x52e   : > { %v1273_v13 = vrot.slane %v1271_v25, 7  ;;  %v1281_v34 = vrot.slane %v1279_v26, 7  ;;  %v1290_v58 = vshll.u32 %v3603_v30, 16  ;;  %v1295_v40 = vshrl.u32 %v3604_v20, 16  ;;  %v1386_v30 = vld [vmem:[#allocation2 + $0x44] sm:$0x1] }
 0x52f   : > { %v5319_v44 = vor.u32 %v1258_v14, %v5310_v24  ;;  %v1261_v45 = vrot.slane %v5310_v24, 4  ;;  %v1268_v27 = vor.u32 %v1266_v23, %v1265_v16  ;;  %v1269_v11 = vrot.slane %v1265_v16, 4 }
 0x530   : > { %v1276_v32 = vor.u32 %v1274_v33, %v1273_v13  ;;  %v1277_v52 = vrot.slane %v1273_v13, 4  ;;  %v5322_v43 = vor.u32 %v1282_v59, %v1281_v34  ;;  %v1285_v1 = vrot.slane %v1281_v34, 4  ;;  %v5894_v59 = vld [vmem:[#allocation49_spill] sm:$0xff] }
 0x531   : > { %v1289_v55 = vrot.slane %v1287_v28, 7  ;;  %v1297_v39 = vrot.slane %v1295_v40, 7  ;;  %v1298_v5 = vshll.u32 %v3604_v20, 16  ;;  %v1303_v8 = vshrl.u32 %v5306_v7, 16  ;;  %v5895_v40 = vld [vmem:[#allocation50_spill] sm:$0xff] }
 0x532   : > { %v1306_v57 = vshll.u32 %v5306_v7, 16  ;;  %v1311_v21 = vshrl.u32 %v5308_v15, 16  ;;  %v1314_v50 = vshll.u32 %v5308_v15, 16  ;;  %v1348_v4 = vsel %vm5314_vm9, %v1268_v27, %v1347_v31  ;;  %v5896_v27 = vld [vmem:[#allocation42_spill] sm:$0xff] }
 0x533   : > { %v1292_v47 = vor.u32 %v1290_v58, %v1289_v55  ;;  %v1293_v18 = vrot.slane %v1289_v55, 4  ;;  %v1300_v48 = vor.u32 %v1298_v5, %v1297_v39  ;;  %v1301_v49 = vrot.slane %v1297_v39, 4  ;;  %1349 = vst [vmem:[#allocation2 + $0x10] sm:$0xf] %v1348_v4  ;;  %v5900_v55 = vld [vmem:[#allocation44_spill] sm:$0xff] }
 0x534   : > { %v1305_v54 = vrot.slane %v1303_v8, 7  ;;  %v1313_v6 = vrot.slane %v1311_v21, 7  ;;  %v1351_v63 = vsel %vm4955_vm3, %v1269_v11, %v1350_v41  ;;  %v1354_v9 = vsel %vm5314_vm9, %v1276_v32, %v1353_v19  ;;  %v5898_v32 = vld [vmem:[#allocation51_spill] sm:$0xff] }
 0x535   : > { %1352 = vst [vmem:[#allocation2 + $0x14] sm:$0x1] %v1351_v63  ;;  %1355 = vst [vmem:[#allocation2 + $0x18] sm:$0xf] %v1354_v9  ;;  %v1357_v20 = vsel %vm4955_vm3, %v1277_v52, %v1356_v0  ;;  %v1363_v7 = vsel %vm4955_vm3, %v1285_v1, %v1362_v42  ;;  %v1366_v15 = vsel %vm5314_vm9, %v1292_v47, %v1365_v12  ;;  %v5897_v0 = vld [vmem:[#allocation43_spill] sm:$0xff]  ;;  %v5899_v1 = vld [vmem:[#allocation52_spill] sm:$0xff] }
 0x536   : > { %v1369_v60 = vsel %vm4955_vm3, %v1293_v18, %v1368_v17  ;;  %v1308_v14 = vor.u32 %v1306_v57, %v1305_v54  ;;  %v1309_v22 = vrot.slane %v1305_v54, 4  ;;  %v1316_v23 = vor.u32 %v1314_v50, %v1313_v6  ;;  %1358 = vst [vmem:[#allocation2 + $0x1c] sm:$0x1] %v1357_v20  ;;  %1364 = vst [vmem:[#allocation2 + $0x24] sm:$0x1] %v1363_v7 }
 0x537   : > { %v1317_v25 = vrot.slane %v1313_v6, 4  ;;  %1370 = vst [vmem:[#allocation2 + $0x2c] sm:$0x1] %v1369_v60  ;;  %1367 = vst [vmem:[#allocation2 + $0x28] sm:$0xf] %v1366_v15  ;;  %v1372_v33 = vsel %vm5314_vm9, %v1300_v48, %v1371_v46  ;;  %v1375_v26 = vsel %vm4955_vm3, %v1301_v49, %v1374_v29  ;;  %v1429_v16 = vmul.f32 %v5273_v61, %v5028_v56  ;;  %v5901_v46 = vld [vmem:[#allocation45_spill] sm:$0xff] }
 0x538   : > { %v1721_v28 = vmul.f32 %v5273_v61, %v5894_v59  ;;  %1376 = vst [vmem:[#allocation2 + $0x34] sm:$0x1] %v1375_v26  ;;  %v1378_v31 = vsel %vm5314_vm9, %v1308_v14, %v1377_v53  ;;  %v1381_v13 = vsel %vm4955_vm3, %v1309_v22, %v1380_v37  ;;  %v1384_v34 = vsel %vm5314_vm9, %v1316_v23, %v1383_v3  ;;  %v1338_v18 = vld [vmem:[#allocation2 + $0x8] sm:$0xf]  ;;  %v1359_v9 = vld [vmem:[#allocation2 + $0x20] sm:$0xf] }
 0x539   : > { %v1387_v58 = vsel %vm4955_vm3, %v1317_v25, %v1386_v30  ;;  %1373 = vst [vmem:[#allocation2 + $0x30] sm:$0xf] %v1372_v33  ;;  %1379 = vst [vmem:[#allocation2 + $0x38] sm:$0xf] %v1378_v31  ;;  %v1437_v56 = vadd.f32 %v1429_v16, %v5280_v10  ;;  %v1722_v41 = vmul.f32 %v5273_v61, %v5895_v40  ;;  %v5902_v53 = vld [vmem:[#allocation46_spill] sm:$0xff]  ;;  %v5903_v60 = vld [vmem:[#allocation48_spill] sm:$0xff] }
 0x53a   : > { %1382 = vst [vmem:[#allocation2 + $0x3c] sm:$0x1] %v1381_v13  ;;  %1385 = vst [vmem:[#allocation2 + $0x40] sm:$0xf] %v1384_v34  ;;  %v1729_v19 = vadd.f32 %v1721_v28, %v5280_v10  ;;  %v1430_v11 = vmul.f32 %v5273_v61, %v5896_v27  ;;  %v1431_v42 = vmul.f32 %v5273_v61, %v5897_v0  ;;  %v1400_v6 = vld [vmem:[#allocation2 + $0x10] sm:$0x1] }
 0x53b   : > { %1388 = vst [vmem:[#allocation2 + $0x44] sm:$0x1] %v1387_v58  ;;  %v1723_v52 = vmul.f32 %v5273_v61, %v5898_v32  ;;  %v1724_v12 = vmul.f32 %v5273_v61, %v5899_v1  ;;  %v1432_v39 = vmul.f32 %v5273_v61, %v5900_v55  ;;  %v1445_v5 = vpack.c.bf16 %v1437_v56, %v1437_v56  ;;  %v1344_v33 = vld [vmem:[#allocation2 + $0xc] sm:$0x1]  ;;  %v1495_v26 = vld [vmem:[%s4924_s29 + $0x10] sm:$0xff]  ;;  %v1496_v13 = vld [vmem:[%s4924_s29 + $0x18] sm:$0xff] }
 0x53c   : > { %v1730_v8 = vadd.f32 %v1722_v41, %v5280_v10  ;;  %v1737_v17 = vpack.c.bf16 %v1729_v19, %v1729_v19  ;;  %v1438_v57 = vadd.f32 %v1430_v11, %v5280_v10  ;;  %v1439_v21 = vadd.f32 %v1431_v42, %v5280_v10  ;;  %v1403_v63 = vld [vmem:[#allocation2 + $0x18] sm:$0x1]  ;;  %v1497_v34 = vld [vmem:[%s4924_s29 + $0x20] sm:$0xff]  ;;  %v1499_v19 = vld [vmem:[%s4924_s29 + $0x30] sm:$0xff] }
 0x53d   : > { %v1731_v50 = vadd.f32 %v1723_v52, %v5280_v10  ;;  %v1732_v4 = vadd.f32 %v1724_v12, %v5280_v10  ;;  %v1433_v47 = vmul.f32 %v5273_v61, %v5901_v46  ;;  %1454 = vst.msk [vmem:[#allocation3 + $0x8] sm:$0xf] %vm1335_vm7, %v1445_v5  ;;  %v1440_v29 = vadd.f32 %v1432_v39, %v5280_v10  ;;  %v4040_v11 = vld [vmem:[%s4924_s29] sm:$0xff]  ;;  %v5904_v42 = vld [vmem:[#allocation47_spill] sm:$0xff]  ;;  %v1500_v1 = vld [vmem:[%s4924_s29 + $0x38] sm:$0xff] }
 0x53e   : > { %v1738_v48 = vpack.c.bf16 %v1730_v8, %v1730_v8  ;;  %1745 = vst.msk [vmem:[#allocation5 + $0x20] sm:$0xf] %vm1335_vm7, %v1737_v17  ;;  %v1446_v49 = vpack.c.bf16 %v1438_v57, %v1438_v57  ;;  %v1434_v54 = vmul.f32 %v5273_v61, %v5902_v53  ;;  %v1447_v37 = vpack.c.bf16 %v1439_v21, %v1439_v21  ;;  %v1409_v7 = vld [vmem:[#allocation2 + $0x28] sm:$0x1]  ;;  %v1709_v5 = vld [vmem:[%s4927_s19] sm:$0xff]  ;;  %v1711_v46 = vld [vmem:[%s4927_s19 + $0x10] sm:$0xff] }
 0x53f   : > { %v1739_v3 = vpack.c.bf16 %v1731_v50, %v1731_v50  ;;  %v1740_v30 = vpack.c.bf16 %v1732_v4, %v1732_v4  ;;  %v1441_v20 = vadd.f32 %v1433_v47, %v5280_v10  ;;  %v1448_v15 = vpack.c.bf16 %v1440_v29, %v1440_v29  ;;  %v1710_v8 = vld [vmem:[%s4927_s19 + $0x8] sm:$0xff]  ;;  %v1428_v29 = vld [vmem:[%s4917_s14 + $0x38] sm:$0xff] }
 0x540   : > { %1746 = vst.msk [vmem:[#allocation5 + $0x28] sm:$0xf] %vm1335_vm7, %v1738_v48  ;;  %1455 = vst.msk [vmem:[#allocation3 + $0x10] sm:$0xf] %vm1335_vm7, %v1446_v49  ;;  %v1435_v14 = vmul.f32 %v5273_v61, %v5903_v60  ;;  %v1442_v22 = vadd.f32 %v1434_v54, %v5280_v10  ;;  %v1339_v23 = vsel %vm5314_vm9, %v5319_v44, %v1338_v18  ;;  %v1412_v25 = vld [vmem:[#allocation2 + $0x30] sm:$0x1] }
 0x541   : > { %1456 = vst.msk [vmem:[#allocation3 + $0x18] sm:$0xf] %vm1335_vm7, %v1447_v37  ;;  %1747 = vst.msk [vmem:[#allocation5 + $0x30] sm:$0xf] %vm1335_vm7, %v1739_v3  ;;  %v1449_v16 = vpack.c.bf16 %v1441_v20, %v1441_v20  ;;  %v1401_v59 = vsel %vm4955_vm3, 0, %v1400_v6  ;;  %v1404_v28 = vsel %vm4955_vm3, 0, %v1403_v63  ;;  %v1360_v44 = vsel %vm5314_vm9, %v5322_v43, %v1359_v9 }
 0x542   : > { %1748 = vst.msk [vmem:[#allocation5 + $0x38] sm:$0xf] %vm1335_vm7, %v1740_v30  ;;  %1340 = vst [vmem:[#allocation2 + $0x8] sm:$0xf] %v1339_v23  ;;  %v1415_v31 = vld [vmem:[#allocation2 + $0x38] sm:$0x1]  ;;  %v1443_v58 = vadd.f32 %v1435_v14, %v5280_v10  ;;  %v1450_v56 = vpack.c.bf16 %v1442_v22, %v1442_v22  ;;  %v1501_v0 = vmul.f32 %v4040_v11, %v5273_v61 }
 0x543   : > { %1457 = vst.msk [vmem:[#allocation3 + $0x20] sm:$0xf] %vm1335_vm7, %v1448_v15  ;;  %1402 = vst [vmem:[#allocation2 + $0x10] sm:$0x1] %v1401_v59  ;;  %v1410_v40 = vsel %vm4955_vm3, 0, %v1409_v7  ;;  %v1413_v41 = vsel %vm4955_vm3, 0, %v1412_v25  ;;  %v1502_v32 = vmul.f32 %v5273_v61, %v5904_v42  ;;  %v1345_v52 = vsel %vm4955_vm3, %v1261_v45, %v1344_v33 }
 0x544   : > { %1405 = vst [vmem:[#allocation2 + $0x18] sm:$0x1] %v1404_v28  ;;  %1361 = vst [vmem:[#allocation2 + $0x20] sm:$0xf] %v1360_v44  ;;  %v1498_v43 = vld [vmem:[%s4924_s29 + $0x28] sm:$0xff]  ;;  %v1416_v27 = vsel %vm4955_vm3, 0, %v1415_v31  ;;  %v1451_v12 = vpack.c.bf16 %v1443_v58, %v1443_v58  ;;  %v1503_v39 = vmul.f32 %v1495_v26, %v5273_v61  ;;  %v1504_v24 = vmul.f32 %v1496_v13, %v5273_v61 }
 0x545   : > { %1458 = vst.msk [vmem:[#allocation3 + $0x28] sm:$0xf] %vm1335_vm7, %v1449_v16  ;;  %1411 = vst [vmem:[#allocation2 + $0x28] sm:$0x1] %v1410_v40  ;;  %v1505_v45 = vmul.f32 %v1497_v34, %v5273_v61  ;;  %v4007_v17 = vld [vmem:[#allocation3] ss:$8 sps:$4 sm:$0xff]   ;;  %v1509_v57 = vadd.f32 %v1501_v0, %v5280_v10  ;;  %v1510_v21 = vadd.f32 %v1502_v32, %v5280_v10 }
 0x546   : > { %1414 = vst [vmem:[#allocation2 + $0x30] sm:$0x1] %v1413_v41  ;;  %1459 = vst.msk [vmem:[#allocation3 + $0x30] sm:$0xf] %vm1335_vm7, %v1450_v56  ;;  %v1506_v50 = vmul.f32 %v1498_v43, %v5273_v61  ;;  %v1507_v4 = vmul.f32 %v1499_v19, %v5273_v61  ;;  %v1511_v47 = vadd.f32 %v1503_v39, %v5280_v10  ;;  %v1712_v49 = vld [vmem:[%s4927_s19 + $0x18] sm:$0xff]  ;;  %3697 = vmatprep.mubr.msk.bf16.mxu0 %vm615_vm4, %v4007_v17  ;;  %v5452_v6 = vld [vmem:[#allocation20 + $0x30] sm:$0xff]  }
 0x547   : > { %1417 = vst [vmem:[#allocation2 + $0x38] sm:$0x1] %v1416_v27  ;;  %1346 = vst [vmem:[#allocation2 + $0xc] sm:$0x1] %v1345_v52  ;;  %v1512_v18 = vadd.f32 %v1504_v24, %v5280_v10  ;;  %v1513_v48 = vadd.f32 %v1505_v45, %v5280_v10  ;;  %v4008_v53 = vld [vmem:[#allocation5 + $0x20] ss:$8 sps:$4 sm:$0xff]   ;;  %v5450_v54 = vpack.c.bf16 %v1509_v57, %v1509_v57 }
 0x548   : > { %1460 = vst.msk [vmem:[#allocation3 + $0x38] sm:$0xf] %vm1335_vm7, %v1451_v12  ;;  %v1514_v63 = vadd.f32 %v1506_v50, %v5280_v10  ;;  %v5455_v9 = vld [vmem:[#allocation20 + $0x10] sm:$0xff]   ;;  %v5457_v37 = vld [vmem:[#allocation2 + $0x14] sm:$0x1]  ;;  %v1508_v3 = vmul.f32 %v1500_v1, %v5273_v61  ;;  %v2041_v20 = vsel %vm5429_vm12, %v5275_v62, %v5277_v51  ;;  %v5465_v7 = vadd.f32 %v1507_v4, %v5280_v10 }
 0x549   : > { %v4009_v30 = vld [vmem:[#allocation3 + $0x10] ss:$8 sps:$4 sm:$0xff]   ;;  %3741 = vmatprep.mubr.msk.bf16.mxu1 %vm615_vm4, %v4008_v53  ;;  %v4010_v15 = vld [vmem:[#allocation5 + $0x30] ss:$8 sps:$4 sm:$0xff]   ;;  %v5468_v60 = vpack.c.bf16 %v1510_v21, %v1510_v21  ;;  %v1717_v22 = vmul.f32 %v1709_v5, %v5273_v61  ;;  %v1718_v23 = vmul.f32 %v1710_v8, %v5273_v61  ;;  %v5476_v26 = vpack.c.bf16 %v1511_v47, %v1511_v47  ;;  %v1632_v19 = vld [vmem:[#allocation4 + $0x4] sm:$0x1] }
 0x54a   : > { %v5471_v14 = vadd.f32 %v1508_v3, %v5280_v10  ;;  %3698 = vmatmul.mubr.msk.bf16.vlgmr.msra.gmra.mrb[4].mxu0 %vm615_vm4, %v4009_v30  ;;  %v1397_v33 = vld [vmem:[#allocation2 + $0x8] sm:$0x1]  ;;  %v1719_v16 = vmul.f32 %v1711_v46, %v5273_v61  ;;  %v1720_v59 = vmul.f32 %v1712_v49, %v5273_v61  ;;  %v1436_v28 = vmul.f32 %v1428_v29, %v5273_v61  ;;  %v1629_v11 = vld [vmem:[#allocation4] sm:$0xf]  ;;  %v1635_v5 = vld [vmem:[#allocation4 + $0x8] sm:$0xf] }
 0x54b   : > { %3742 = vmatmul.mubr.msk.bf16.vlgmr.msra.gmra.mrb[4].mxu1 %vm615_vm4, %v4010_v15  ;;  %3706 = vmatpush3.bf16.msra.mxu0 %v5261_v38  ;;  %v1398_v44 = vsel %vm4955_vm3, 0, %v1397_v33  ;;  %v1550_v31 = vshrl.u32 %v5450_v54, 16  ;;  %v5486_v13 = vpack.c.bf16 %v1512_v18, %v1512_v18  ;;  %v1725_v34 = vadd.f32 %v1717_v22, %v5280_v10  ;;  %v1406_v58 = vld [vmem:[#allocation2 + $0x20] sm:$0x1]  ;;  %v1638_v8 = vld [vmem:[#allocation4 + $0xc] sm:$0x1] }
 0x54c   : > { %v4011_v25 = vld [vmem:[#allocation3 + $0x20] ss:$8 sps:$4 sm:$0xff]   ;;  %1399 = vst [vmem:[#allocation2 + $0x8] sm:$0x1] %v1398_v44  ;;  %3746 = vmatpush3.bf16.msra.mxu1 %v5266_v36  ;;  %v2066_v61 = vshll.u32 %v5457_v37, 16  ;;  %v1726_v56 = vadd.f32 %v1718_v23, %v5280_v10  ;;  %v1727_v38 = vadd.f32 %v1719_v16, %v5280_v10  ;;  %v1728_v40 = vadd.f32 %v1720_v59, %v5280_v10 }
 0x54d   : > { %3701 = vmatprep.mubr.msk.bf16.mxu0 %vm615_vm4, %v4011_v25  ;;  %v1407_v41 = vsel %vm4955_vm3, 0, %v1406_v58  ;;  %v1552_v43 = vrot.slane %v1550_v31, 7  ;;  %3755 = vmatprep.subr.bf16.mxu1 %v5452_v6  ;;  %v1733_v27 = vpack.c.bf16 %v1725_v34, %v1725_v34  ;;  %v5500_v36 = vadd.f32 %v1436_v28, %v5280_v10  ;;  %v1644_v49 = vld [vmem:[#allocation4 + $0x14] sm:$0x1]  ;;  %v1647_v29 = vld [vmem:[#allocation4 + $0x18] sm:$0xf] }
 0x54e   : > { %3715 = vmatprep.subr.bf16.mxu0 %v5455_v9  ;;  %1408 = vst [vmem:[#allocation2 + $0x20] sm:$0x1] %v1407_v41  ;;  %v5502_v0 = vpack.c.bf16 %v1513_v48, %v1513_v48  ;;  %v1734_v42 = vpack.c.bf16 %v1726_v56, %v1726_v56  ;;  %v1735_v32 = vpack.c.bf16 %v1727_v38, %v1727_v38  ;;  %v1553_v12 = vshll.u32 %v5450_v54, 16  ;;  %v2012_v17 = vld [vmem:[#allocation2 + $0xc] sm:$0x1] }
 0x54f   : > { %v1736_v52 = vpack.c.bf16 %v1728_v40, %v1728_v40  ;;  %v4012_v1 = vld [vmem:[#allocation3 + $0x30] ss:$8 sps:$4 sm:$0xff]   ;;  %v1556_v39 = vrot.slane %v1552_v43, 4  ;;  %v1558_v24 = vshrl.u32 %v5468_v60, 16  ;;  %v5506_v45 = vpack.c.bf16 %v1514_v63, %v1514_v63  ;;  %1741 = vst.msk [vmem:[#allocation5] sm:$0xf] %vm1335_vm7, %v1733_v27 }
 0x550   : > { %v1561_v10 = vshll.u32 %v5468_v60, 16  ;;  %v1566_v57 = vshrl.u32 %v5476_v26, 16  ;;  %v1569_v21 = vshll.u32 %v5476_v26, 16  ;;  %v1574_v50 = vshrl.u32 %v5486_v13, 16  ;;  %1742 = vst.msk [vmem:[#allocation5 + $0x8] sm:$0xf] %vm1335_vm7, %v1734_v42 }
 0x551   : > { %1743 = vst.msk [vmem:[#allocation5 + $0x10] sm:$0xf] %vm1335_vm7, %v1735_v32  ;;  %1744 = vst.msk [vmem:[#allocation5 + $0x18] sm:$0xf] %vm1335_vm7, %v1736_v52  ;;  %v1555_v4 = vor.u32 %v1553_v12, %v1552_v43  ;;  %v1560_v46 = vrot.slane %v1558_v24, 7  ;;  %v1633_v47 = vsel %vm4955_vm3, %v1556_v39, %v1632_v19  ;;  %v1577_v18 = vshll.u32 %v5486_v13, 16 }
 0x552   : > { %v1641_v48 = vld [vmem:[#allocation4 + $0x10] sm:$0xf]  ;;  %3702 = vmatmul.mubr.msk.bf16.gmra.mrb[8].mxu0 %vm615_vm4, %v4012_v1  ;;  %1634 = vst [vmem:[#allocation4 + $0x4] sm:$0x1] %v1633_v47  ;;  %v2052_v53 = vshll.u32 %v2012_v17, 16  ;;  %v1568_v54 = vrot.slane %v1566_v57, 7 }
 0x553   : > { %v1576_v63 = vrot.slane %v1574_v50, 7  ;;  %v1650_v3 = vld [vmem:[#allocation4 + $0x1c] sm:$0x1]  ;;  %v1582_v30 = vshrl.u32 %v5502_v0, 16  ;;  %v4014_v15 = vld [vmem:[#allocation2] ss:$8 sps:$4 sm:$0xff]   ;;  %v1563_v60 = vor.u32 %v1561_v10, %v1560_v46  ;;  %v1630_v23 = vsel %vm5314_vm9, %v1555_v4, %v1629_v11 }
 0x554   : > { %v1564_v22 = vrot.slane %v1560_v46, 4  ;;  %v1585_v25 = vshll.u32 %v5502_v0, 16  ;;  %1631 = vst [vmem:[#allocation4] sm:$0xf] %v1630_v23  ;;  %v2011_v33 = vld [vmem:[#allocation2 + $0x8] sm:$0xf]  ;;  %v1571_v26 = vor.u32 %v1569_v21, %v1568_v54  ;;  %3707 = vmatprep.mubr.msk.bf16.mxu0 %vm615_vm4, %v4014_v15 }
 0x555   : > { %v1572_v16 = vrot.slane %v1568_v54, 4  ;;  %v1579_v59 = vor.u32 %v1577_v18, %v1576_v63  ;;  %v1580_v28 = vrot.slane %v1576_v63, 4  ;;  %v1636_v44 = vsel %vm5314_vm9, %v1563_v60, %v1635_v5  ;;  %v2013_v58 = vld [vmem:[#allocation2 + $0x10] sm:$0xf]  ;;  %v1656_v52 = vld [vmem:[#allocation4 + $0x24] sm:$0x1] }
 0x556   : > { %v1639_v31 = vsel %vm4955_vm3, %v1564_v22, %v1638_v8  ;;  %v2043_v13 = vshrl.u32 %v2011_v33, 16  ;;  %v2046_v34 = vshll.u32 %v2011_v33, 16  ;;  %v4015_v56 = vld [vmem:[#allocation2 + $0x10] ss:$8 sps:$4 sm:$0xff]   ;;  %1637 = vst [vmem:[#allocation4 + $0x8] sm:$0xf] %v1636_v44  ;;  %v1642_v38 = vsel %vm5314_vm9, %v1571_v26, %v1641_v48 }
 0x557   : > { %1640 = vst [vmem:[#allocation4 + $0xc] sm:$0x1] %v1639_v31  ;;  %v1645_v40 = vsel %vm4955_vm3, %v1572_v16, %v1644_v49  ;;  %v1648_v41 = vsel %vm5314_vm9, %v1579_v59, %v1647_v29  ;;  %v1651_v43 = vsel %vm4955_vm3, %v1580_v28, %v1650_v3  ;;  %v1653_v19 = vld [vmem:[#allocation4 + $0x20] sm:$0xf]  ;;  %1643 = vst [vmem:[#allocation4 + $0x10] sm:$0xf] %v1642_v38 }
 0x558   : > { %v5537_v27 = vld [vmem:[#allocation20 + $0x18] sm:$0xff]   ;;  %v2045_v11 = vrot.slane %v2043_v13, 4  ;;  %v2048_v0 = vrot.slane %v2046_v34, 5  ;;  %1646 = vst [vmem:[#allocation4 + $0x14] sm:$0x1] %v1645_v40  ;;  %v1584_v42 = vrot.slane %v1582_v30, 7  ;;  %v1452_v13 = vpack.c.bf16 %v5500_v36, %v5500_v36 }
 0x559   : > { %1649 = vst [vmem:[#allocation4 + $0x18] sm:$0xf] %v1648_v41  ;;  %1652 = vst [vmem:[#allocation4 + $0x1c] sm:$0x1] %v1651_v43  ;;  %v1590_v32 = vshrl.u32 %v5506_v45, 16  ;;  %v2054_v39 = vrot.slane %v2052_v53, 5 }
 0x55a   : > { %v5540_v1 = vld [vmem:[#allocation2 + $0x18] sm:$0xf]  ;;  %v4017_v12 = vld [vmem:[#allocation2 + $0x20] ss:$8 sps:$4 sm:$0xff]   ;;  %v1593_v24 = vshll.u32 %v5506_v45, 16  ;;  %v2057_v8 = vshrl.u32 %v2013_v58, 16  ;;  %v2049_v21 = vor.u32 %v2048_v0, %v2045_v11  ;;  %v1587_v50 = vor.u32 %v1585_v25, %v1584_v42  ;;  %3708 = vmatmul.mubr.msk.bf16.vlgmr.msra.gmra.mrb[4].mxu0 %vm615_vm4, %v4015_v56 }
 0x55b   : > { %v1659_v10 = vld [vmem:[#allocation4 + $0x28] sm:$0xf]  ;;  %v1662_v5 = vld [vmem:[#allocation4 + $0x2c] sm:$0x1]  ;;  %v2060_v17 = vshll.u32 %v2013_v58, 16  ;;  %v1588_v4 = vrot.slane %v1584_v42, 4  ;;  %3711 = vmatprep.mubr.msk.bf16.mxu0 %vm615_vm4, %v4017_v12  ;;  %3716 = vmatpush3.bf16.msra.mxu0 %v5455_v9 }
 0x55c   : > { %v2491_v57 = vld [vmem:[#allocation4 + $0x4] sm:$0x1]  ;;  %v1592_v46 = vrot.slane %v1590_v32, 7  ;;  %v2059_v18 = vrot.slane %v2057_v8, 4  ;;  %v5546_v49 = vrot.slane %v2066_v61, 5  ;;  %v2050_v29 = vrot.slane %v2049_v21, 4  ;;  %3725 = vmatprep.subr.bf16.mxu0 %v5537_v27 }
 0x55d   : > { %v2516_v47 = vshll.u32 %v2491_v57, 16  ;;  %v2062_v48 = vrot.slane %v2060_v17, 5  ;;  %v1682_v45 = vld [vmem:[#allocation4] sm:$0x1]  ;;  %v1654_v63 = vsel %vm5314_vm9, %v1587_v50, %v1653_v19  ;;  %v1657_v37 = vsel %vm4955_vm3, %v1588_v4, %v1656_v52  ;;  %v2016_v61 = vld [vmem:[#allocation2 + $0x1c] sm:$0x1] }
 0x55e   : > { %v1595_v53 = vor.u32 %v1593_v24, %v1592_v46  ;;  %v1596_v54 = vrot.slane %v1592_v46, 4  ;;  %v1683_v3 = vsel %vm4955_vm3, 0, %v1682_v45  ;;  %1655 = vst [vmem:[#allocation4 + $0x20] sm:$0xf] %v1654_v63  ;;  %v2071_v15 = vshrl.u32 %v5540_v1, 16 }
 0x55f   : > { %v2063_v30 = vor.u32 %v2062_v48, %v2059_v18  ;;  %v2017_v60 = vld [vmem:[#allocation2 + $0x20] sm:$0xf]  ;;  %1684 = vst [vmem:[#allocation4] sm:$0x1] %v1683_v3  ;;  %v1685_v22 = vld [vmem:[#allocation4 + $0x8] sm:$0x1]  ;;  %v2055_v9 = vsel %vm5429_vm12, %v2050_v29, %v2054_v39  ;;  %v5599_v4 = vpack.c.bf16 %v5465_v7, %v5465_v7  ;;  %v5603_v46 = vpack.c.bf16 %v5471_v14, %v5471_v14 }
 0x560   : > { %v2493_v23 = vld [vmem:[#allocation4 + $0xc] sm:$0x1]  ;;  %v5558_v25 = vrot.slane %v2516_v47, 5  ;;  %1658 = vst [vmem:[#allocation4 + $0x24] sm:$0x1] %v1657_v37  ;;  %v1660_v33 = vsel %vm5314_vm9, %v1595_v53, %v1659_v10  ;;  %v1663_v26 = vsel %vm4955_vm3, %v1596_v54, %v1662_v5  ;;  %v1686_v59 = vsel %vm4955_vm3, 0, %v1685_v22 }
 0x561   : > { %v2018_v16 = vld [vmem:[#allocation2 + $0x24] sm:$0x1]  ;;  %v2530_v28 = vshll.u32 %v2493_v23, 16  ;;  %v1688_v44 = vld [vmem:[#allocation4 + $0x10] sm:$0x1]  ;;  %v3526_v34 = vcombine.low %v2041_v20, %v2055_v9  ;;  %v5579_v19 = vrot.slane %v2063_v30, 4 }
 0x562   : > { %v1691_v31 = vld [vmem:[#allocation4 + $0x18] sm:$0x1]  ;;  %1661 = vst [vmem:[#allocation4 + $0x28] sm:$0xf] %v1660_v33  ;;  %1664 = vst [vmem:[#allocation4 + $0x2c] sm:$0x1] %v1663_v26 }
 0x563   : > { %1687 = vst [vmem:[#allocation4 + $0x8] sm:$0x1] %v1686_v59  ;;  %v1689_v58 = vsel %vm4955_vm3, 0, %v1688_v44  ;;  %v1692_v56 = vsel %vm4955_vm3, 0, %v1691_v31  ;;  %v2495_v38 = vld [vmem:[#allocation4 + $0x14] sm:$0x1]  ;;  %v2069_v29 = vsel %vm5429_vm12, %v5579_v19, %v5546_v49 }
 0x564   : > { %v2497_v40 = vld [vmem:[#allocation4 + $0x1c] sm:$0x1]  ;;  %v4018_v41 = vld [vmem:[#allocation2 + $0x30] ss:$8 sps:$4 sm:$0xff]   ;;  %1690 = vst [vmem:[#allocation4 + $0x10] sm:$0x1] %v1689_v58 }
 0x565   : > { %1693 = vst [vmem:[#allocation4 + $0x18] sm:$0x1] %v1692_v56  ;;  %v2544_v43 = vshll.u32 %v2495_v38, 16  ;;  %v2558_v36 = vshll.u32 %v2497_v40, 16  ;;  %v2073_v11 = vrot.slane %v2071_v15, 4  ;;  %v2074_v62 = vshll.u32 %v5540_v1, 16  ;;  %3712 = vmatmul.mubr.msk.bf16.gmra.mrb[8].mxu0 %vm615_vm4, %v4018_v41 }
 0x566   : > { %1461 = vst.msk [vmem:[#allocation3 + $0x40] sm:$0xf] %vm1335_vm7, %v1452_v13  ;;  %v2080_v51 = vshll.u32 %v2016_v61, 16  ;;  %v2085_v20 = vshrl.u32 %v2017_v60, 16  ;;  %v2088_v0 = vshll.u32 %v2017_v60, 16  ;;  %v5584_v42 = vrot.slane %v2530_v28, 5  ;;  %3717 = vmatprep.mubr.msk.bf16.mxu0 %vm615_vm4, %v3526_v34 }
 0x567   : > { %v5586_v32 = vrot.slane %v2544_v43, 5  ;;  %v5588_v52 = vrot.slane %v2558_v36, 5  ;;  %v2094_v12 = vshll.u32 %v2018_v16, 16  ;;  %v1694_v39 = vld [vmem:[#allocation4 + $0x20] sm:$0x1]  ;;  %v2076_v24 = vrot.slane %v2074_v62, 5 }
 0x568   : > { %v2082_v10 = vrot.slane %v2080_v51, 5  ;;  %v5591_v5 = vld [vmem:[#allocation2 + $0x28] sm:$0xf]  ;;  %v2087_v1 = vrot.slane %v2085_v20, 4  ;;  %v2090_v8 = vrot.slane %v2088_v0, 5  ;;  %v1695_v57 = vsel %vm4955_vm3, 0, %v1694_v39 }
 0x569   : > { %v2490_v17 = vld [vmem:[#allocation4] sm:$0xf]  ;;  %v2499_v21 = vld [vmem:[#allocation4 + $0x24] sm:$0x1]  ;;  %v5595_v50 = vrot.slane %v2094_v12, 5  ;;  %v2077_v53 = vor.u32 %v2076_v24, %v2073_v11  ;;  %v2099_v49 = vshrl.u32 %v5591_v5, 16 }
 0x56a   : > { %v2507_v47 = vshrl.u32 %v2490_v17, 16  ;;  %v2510_v18 = vshll.u32 %v2490_v17, 16  ;;  %1696 = vst [vmem:[#allocation4 + $0x20] sm:$0x1] %v1695_v57  ;;  %v1697_v48 = vld [vmem:[#allocation4 + $0x28] sm:$0x1]  ;;  %v2091_v37 = vor.u32 %v2090_v8, %v2087_v1 }
 0x56b   : > { %v2501_v45 = vld [vmem:[#allocation4 + $0x2c] sm:$0x1]  ;;  %v2492_v54 = vld [vmem:[#allocation4 + $0x8] sm:$0xf]  ;;  %v1698_v7 = vsel %vm4955_vm3, 0, %v1697_v48  ;;  %v2572_v63 = vshll.u32 %v2499_v21, 16 }
 0x56c   : > { %v2586_v3 = vshll.u32 %v2501_v45, 16  ;;  %v2509_v14 = vrot.slane %v2507_v47, 4  ;;  %v2512_v61 = vrot.slane %v2510_v18, 5  ;;  %v2521_v30 = vshrl.u32 %v2492_v54, 16  ;;  %v2494_v60 = vld [vmem:[#allocation4 + $0x10] sm:$0xf] }
 0x56d   : > { %v2524_v15 = vshll.u32 %v2492_v54, 16  ;;  %1699 = vst [vmem:[#allocation4 + $0x28] sm:$0x1] %v1698_v7  ;;  %v2496_v22 = vld [vmem:[#allocation4 + $0x18] sm:$0xf]  ;;  %v2535_v23 = vshrl.u32 %v2494_v60, 16 }
 0x56e   : > { %v2538_v9 = vshll.u32 %v2494_v60, 16  ;;  %v5611_v33 = vrot.slane %v2572_v63, 5  ;;  %v2513_v26 = vor.u32 %v2512_v61, %v2509_v14  ;;  %v2523_v16 = vrot.slane %v2521_v30, 4  ;;  %v2020_v8 = vld [vmem:[#allocation2 + $0x2c] sm:$0x1]  ;;  %v5641_v14 = vld [vmem:[#allocation20 + $0x20] sm:$0xff]  }
 0x56f   : > { %v2526_v59 = vrot.slane %v2524_v15, 5  ;;  %v2549_v28 = vshrl.u32 %v2496_v22, 16  ;;  %v2537_v44 = vrot.slane %v2535_v23, 4  ;;  %v2552_v13 = vshll.u32 %v2496_v22, 16  ;;  %v2021_v7 = vld [vmem:[#allocation2 + $0x30] sm:$0xf] }
 0x570   : > { %v2540_v31 = vrot.slane %v2538_v9, 5  ;;  %v2078_v34 = vrot.slane %v2077_v53, 4  ;;  %v2514_v58 = vrot.slane %v2513_v26, 4  ;;  %v5614_v40 = vrot.slane %v2586_v3, 5  ;;  %v5645_v15 = vld [vmem:[#allocation20 + $0x38] sm:$0xff]  }
 0x571   : > { %v2527_v56 = vor.u32 %v2526_v59, %v2523_v16  ;;  %v2551_v38 = vrot.slane %v2549_v28, 4  ;;  %v2554_v43 = vrot.slane %v2552_v13, 5  ;;  %v2498_v36 = vld [vmem:[#allocation4 + $0x20] sm:$0xf]  ;;  %v5618_v11 = vrot.slane %v2091_v37, 4 }
 0x572   : > { %v2541_v41 = vor.u32 %v2540_v31, %v2537_v44  ;;  %v2083_v19 = vsel %vm5429_vm12, %v2078_v34, %v2082_v10  ;;  %v2519_v62 = vsel %vm5429_vm12, %v2514_v58, %v5558_v25  ;;  %v2563_v20 = vshrl.u32 %v2498_v36, 16  ;;  %v1668_v9 = vld [vmem:[#allocation4 + $0x34] sm:$0x1]  ;;  %v1671_v16 = vld [vmem:[#allocation4 + $0x38] sm:$0xf] }
 0x573   : > { %v2528_v51 = vrot.slane %v2527_v56, 4  ;;  %v2566_v0 = vshll.u32 %v2498_v36, 16  ;;  %v2555_v39 = vor.u32 %v2554_v43, %v2551_v38  ;;  %v3527_v1 = vcombine.low %v2069_v29, %v2083_v19  ;;  %v1674_v59 = vld [vmem:[#allocation4 + $0x3c] sm:$0x1]  ;;  %v2022_v58 = vld [vmem:[#allocation2 + $0x34] sm:$0x1] }
 0x574   : > { %v2542_v12 = vrot.slane %v2541_v41, 4  ;;  %v2500_v24 = vld [vmem:[#allocation4 + $0x28] sm:$0xf]  ;;  %v2101_v17 = vrot.slane %v2099_v49, 4  ;;  %v2565_v10 = vrot.slane %v2563_v20, 4  ;;  %v2097_v54 = vsel %vm5429_vm12, %v5618_v11, %v5595_v50 }
 0x575   : > { %v2533_v57 = vsel %vm5429_vm12, %v2528_v51, %v5584_v42  ;;  %v2568_v21 = vrot.slane %v2566_v0, 5  ;;  %v2577_v47 = vshrl.u32 %v2500_v24, 16  ;;  %v2556_v48 = vrot.slane %v2555_v39, 4  ;;  %3718 = vmatmul.mubr.msk.bf16.vlgmr.msra.gmra.mrb[4].mxu0 %vm615_vm4, %v3527_v1  ;;  %v2023_v19 = vld [vmem:[#allocation2 + $0x38] sm:$0xf] }
 0x576   : > { %v3553_v18 = vcombine.low %v2519_v62, %v2533_v57  ;;  %v2547_v25 = vsel %vm5429_vm12, %v2542_v12, %v5586_v32  ;;  %v2580_v45 = vshll.u32 %v2500_v24, 16  ;;  %v2102_v42 = vshll.u32 %v5591_v5, 16  ;;  %3726 = vmatpush3.bf16.msra.mxu0 %v5537_v27  ;;  %v1665_v27 = vld [vmem:[#allocation4 + $0x30] sm:$0xf]  ;;  %v2024_v24 = vld [vmem:[#allocation2 + $0x3c] sm:$0x1] }
 0x577   : > { %v2569_v53 = vor.u32 %v2568_v21, %v2565_v10  ;;  %v2579_v29 = vrot.slane %v2577_v47, 4  ;;  %v2561_v32 = vsel %vm5429_vm12, %v2556_v48, %v5588_v52  ;;  %v2108_v3 = vshll.u32 %v2020_v8, 16  ;;  %3735 = vmatprep.subr.bf16.mxu0 %v5641_v14  ;;  %v1418_v0 = vld [vmem:[#allocation2 + $0x40] sm:$0x1] }
 0x578   : > { %3747 = vmatprep.mubr.msk.bf16.mxu1 %vm615_vm4, %v3553_v18  ;;  %v2582_v63 = vrot.slane %v2580_v45, 5  ;;  %v1598_v37 = vshrl.u32 %v5599_v4, 16  ;;  %v3554_v50 = vcombine.low %v2547_v25, %v2561_v32  ;;  %v2104_v5 = vrot.slane %v2102_v42, 5 }
 0x579   : > { %v2570_v61 = vrot.slane %v2569_v53, 4  ;;  %v1601_v30 = vshll.u32 %v5599_v4, 16  ;;  %v1606_v52 = vshrl.u32 %v5603_v46, 16  ;;  %v1609_v23 = vshll.u32 %v5603_v46, 16 }
 0x57a   : > { %v2583_v60 = vor.u32 %v2582_v63, %v2579_v29  ;;  %v1600_v22 = vrot.slane %v1598_v37, 7  ;;  %3748 = vmatmul.mubr.msk.bf16.vlgmr.msra.gmra.mrb[8].mxu1 %vm615_vm4, %v3554_v50  ;;  %v2105_v26 = vor.u32 %v2104_v5, %v2101_v17  ;;  %v2113_v4 = vshrl.u32 %v2021_v7, 16 }
 0x57b   : > { %v2575_v49 = vsel %vm5429_vm12, %v2570_v61, %v5611_v33  ;;  %v2116_v28 = vshll.u32 %v2021_v7, 16  ;;  %3756 = vmatpush3.bf16.msra.mxu1 %v5452_v6  ;;  %v1608_v34 = vrot.slane %v1606_v52, 7  ;;  %v2110_v56 = vrot.slane %v2108_v3, 5  ;;  %v4023_v3 = vld [vmem:[#allocation4] ss:$8 sps:$4 sm:$0xff]  }
 0x57c   : > { %v2584_v44 = vrot.slane %v2583_v60, 4  ;;  %v1603_v31 = vor.u32 %v1601_v30, %v1600_v22  ;;  %v1604_v13 = vrot.slane %v1600_v22, 4  ;;  %v2106_v46 = vrot.slane %v2105_v26, 4  ;;  %3765 = vmatprep.subr.bf16.mxu1 %v5645_v15 }
 0x57d   : > { %v2115_v38 = vrot.slane %v2113_v4, 4  ;;  %v2118_v41 = vrot.slane %v2116_v28, 5  ;;  %v1611_v43 = vor.u32 %v1609_v23, %v1608_v34  ;;  %v1612_v36 = vrot.slane %v1608_v34, 4 }
 0x57e   : > { %v2589_v33 = vsel %vm5429_vm12, %v2584_v44, %v5614_v40  ;;  %v1666_v6 = vsel %vm5314_vm9, %v1603_v31, %v1665_v27  ;;  %v2111_v62 = vsel %vm5429_vm12, %v2106_v46, %v2110_v56  ;;  %v1669_v51 = vsel %vm4955_vm3, %v1604_v13, %v1668_v9  ;;  %v4027_v9 = vld [vmem:[#allocation4 + $0x10] ss:$8 sps:$4 sm:$0xff]  }
 0x57f   : > { %v3555_v11 = vcombine.low %v2575_v49, %v2589_v33  ;;  %1667 = vst [vmem:[#allocation4 + $0x30] sm:$0xf] %v1666_v6  ;;  %v2119_v20 = vor.u32 %v2118_v41, %v2115_v38  ;;  %v3528_v12 = vcombine.low %v2097_v54, %v2111_v62  ;;  %1670 = vst [vmem:[#allocation4 + $0x34] sm:$0x1] %v1669_v51  ;;  %v2122_v1 = vshll.u32 %v2022_v58, 16 }
 0x580   : > { %v1672_v40 = vsel %vm5314_vm9, %v1611_v43, %v1671_v16  ;;  %v1675_v39 = vsel %vm4955_vm3, %v1612_v36, %v1674_v59  ;;  %v2127_v8 = vshrl.u32 %v2023_v19, 16  ;;  %v2130_v17 = vshll.u32 %v2023_v19, 16  ;;  %v4028_v49 = vld [vmem:[#allocation4 + $0x20] ss:$8 sps:$4 sm:$0xff]   ;;  %v2970_v6 = vld [vmem:[#allocation2 + $0x8] sm:$0xf] }
 0x581   : > { %3751 = vmatprep.mubr.msk.bf16.mxu1 %vm615_vm4, %v3555_v11  ;;  %1673 = vst [vmem:[#allocation4 + $0x38] sm:$0xf] %v1672_v40  ;;  %1676 = vst [vmem:[#allocation4 + $0x3c] sm:$0x1] %v1675_v39  ;;  %3721 = vmatprep.mubr.msk.bf16.mxu0 %vm615_vm4, %v3528_v12  ;;  %v1419_v57 = vsel %vm4955_vm3, 0, %v1418_v0  ;;  %v2120_v10 = vrot.slane %v2119_v20, 4 }
 0x582   : > { %v2129_v21 = vrot.slane %v2127_v8, 4  ;;  %v2132_v35 = vrot.slane %v2130_v17, 5  ;;  %v2136_v47 = vshll.u32 %v2024_v24, 16  ;;  %1420 = vst [vmem:[#allocation2 + $0x40] sm:$0x1] %v1419_v57  ;;  %v2124_v18 = vrot.slane %v2122_v1, 5 }
 0x583   : > { %v4033_v41 = vld [vmem:[#allocation5] ss:$8 sps:$4 sm:$0xff]   ;;  %v4021_v33 = vld [vmem:[#allocation2 + $0x8] ss:$8 sps:$4 sm:$0xff]   ;;  %v2987_v62 = vshrl.u32 %v2970_v6, 16  ;;  %v2990_v51 = vshll.u32 %v2970_v6, 16 }
 0x584   : > { %v2133_v25 = vor.u32 %v2132_v35, %v2129_v21  ;;  %v2125_v53 = vsel %vm5429_vm12, %v2120_v10, %v2124_v18  ;;  %v2138_v54 = vrot.slane %v2136_v47, 5  ;;  %v4024_v43 = vld [vmem:[#allocation2 + $0x18] ss:$8 sps:$4 sm:$0xff]   ;;  %v4025_v19 = vld [vmem:[#allocation2 + $0x28] ss:$8 sps:$4 sm:$0xff]  }
 0x585   : > { %v4032_v36 = vld [vmem:[#allocation20 + $0x40] sm:$0xff]   ;;  %v2972_v11 = vld [vmem:[#allocation2 + $0x10] sm:$0xf]  ;;  %v2989_v12 = vrot.slane %v2987_v62, 4  ;;  %v2992_v40 = vrot.slane %v2990_v51, 5 }
 0x586   : > { %v1700_v48 = vld [vmem:[#allocation4 + $0x30] sm:$0x1]  ;;  %v2134_v29 = vrot.slane %v2133_v25, 4  ;;  %v2503_v37 = vld [vmem:[#allocation4 + $0x34] sm:$0x1]  ;;  %v3001_v20 = vshrl.u32 %v2972_v11, 16 }
 0x587   : > { %v1701_v45 = vsel %vm4955_vm3, 0, %v1700_v48  ;;  %v2600_v60 = vshll.u32 %v2503_v37, 16  ;;  %v3004_v0 = vshll.u32 %v2972_v11, 16  ;;  %v2974_v8 = vld [vmem:[#allocation2 + $0x18] sm:$0xf] }
 0x588   : > { %1702 = vst [vmem:[#allocation4 + $0x30] sm:$0x1] %v1701_v45  ;;  %v1703_v42 = vld [vmem:[#allocation4 + $0x38] sm:$0x1]  ;;  %v2139_v32 = vsel %vm5429_vm12, %v2134_v29, %v2138_v54  ;;  %v2505_v61 = vld [vmem:[#allocation4 + $0x3c] sm:$0x1] }
 0x589   : > { %v1704_v7 = vsel %vm4955_vm3, 0, %v1703_v42  ;;  %v3529_v63 = vcombine.low %v2125_v53, %v2139_v32  ;;  %v2614_v4 = vshll.u32 %v2505_v61, 16  ;;  %v2602_v44 = vrot.slane %v2600_v60, 5  ;;  %v4029_v39 = vld [vmem:[#allocation2 + $0x38] ss:$8 sps:$4 sm:$0xff]  }
 0x58a   : > { %1705 = vst [vmem:[#allocation4 + $0x38] sm:$0x1] %v1704_v7  ;;  %v3003_v24 = vrot.slane %v3001_v20, 4  ;;  %v3006_v1 = vrot.slane %v3004_v0, 5  ;;  %v4030_v17 = vld [vmem:[#allocation3 + $0x8] ss:$8 sps:$4 sm:$0xff]  }
 0x58b   : > { %3722 = vmatmul.mubr.msk.bf16.gmra.mrb[8].mxu0 %vm615_vm4, %v3529_v63  ;;  %v2616_v58 = vrot.slane %v2614_v4, 5  ;;  %v2976_v57 = vld [vmem:[#allocation2 + $0x20] sm:$0xf]  ;;  %v2971_v10 = vld [vmem:[#allocation2 + $0xc] sm:$0x1]  ;;  %v3015_v35 = vshrl.u32 %v2974_v8, 16 }
 0x58c   : > { %3727 = vmatprep.mubr.msk.bf16.mxu0 %vm615_vm4, %v4023_v3  ;;  %v2973_v21 = vld [vmem:[#allocation2 + $0x14] sm:$0x1]  ;;  %v2978_v47 = vld [vmem:[#allocation2 + $0x28] sm:$0xf]  ;;  %v2980_v18 = vld [vmem:[#allocation2 + $0x30] sm:$0xf]  ;;  %v3007_v25 = vor.u32 %v3006_v1, %v3003_v24 }
 0x58d   : > { %v3018_v48 = vshll.u32 %v2974_v8, 16  ;;  %v3029_v45 = vshrl.u32 %v2976_v57, 16  ;;  %v3032_v53 = vshll.u32 %v2976_v57, 16  ;;  %v2996_v29 = vshll.u32 %v2971_v10, 16  ;;  %v4035_v60 = vld [vmem:[#allocation3 + $0x28] ss:$8 sps:$4 sm:$0xff]  }
 0x58e   : > { %v3010_v54 = vshll.u32 %v2973_v21, 16  ;;  %v3043_v42 = vshrl.u32 %v2978_v47, 16  ;;  %v3046_v7 = vshll.u32 %v2978_v47, 16  ;;  %v3057_v32 = vshrl.u32 %v2980_v18, 16  ;;  %v2983_v21 = vld [vmem:[#allocation2 + $0x3c] sm:$0x1] }
 0x58f   : > { %v2502_v50 = vld [vmem:[#allocation4 + $0x30] sm:$0xf]  ;;  %v3060_v63 = vshll.u32 %v2980_v18, 16  ;;  %v3017_v37 = vrot.slane %v3015_v35, 4  ;;  %v3008_v61 = vrot.slane %v3007_v25, 4 }
 0x590   : > { %v2591_v5 = vshrl.u32 %v2502_v50, 16  ;;  %v2594_v30 = vshll.u32 %v2502_v50, 16  ;;  %v4034_v50 = vld [vmem:[#allocation3 + $0x18] ss:$8 sps:$4 sm:$0xff]  }
 0x591   : > { %v2504_v27 = vld [vmem:[#allocation4 + $0x38] sm:$0xf] }
 0x592   : > { %v2593_v22 = vrot.slane %v2591_v5, 4  ;;  %v2596_v2 = vrot.slane %v2594_v30, 5  ;;  %v2605_v52 = vshrl.u32 %v2504_v27, 16  ;;  %v2608_v23 = vshll.u32 %v2504_v27, 16  ;;  %v4031_v56 = vld [vmem:[#allocation4 + $0x30] ss:$8 sps:$4 sm:$0xff]  }
 0x593   : > { %3728 = vmatmul.mubr.msk.bf16.vlgmr.msra.gmra.mrb[4].mxu0 %vm615_vm4, %v4027_v9  ;;  %v3020_v5 = vrot.slane %v3018_v48, 5  ;;  %v3031_v30 = vrot.slane %v3029_v45, 4  ;;  %v3034_v27 = vrot.slane %v3032_v53, 5  ;;  %v3048_v9 = vrot.slane %v3046_v7, 5 }
 0x594   : > { %v2597_v26 = vor.u32 %v2596_v2, %v2593_v22  ;;  %v2607_v16 = vrot.slane %v2605_v52, 4  ;;  %v2610_v59 = vrot.slane %v2608_v23, 5  ;;  %3731 = vmatprep.mubr.msk.bf16.mxu0 %vm615_vm4, %v4028_v49  ;;  %3736 = vmatpush3.bf16.msra.mxu0 %v5641_v14  ;;  %v4036_v14 = vld [vmem:[#allocation5 + $0x10] ss:$8 sps:$4 sm:$0xff]   ;;  %v2998_v22 = vrot.slane %v2996_v29, 5 }
 0x595   : > { %v3012_v2 = vrot.slane %v3010_v54, 5  ;;  %v2982_v52 = vld [vmem:[#allocation2 + $0x38] sm:$0xf]  ;;  %v3045_v23 = vrot.slane %v3043_v42, 4  ;;  %v3059_v49 = vrot.slane %v3057_v32, 4  ;;  %v3080_v53 = vshll.u32 %v2983_v21, 16 }
 0x596   : > { %v2598_v28 = vrot.slane %v2597_v26, 4  ;;  %v2611_v31 = vor.u32 %v2610_v59, %v2607_v16  ;;  %v3062_v26 = vrot.slane %v3060_v63, 5  ;;  %v2984_v16 = vld [vmem:[#allocation2 + $0x40] sm:$0xf] }
 0x597   : > { %v3013_v4 = vsel %vm5429_vm12, %v3008_v61, %v3012_v2  ;;  %v3082_v63 = vrot.slane %v3080_v53, 5 }
 0x598   : > { %v2603_v13 = vsel %vm5429_vm12, %v2598_v28, %v2602_v44  ;;  %v2612_v34 = vrot.slane %v2611_v31, 4  ;;  %v2975_v28 = vld [vmem:[#allocation2 + $0x1c] sm:$0x1]  ;;  %v2977_v44 = vld [vmem:[#allocation2 + $0x24] sm:$0x1]  ;;  %v3021_v31 = vor.u32 %v3020_v5, %v3017_v37 }
 0x599   : > { %v3038_v6 = vshll.u32 %v2977_v44, 16 }
 0x59a   : > { %v2617_v46 = vsel %vm5429_vm12, %v2612_v34, %v2616_v58  ;;  %v2979_v34 = vld [vmem:[#allocation2 + $0x2c] sm:$0x1]  ;;  %v2981_v58 = vld [vmem:[#allocation2 + $0x34] sm:$0x1]  ;;  %v3022_v11 = vrot.slane %v3021_v31, 4 }
 0x59b   : > { %v3556_v38 = vcombine.low %v2603_v13, %v2617_v46  ;;  %3732 = vmatmul.mubr.msk.bf16.gmra.mrb[8].mxu0 %vm615_vm4, %v4031_v56  ;;  %v3035_v13 = vor.u32 %v3034_v27, %v3031_v30  ;;  %v3071_v46 = vshrl.u32 %v2982_v52, 16  ;;  %v3074_v56 = vshll.u32 %v2982_v52, 16 }
 0x59c   : > { %3737 = vmatprep.mubr.msk.bf16.mxu0 %vm615_vm4, %v4033_v41  ;;  %v3088_v41 = vshll.u32 %v2984_v16, 16  ;;  %v3052_v51 = vshll.u32 %v2979_v34, 16  ;;  %v3066_v20 = vshll.u32 %v2981_v58, 16 }
 0x59d   : > { %3752 = vmatmul.mubr.msk.bf16.gmra.mrb[4].mxu1 %vm615_vm4, %v3556_v38  ;;  %v3085_v38 = vshrl.u32 %v2984_v16, 16  ;;  %v3036_v62 = vrot.slane %v3035_v13, 4  ;;  %v3073_v0 = vrot.slane %v3071_v46, 4 }
 0x59e   : > { %3757 = vmatprep.mubr.msk.bf16.mxu1 %vm615_vm4, %v4021_v33  ;;  %v3049_v33 = vor.u32 %v3048_v9, %v3045_v23  ;;  %v3054_v57 = vrot.slane %v3052_v51, 5  ;;  %v3068_v10 = vrot.slane %v3066_v20, 5 }
 0x5a0   : > { %v3050_v24 = vrot.slane %v3049_v33, 4 }
 0x5a2   : > { %v3055_v48 = vsel %vm5429_vm12, %v3050_v24, %v3054_v57 }
 0x5a3   : > { %3738 = vmatmul.mubr.msk.bf16.vlgmr.msra.gmra.mrb[4].mxu0 %vm615_vm4, %v4036_v14  ;;  %v3063_v14 = vor.u32 %v3062_v26, %v3059_v49  ;;  %v3589_v49 = vld [vmem:[#allocation21] ss:$0 sm:$0xff] }
 0x5a5   : > { %3758 = vmatmul.mubr.msk.bf16.vlgmr.msra.gmra.mrb[8].mxu1 %vm615_vm4, %v4024_v43  ;;  %v3064_v1 = vrot.slane %v3063_v14, 4 }
 0x5a6   : > { %3766 = vmatpush3.bf16.msra.mxu1 %v5645_v15  ;;  %3761 = vmatprep.mubr.msk.bf16.mxu1 %vm615_vm4, %v4025_v19  ;;  %v2993_v15 = vor.u32 %v2992_v40, %v2989_v12  ;;  %v4037_v19 = vld [vmem:[#allocation3 + $0x38] ss:$8 sps:$4 sm:$0xff]   ;;  %v3076_v12 = vrot.slane %v3074_v56, 5  ;;  %v3087_v40 = vrot.slane %v3085_v38, 4 }
 0x5a7   : > { %3775 = vmatprep.subr.bf16.mxu1 %v4032_v36  ;;  %v3069_v45 = vsel %vm5429_vm12, %v3064_v1, %v3068_v10 }
 0x5a8   : > { %v2994_v3 = vrot.slane %v2993_v15, 4  ;;  %v2985_v15 = vld [vmem:[#allocation2 + $0x44] sm:$0x1]  ;;  %v3077_v18 = vor.u32 %v3076_v12, %v3073_v0  ;;  %v3582_v42 = vcombine.low %v3055_v48, %v3069_v45 }
 0x5a9   : > { %v3094_v29 = vshll.u32 %v2985_v15, 16 }
 0x5aa   : > { %v2999_v59 = vsel %vm5429_vm12, %v2994_v3, %v2998_v22  ;;  %v3078_v7 = vrot.slane %v3077_v18, 4 }
 0x5ab   : > { %v3580_v43 = vcombine.low %v2999_v59, %v3013_v4  ;;  %v3096_v3 = vrot.slane %v3094_v29, 5 }
 0x5ac   : > { %v3083_v37 = vsel %vm5429_vm12, %v3078_v7, %v3082_v63 }
 0x5ad   : > { %3762 = vmatmul.mubr.msk.bf16.gmra.mrb[4].mxu1 %vm615_vm4, %v4029_v39  ;;  %v3090_v39 = vrot.slane %v3088_v41, 5 }
 0x5ae   : > { %3767 = vmatprep.mubr.msk.bf16.mxu1 %vm615_vm4, %v4030_v17  ;;  %v3040_v17 = vrot.slane %v3038_v6, 5 }
 0x5af   : > { %v3091_v25 = vor.u32 %v3090_v39, %v3087_v40 }
 0x5b0   : > { %v3041_v47 = vsel %vm5429_vm12, %v3036_v62, %v3040_v17 }
 0x5b1   : > { %v3092_v32 = vrot.slane %v3091_v25, 4 }
 0x5b5   : > { %3768 = vmatmul.mubr.msk.bf16.vlgmr.msra.gmra.mrb[8].mxu1 %vm615_vm4, %v4034_v50  ;;  %v3097_v50 = vsel %vm5429_vm12, %v3092_v32, %v3096_v3 }
 0x5b6   : > { %3776 = vmatpush3.bf16.msra.mxu1 %v4032_v36  ;;  %3771 = vmatprep.mubr.msk.bf16.mxu1 %vm615_vm4, %v4035_v60  ;;  %v3024_v36 = vshll.u32 %v2975_v28, 16  ;;  %v3583_v61 = vcombine.low %v3083_v37, %v3097_v50 }
 0x5b8   : > { %v3026_v8 = vrot.slane %v3024_v36, 5 }
 0x5ba   : > { %v3027_v35 = vsel %vm5429_vm12, %v3022_v11, %v3026_v8 }
 0x5bb   : > { %v3581_v54 = vcombine.low %v3027_v35, %v3041_v47 }
 0x5bd   : > { %3772 = vmatmul.mubr.msk.bf16.gmra.mrb[4].mxu1 %vm615_vm4, %v4037_v19 }
 0x5be   : > { %3777 = vmatprep.mubr.msk.bf16.mxu1 %vm615_vm4, %v3580_v43 }
 0x5c5   : > { %3778 = vmatmul.mubr.msk.bf16.vlgmr.msra.gmra.mrb[8].mxu1 %vm615_vm4, %v3581_v54 }
 0x5c6   : > { %3781 = vmatprep.mubr.msk.bf16.mxu1 %vm615_vm4, %v3582_v42 }
 0x5cd   : > { %3782 = vmatmul.mubr.msk.bf16.gmra.mrb[4].mxu1 %vm615_vm4, %v3583_v61 }
 0x66e   : > { %v3733_v5 = vpop.f32.mrb[8].mxu0 }
 0x66f   : > { %v2345_v30 = vpop.f32.mrb[9].mxu0 }
 0x670   : > { %v3734_v27 = vpop.f32.mrb[10].mxu0 }
 0x671   : > { %v2348_v60 = vpop.f32.mrb[11].mxu0 }
 0x676   : > { %v3739_v22 = vpop.f32.mrb[4].mxu0 }
 0x677   : > { %v2451_v2 = vpop.f32.mrb[5].mxu0 }
 0x678   : > { %v3740_v52 = vpop.f32.mrb[6].mxu0 }
 0x679   : > { %v2454_v23 = vpop.f32.mrb[7].mxu0 }
 0x698   : > { %v3779_v9 = vpop.f32.mrb[8].mxu1 }
 0x699   : > { %v3793_v26 = vadd.f32 %v3779_v9, %v3739_v22  ;;  %v3165_v16 = vpop.f32.mrb[9].mxu1 }
 0x69a   : > { %v3794_v59 = vadd.f32 %v3165_v16, %v2451_v2  ;;  %v3780_v4 = vpop.f32.mrb[10].mxu1 }
 0x69b   : > { %v3213_v55 = vadd.f32 %v3793_v26, %v3589_v49  ;;  %v3795_v28 = vadd.f32 %v3780_v4, %v3740_v52  ;;  %v3168_v44 = vpop.f32.mrb[11].mxu1 }
 0x69c   : > { %v3211_v31 = vadd.f32 %v3794_v59, %v3589_v49  ;;  %v3796_v13 = vadd.f32 %v3168_v44, %v2454_v23 }
 0x69d   : > { %3221 = vst [vmem:[%s601_s23 + $0x10] sm:$0xff] %v3213_v55  ;;  %v3214_v34 = vadd.f32 %v3795_v28, %v3589_v49 }
 0x69e   : > { %3219 = vst [vmem:[%s601_s23] sm:$0xff] %v3211_v31  ;;  %v3212_v58 = vadd.f32 %v3796_v13, %v3589_v49 }
 0x69f   : > { %3222 = vst [vmem:[%s601_s23 + $0x18] sm:$0xff] %v3214_v34 }
 0x6a0   : > { %3220 = vst [vmem:[%s601_s23 + $0x8] sm:$0xff] %v3212_v58  ;;  %v3783_v46 = vpop.f32.mrb[4].mxu1 }
 0x6a1   : > { %v3797_v56 = vadd.f32 %v3783_v46, %v3733_v5  ;;  %v3181_v38 = vpop.f32.mrb[5].mxu1 }
 0x6a2   : > { %v3798_v41 = vadd.f32 %v3181_v38, %v2345_v30  ;;  %v3784_v33 = vpop.f32.mrb[6].mxu1 }
 0x6a3   : > { %v3217_v14 = vadd.f32 %v3797_v56, %v3589_v49  ;;  %v3799_v43 = vadd.f32 %v3784_v33, %v3734_v27  ;;  %v3184_v36 = vpop.f32.mrb[7].mxu1 }
 0x6a4   : > { %v3215_v6 = vadd.f32 %v3798_v41, %v3589_v49  ;;  %v3800_v19 = vadd.f32 %v3184_v36, %v2348_v60 }
 0x6a5   : > { %3225 = vst [vmem:[%s601_s23 + $0x30] sm:$0xff] %v3217_v14  ;;  %v3218_v11 = vadd.f32 %v3799_v43, %v3589_v49 }
 0x6a6   : > { %3223 = vst [vmem:[%s601_s23 + $0x20] sm:$0xff] %v3215_v6  ;;  %v3216_v62 = vadd.f32 %v3800_v19, %v3589_v49 }
 0x6a7   : > { %3226 = vst [vmem:[%s601_s23 + $0x38] sm:$0xff] %v3218_v11 }
 0x6a8   : > { %3224 = vst [vmem:[%s601_s23 + $0x28] sm:$0xff] %v3216_v62 }
 0x6a9   : > { %4343 = shalt.err (!%p4340_p8)
}
 0x6aa   : > { %s4344_s26 = scalar_lea.hbm %s5729_s5, 1024  ;;  %s4348_s21 = scalar_lea.hbm %s5909_s4, 2048 }
 0x6ab   : > { %p4345_p6 = scmp.ne.s32.totalorder %s5729_s5, %s4344_s26  ;;  %p4349_p5 = scmp.lt.u32.totalorder %s5729_s5, %s5909_s4 }
 0x6ac   : > { %p4350_p0 = scmp.lt.u32.totalorder %s4348_s21, %s4344_s26  ;;  %p4352_p10 = scmp.lt.u32.totalorder %s4344_s26, %s5729_s5 }
 0x6ad   : > { %p4346_p9 = pnand %p4345_p6, %p5910_p4 }
 0x6ae   : > { %p4351_p7 = por %p4350_p0, %p4349_p5 }
 0x6af   : > { %p4347_p2 = pneg %p4346_p9 }
 0x6b0   : > { %p4353_p12 = por %p4352_p10, %p4351_p7 }
 0x6b2   : > { %p4354_p13 = pnand %p4353_p12, %p4347_p2 }
 0x6b4   : > { %4357 = shalt.err (!%p4354_p13)
}
 0x6b5   : > { %s4457_s7 = smov 128   ;;  %s4458_s19 = smov 8  }
 0x6b6   : > { %3889 = dma.vmem_to_hbm [thread:$0]  (%p5910_p4), %s5724_s28, 1024, %s5729_s5, %s3228_s1, %s4457_s7, %s4457_s7, %s4458_s19  }
 0x6b7 PF: > { %s5911_s27 = sld [smem:[#allocation32_spill]]  ;;  %s5912_s23 = sld [smem:[#allocation41_spill]] }
 0x6b8   : > { %p5914_p3 = scmp.ge.s32.totalorder %s4436_s18, 2 }
 0x6bd   : > { %s3257_s16 = sand.u32 1, %s5911_s27   ;;  %p5913_p1 = scmp.ne.s32.totalorder %s5912_s23, 0 }
 0x6be   : > { %s3258_s30 = scalar_lea.sflag [#allocation8], %s3257_s16 }
 0x6bf   : > { %p3924_p11 = pnand %p5914_p3, %p5913_p1 }
 0x6c1   : > { %4411 = dma.done.wait (!%p3924_p11), %s3258_s30, 1024  }
 0x6c2   : > { %4413 = vsyncadd (!%p3924_p11), %s3258_s30, 4294966272  ;;  %s35_s18 = sadd.s32 1, %s4436_s18   ;;  %s5915_s13 = sld [smem:[#allocation33_spill]] }
 0x6c3   : > { %p32_p8 = scmp.ge.s32.totalorder %s35_s18, 4   ;;  %s5916_s10 = sld [smem:[#allocation40_spill]] }
 0x6c4   : > { %s5917_s16 = sld [smem:[#allocation35_spill]]  ;;  %s5918_s17 = sld [smem:[#allocation37_spill]] }
 0x6c5   : > { %s5919_s14 = smov %s4424_s15  ;;  %34 = sbr.rel (!%p32_p8) target bundleno = 19 (0x13), region = 186 }
 0x6c9   : > { %s5920_s15 = smov %s5916_s10 }
 0x6cc   :  { %3263 = vsyncpa [#allocation7], 1 }
 0x6cd   :  { %3265 = vsyncpa [#allocation7 + $0x1], 1 }
 0x6ce   :  { %3266 = vsyncpa [#allocation10], 1 }
 0x6cf   :  { %3268 = vsyncpa [#allocation10 + $0x1], 1 }
 0x6d0   :  { %3269 = vsyncpa [#allocation13], 1 }
 0x6d1   :  { %3271 = vsyncpa [#allocation13 + $0x1], 1 }
 0x6d2   :  { %3272 = vsyncpa [#allocation16], 1 }
 0x6d3   :  { %3273 = vsyncpa [#allocation19], 1 }
 0x6d4   :  { %3274 = vsyncpa [#allocation22], 1 }
 0x6d5   :  { %3275 = vsyncpa [#allocation8], 1 }
 0x6d6   :  { %3277 = vsyncpa [#allocation8 + $0x1], 1 }

</bundles_post_ra>
